<compile_context>
chip_gen: v6e
topology: v6e:2x2x1
jax: 0.10.0
libtpu: 0.0.40
codegen_flags: <defaults>
</compile_context>

<pallas_src>
import functools

import jax
import jax.numpy as jnp
from jax.experimental import pallas as pl
from jax.experimental.pallas import tpu as pltpu

FEAT = 512            # per-modality embedding dim (text 512 + image 512 = 1024)
HIDDEN = 2 * FEAT     # 1024
NUM_CLASSES = 6
PADC = 128            # classifier dim padded to one full 128-lane vreg
LN_EPS = 1e-5
NEG_BIG = -1e30       # softmax mask for padded classifier columns


def _round_up(x, m):
    return (x + m - 1) // m * m


def _pick_tm(batch):
    """Rows per grid step: multiple of 8, <=256, and >=2 steps when possible."""
    rows = _round_up(max(batch, 1), 8)
    if rows <= 8:
        return 8
    # >=2 steps so v7x's second TensorCore gets work (neutral on v5e/v6e),
    # <=256 rows/step to amortize per-step overhead without bloating VMEM.
    steps = max(2, pl.cdiv(rows, 256))
    return _round_up(pl.cdiv(rows, steps), 8)


def head_kernel(t_ref, i_ref, w1t_ref, w1b_ref, vec_ref, w3_ref,
                logits_ref, probs_ref):
    # Inputs arrive as bf16 (halves the streamed DMA); relu commutes with the
    # downcast, so this matches relu(fp32)->bf16 up to rounding.  The concat
    # of the reference module becomes a split matmul: no extra (TM,1024) copy.
    t = jnp.maximum(t_ref[...], 0.0)        # bf16
    im = jnp.maximum(i_ref[...], 0.0)       # bf16

    b1 = vec_ref[0:1, :]               # (1, 1024) fp32
    gamma = vec_ref[1:2, :]            # (1, 1024) fp32
    beta = vec_ref[2:3, :]             # (1, 1024) fp32
    b3 = vec_ref[3:4, :PADC]           # (1, 128) fp32; cols >= 6 hold -1e30

    # linear1 as two (TM,512)@(512,1024) bf16 dots, fp32 accumulation
    h = (jnp.dot(t, w1t_ref[...], preferred_element_type=jnp.float32)
         + jnp.dot(im, w1b_ref[...], preferred_element_type=jnp.float32)
         + b1)

    # LayerNorm(1024) with one-pass statistics (E[x^2]-mean^2); gamma folded
    # into the rsqrt scale (EUP rsqrt).  Halves the XLU cross-lane reductions.
    inv_n = jnp.float32(1.0 / HIDDEN)
    mean = jnp.sum(h, axis=-1, keepdims=True) * inv_n
    meansq = jnp.sum(h * h, axis=-1, keepdims=True) * inv_n
    var = meansq - mean * mean
    scale = gamma * jax.lax.rsqrt(var + LN_EPS)
    h = (h - mean) * scale + beta

    # dropout(p=0.1) -> identity in eval mode; relu; bf16 for the MXU
    h16 = jnp.maximum(h, 0.0).astype(jnp.bfloat16)

    # linear3 on the padded 128-lane classifier dim (bf16 weights, fp32 acc)
    logits = jnp.dot(h16, w3_ref[...], preferred_element_type=jnp.float32) + b3
    logits_ref[...] = logits

    # softmax over classes (padded columns carry -1e30 -> exp == 0)
    m = jnp.max(logits, axis=1, keepdims=True)
    e = jnp.exp(logits - m)
    denom = jnp.sum(e, axis=1, keepdims=True)
    probs_ref[...] = e * pl.reciprocal(denom, approx=True)


def prepare_head_params(w1_t, b1, gamma, beta, w3_t, b3):
    """Pack PyTorch-style head params for the kernel.

    w1_t : (1024, 1024) Linear(1024,1024).weight transposed to (in, out)
    w3_t : (1024, 6)    Linear(1024, 6).weight transposed to (in, out)
    b1, gamma, beta : (1024,)   b3 : (6,)
    """
    w1_top = w1_t[:FEAT].astype(jnp.bfloat16)    # acts on the text half
    w1_bot = w1_t[FEAT:].astype(jnp.bfloat16)    # acts on the image half
    # Classifier weights in bf16 (single-pass MXU, half the resident VMEM);
    # accumulation stays fp32 in-kernel.
    w3_pad = jnp.zeros((HIDDEN, PADC), jnp.float32).at[:, :NUM_CLASSES].set(
        w3_t.astype(jnp.float32)).astype(jnp.bfloat16)
    # Biases / LN params stay fp32 (fp32 add after the fp32-accumulated dot).
    b3_row = jnp.full((HIDDEN,), NEG_BIG, jnp.float32).at[:NUM_CLASSES].set(
        b3.astype(jnp.float32))
    vecs = jnp.stack([b1, gamma, beta, b3_row], axis=0).astype(jnp.float32)
    return {"w1_top": w1_top, "w1_bot": w1_bot, "vecs": vecs, "w3_pad": w3_pad}


def run_head(t_emb, i_emb, hp):
    B = t_emb.shape[0]
    tm = _pick_tm(B)
    Bp = _round_up(B, tm)

    # bf16 activations into the kernel: halves streamed input DMA per step.
    t_emb = t_emb.astype(jnp.bfloat16)
    i_emb = i_emb.astype(jnp.bfloat16)
    if Bp != B:
        t_emb = jnp.pad(t_emb, ((0, Bp - B), (0, 0)))
        i_emb = jnp.pad(i_emb, ((0, Bp - B), (0, 0)))

    batch_spec = lambda shape: pl.BlockSpec(shape, lambda i: (i, 0))
    # Constant index_map -> weights fetched once and VMEM-resident across the
    # batch grid.  (pipeline_mode=pl.Buffered(1) could halve their double
    # buffer, but total weight VMEM is only ~2.5 MiB so it is not needed.)
    const_spec = lambda shape: pl.BlockSpec(shape, lambda i: (0, 0))

    logits_p, probs_p = pl.pallas_call(
        head_kernel,
        out_shape=(jax.ShapeDtypeStruct((Bp, PADC), jnp.float32),
                   jax.ShapeDtypeStruct((Bp, PADC), jnp.float32)),
        grid=(Bp // tm,),
        in_specs=[
            batch_spec((tm, FEAT)),        # text features, bf16, streamed
            batch_spec((tm, FEAT)),        # image features, bf16, streamed
            const_spec((FEAT, HIDDEN)),    # W1^T top half, bf16, VMEM-resident
            const_spec((FEAT, HIDDEN)),    # W1^T bottom half, bf16, resident
            const_spec((4, HIDDEN)),       # stacked b1 / gamma / beta / b3pad
            const_spec((HIDDEN, PADC)),    # W3^T padded to 128 lanes, bf16
        ],
        out_specs=[batch_spec((tm, PADC)), batch_spec((tm, PADC))],
        compiler_params=pltpu.CompilerParams(
            dimension_semantics=("parallel",)),   # megacore sharding on v7x
    )(t_emb, i_emb, hp["w1_top"], hp["w1_bot"], hp["vecs"], hp["w3_pad"])

    return logits_p[:B, :NUM_CLASSES], probs_p[:B, :NUM_CLASSES]


# TODO(synk): pretrained VisionTextDualEncoderModel ('clip-italian/clip-italian')
# encoders cannot be reproduced without a checkpoint; replaced by deterministic
# stand-in projections producing the same 512-d text / 512-d image features.
def text_features_standin(input_ids, attention_mask, embed_table, text_proj):
    tok = embed_table[input_ids]                                   # (B, S, 512)
    mask = attention_mask.astype(jnp.float32)[..., None]           # (B, S, 1)
    pooled = (tok * mask).sum(axis=1) / jnp.maximum(mask.sum(axis=1), 1.0)
    return jnp.tanh(pooled @ text_proj)                            # (B, 512)


def image_features_standin(pixel_values, image_proj):
    B = pixel_values.shape[0]
    flat = pixel_values.reshape(B, -1)                             # (B, 3*H*W)
    return jnp.tanh(flat @ image_proj)                             # (B, 512)


@jax.jit
def model_forward(input_ids, attention_mask, pixel_values, params):
    # Encoders + head in one jitted program: no extra HBM round-trip or
    # dispatch between the (B,512) embeddings and the Pallas head.
    t_emb = text_features_standin(input_ids, attention_mask,
                                  params["embed_table"], params["text_proj"])
    i_emb = image_features_standin(pixel_values, params["image_proj"])
    return run_head(t_emb, i_emb, params["head"])


if __name__ == "__main__":
    key = jax.random.PRNGKey(0)
    ks = jax.random.split(key, 10)

    B, SEQ, VOCAB = 2, 8, 1000
    C, H, W = 3, 16, 16

    # deterministic "module" parameters (PyTorch layouts, then packed)
    w1 = 0.02 * jax.random.normal(ks[3], (HIDDEN, HIDDEN), jnp.float32)  # (out,in)
    b1 = 0.01 * jax.random.normal(ks[4], (HIDDEN,), jnp.float32)
    gamma = jnp.ones((HIDDEN,), jnp.float32)
    beta = jnp.zeros((HIDDEN,), jnp.float32)
    w3 = 0.02 * jax.random.normal(ks[5], (NUM_CLASSES, HIDDEN), jnp.float32)  # (out,in)
    b3 = 0.01 * jax.random.normal(ks[6], (NUM_CLASSES,), jnp.float32)

    params = {
        "embed_table": 0.02 * jax.random.normal(ks[0], (VOCAB, FEAT), jnp.float32),
        "text_proj":   0.05 * jax.random.normal(ks[1], (FEAT, FEAT), jnp.float32),
        "image_proj":  0.05 * jax.random.normal(ks[2], (C * H * W, FEAT), jnp.float32),
        "head": prepare_head_params(w1.T, b1, gamma, beta, w3.T, b3),
    }

    # deterministic example inputs
    input_ids = jax.random.randint(ks[7], (B, SEQ), 0, VOCAB, dtype=jnp.int32)
    attention_mask = jnp.ones((B, SEQ), jnp.int32)
    pixel_values = jax.random.normal(ks[8], (B, C, H, W), jnp.float32)

    logits, probs = model_forward(input_ids, attention_mask, pixel_values, params)
    jax.block_until_ready((logits, probs))

    # sanity: shapes, finiteness, probs rows ~sum to 1 (approx reciprocal)
    assert logits.shape == (B, NUM_CLASSES)
    assert probs.shape == (B, NUM_CLASSES)
    assert bool(jnp.all(jnp.isfinite(logits))) and bool(jnp.all(jnp.isfinite(probs)))
    assert jnp.allclose(jnp.sum(probs, axis=1), 1.0, atol=1e-2)
    print("KERNEL_OK")
</pallas_src>

<mosaic_0001>
module attributes {stable_mosaic.version = 11 : i64} {
  func.func @head_kernel(%arg0: i32, %arg1: memref<8x512xbf16, #tpu.memory_space<vmem>>, %arg2: memref<8x512xbf16, #tpu.memory_space<vmem>>, %arg3: memref<512x1024xbf16, #tpu.memory_space<vmem>>, %arg4: memref<512x1024xbf16, #tpu.memory_space<vmem>>, %arg5: memref<4x1024xf32, #tpu.memory_space<vmem>>, %arg6: memref<1024x128xbf16, #tpu.memory_space<vmem>>, %arg7: memref<8x128xf32, #tpu.memory_space<vmem>>, %arg8: memref<8x128xf32, #tpu.memory_space<vmem>>) attributes {dimension_semantics = [#tpu.dimension_semantics<parallel>], iteration_bounds = array<i64: 1>, scalar_prefetch = 0 : i64, scratch_operands = 0 : i64, tpu.core_type = #tpu.core_type<tc>, window_params = [{transform_indices = @transform_0, window_bounds = array<i64: 8, 512>}, {transform_indices = @transform_1, window_bounds = array<i64: 8, 512>}, {pipeline_mode = #tpu.pipeline_mode<synchronous>, transform_indices = @transform_2, window_bounds = array<i64: 512, 1024>}, {pipeline_mode = #tpu.pipeline_mode<synchronous>, transform_indices = @transform_3, window_bounds = array<i64: 512, 1024>}, {pipeline_mode = #tpu.pipeline_mode<synchronous>, transform_indices = @transform_4, window_bounds = array<i64: 4, 1024>}, {pipeline_mode = #tpu.pipeline_mode<synchronous>, transform_indices = @transform_5, window_bounds = array<i64: 1024, 128>}, {transform_indices = @transform_6, window_bounds = array<i64: 8, 128>}, {transform_indices = @transform_7, window_bounds = array<i64: 8, 128>}]} {
    %c0 = arith.constant 0 : index
    %c0_0 = arith.constant 0 : index
    %0 = vector.load %arg1[%c0, %c0_0] : memref<8x512xbf16, #tpu.memory_space<vmem>>, vector<8x512xbf16>
    %cst = arith.constant 0.000000e+00 : bf16
    %1 = vector.broadcast %cst : bf16 to vector<8x512xbf16>
    %2 = arith.maximumf %0, %1 : vector<8x512xbf16>
    %c0_1 = arith.constant 0 : index
    %c0_2 = arith.constant 0 : index
    %3 = vector.load %arg2[%c0_1, %c0_2] : memref<8x512xbf16, #tpu.memory_space<vmem>>, vector<8x512xbf16>
    %cst_3 = arith.constant 0.000000e+00 : bf16
    %4 = vector.broadcast %cst_3 : bf16 to vector<8x512xbf16>
    %5 = arith.maximumf %3, %4 : vector<8x512xbf16>
    %c0_4 = arith.constant 0 : index
    %c0_5 = arith.constant 0 : index
    %6 = vector.load %arg5[%c0_4, %c0_5] : memref<4x1024xf32, #tpu.memory_space<vmem>>, vector<1x1024xf32>
    %c1 = arith.constant 1 : index
    %c0_6 = arith.constant 0 : index
    %7 = vector.load %arg5[%c1, %c0_6] : memref<4x1024xf32, #tpu.memory_space<vmem>>, vector<1x1024xf32>
    %c2 = arith.constant 2 : index
    %c0_7 = arith.constant 0 : index
    %8 = vector.load %arg5[%c2, %c0_7] : memref<4x1024xf32, #tpu.memory_space<vmem>>, vector<1x1024xf32>
    %c3 = arith.constant 3 : index
    %c0_8 = arith.constant 0 : index
    %9 = vector.load %arg5[%c3, %c0_8] : memref<4x1024xf32, #tpu.memory_space<vmem>>, vector<1x128xf32>
    %c0_9 = arith.constant 0 : index
    %c0_10 = arith.constant 0 : index
    %10 = vector.load %arg3[%c0_9, %c0_10] : memref<512x1024xbf16, #tpu.memory_space<vmem>>, vector<512x1024xbf16>
    %cst_11 = arith.constant dense<0.000000e+00> : vector<8x1024xf32>
    %11 = tpu.matmul %2, %10, %cst_11 {dimension_numbers = #tpu.dot_dimension_numbers<[1], [0], [0], [1], [0, 0, 1, 1], [], []>} : vector<8x512xbf16>, vector<512x1024xbf16>, vector<8x1024xf32> -> vector<8x1024xf32>
    %c0_12 = arith.constant 0 : index
    %c0_13 = arith.constant 0 : index
    %12 = vector.load %arg4[%c0_12, %c0_13] : memref<512x1024xbf16, #tpu.memory_space<vmem>>, vector<512x1024xbf16>
    %cst_14 = arith.constant dense<0.000000e+00> : vector<8x1024xf32>
    %13 = tpu.matmul %5, %12, %cst_14 {dimension_numbers = #tpu.dot_dimension_numbers<[1], [0], [0], [1], [0, 0, 1, 1], [], []>} : vector<8x512xbf16>, vector<512x1024xbf16>, vector<8x1024xf32> -> vector<8x1024xf32>
    %14 = arith.addf %11, %13 : vector<8x1024xf32>
    %15 = vector.broadcast %6 : vector<1x1024xf32> to vector<8x1024xf32>
    %16 = arith.addf %14, %15 : vector<8x1024xf32>
    %cst_15 = arith.constant dense<0.000000e+00> : vector<8xf32>
    %17 = vector.multi_reduction <add>, %16, %cst_15 [1] : vector<8x1024xf32> to vector<8xf32>
    %18 = vector.shape_cast %17 : vector<8xf32> to vector<8x1xf32>
    %cst_16 = arith.constant 9.765625E-4 : f32
    %19 = vector.broadcast %cst_16 : f32 to vector<8x1xf32>
    %20 = arith.mulf %18, %19 : vector<8x1xf32>
    %21 = arith.mulf %16, %16 : vector<8x1024xf32>
    %cst_17 = arith.constant dense<0.000000e+00> : vector<8xf32>
    %22 = vector.multi_reduction <add>, %21, %cst_17 [1] : vector<8x1024xf32> to vector<8xf32>
    %23 = vector.shape_cast %22 : vector<8xf32> to vector<8x1xf32>
    %cst_18 = arith.constant 9.765625E-4 : f32
    %24 = vector.broadcast %cst_18 : f32 to vector<8x1xf32>
    %25 = arith.mulf %23, %24 : vector<8x1xf32>
    %26 = arith.mulf %20, %20 : vector<8x1xf32>
    %27 = arith.subf %25, %26 : vector<8x1xf32>
    %cst_19 = arith.constant 9.99999974E-6 : f32
    %28 = vector.broadcast %cst_19 : f32 to vector<8x1xf32>
    %29 = arith.addf %27, %28 : vector<8x1xf32>
    %30 = math.rsqrt %29 : vector<8x1xf32>
    %31 = vector.broadcast %7 : vector<1x1024xf32> to vector<8x1024xf32>
    %32 = vector.broadcast %30 : vector<8x1xf32> to vector<8x1024xf32>
    %33 = arith.mulf %31, %32 : vector<8x1024xf32>
    %34 = vector.broadcast %20 : vector<8x1xf32> to vector<8x1024xf32>
    %35 = arith.subf %16, %34 : vector<8x1024xf32>
    %36 = arith.mulf %35, %33 : vector<8x1024xf32>
    %37 = vector.broadcast %8 : vector<1x1024xf32> to vector<8x1024xf32>
    %38 = arith.addf %36, %37 : vector<8x1024xf32>
    %cst_20 = arith.constant 0.000000e+00 : f32
    %39 = vector.broadcast %cst_20 : f32 to vector<8x1024xf32>
    %40 = arith.maximumf %38, %39 : vector<8x1024xf32>
    %41 = arith.truncf %40 : vector<8x1024xf32> to vector<8x1024xbf16>
    %c0_21 = arith.constant 0 : index
    %c0_22 = arith.constant 0 : index
    %42 = vector.load %arg6[%c0_21, %c0_22] : memref<1024x128xbf16, #tpu.memory_space<vmem>>, vector<1024x128xbf16>
    %cst_23 = arith.constant dense<0.000000e+00> : vector<8x128xf32>
    %43 = tpu.matmul %41, %42, %cst_23 {dimension_numbers = #tpu.dot_dimension_numbers<[1], [0], [0], [1], [0, 0, 1, 1], [], []>} : vector<8x1024xbf16>, vector<1024x128xbf16>, vector<8x128xf32> -> vector<8x128xf32>
    %44 = vector.broadcast %9 : vector<1x128xf32> to vector<8x128xf32>
    %45 = arith.addf %43, %44 : vector<8x128xf32>
    %c0_24 = arith.constant 0 : index
    %c0_25 = arith.constant 0 : index
    %46 = vector.load %arg7[%c0_24, %c0_25] : memref<8x128xf32, #tpu.memory_space<vmem>>, vector<8x128xf32>
    tpu.vector_store %arg7[%c0_24, %c0_25], %45 {strides = array<i32>} : memref<8x128xf32, #tpu.memory_space<vmem>>, vector<8x128xf32>,
    %cst_26 = arith.constant dense<0xFF800000> : vector<8xf32>
    %47 = vector.multi_reduction <maximumf>, %45, %cst_26 [1] : vector<8x128xf32> to vector<8xf32>
    %48 = vector.shape_cast %47 : vector<8xf32> to vector<8x1xf32>
    %49 = vector.broadcast %48 : vector<8x1xf32> to vector<8x128xf32>
    %50 = arith.subf %45, %49 : vector<8x128xf32>
    %51 = math.exp %50 : vector<8x128xf32>
    %cst_27 = arith.constant dense<0.000000e+00> : vector<8xf32>
    %52 = vector.multi_reduction <add>, %51, %cst_27 [1] : vector<8x128xf32> to vector<8xf32>
    %53 = vector.shape_cast %52 : vector<8xf32> to vector<8x1xf32>
    %54 = tpu.reciprocal %53 {approx = true} : vector<8x1xf32> -> vector<8x1xf32>
    %55 = vector.broadcast %54 : vector<8x1xf32> to vector<8x128xf32>
    %56 = arith.mulf %51, %55 : vector<8x128xf32>
    %c0_28 = arith.constant 0 : index
    %c0_29 = arith.constant 0 : index
    %57 = vector.load %arg8[%c0_28, %c0_29] : memref<8x128xf32, #tpu.memory_space<vmem>>, vector<8x128xf32>
    tpu.vector_store %arg8[%c0_28, %c0_29], %56 {strides = array<i32>} : memref<8x128xf32, #tpu.memory_space<vmem>>, vector<8x128xf32>,
    return
  }
  func.func @transform_0(%arg0: i32) -> (i32, i32) {
    %c0_i32 = arith.constant 0 : i32
    %c0_i32_0 = arith.constant 0 : i32
    return %arg0, %c0_i32 : i32, i32
  }
  func.func @transform_1(%arg0: i32) -> (i32, i32) {
    %c0_i32 = arith.constant 0 : i32
    %c0_i32_0 = arith.constant 0 : i32
    return %arg0, %c0_i32 : i32, i32
  }
  func.func @transform_2(%arg0: i32) -> (i32, i32) {
    %c0_i32 = arith.constant 0 : i32
    %c0_i32_0 = arith.constant 0 : i32
    %c0_i32_1 = arith.constant 0 : i32
    return %c0_i32, %c0_i32_0 : i32, i32
  }
  func.func @transform_3(%arg0: i32) -> (i32, i32) {
    %c0_i32 = arith.constant 0 : i32
    %c0_i32_0 = arith.constant 0 : i32
    %c0_i32_1 = arith.constant 0 : i32
    return %c0_i32, %c0_i32_0 : i32, i32
  }
  func.func @transform_4(%arg0: i32) -> (i32, i32) {
    %c0_i32 = arith.constant 0 : i32
    %c0_i32_0 = arith.constant 0 : i32
    %c0_i32_1 = arith.constant 0 : i32
    return %c0_i32, %c0_i32_0 : i32, i32
  }
  func.func @transform_5(%arg0: i32) -> (i32, i32) {
    %c0_i32 = arith.constant 0 : i32
    %c0_i32_0 = arith.constant 0 : i32
    %c0_i32_1 = arith.constant 0 : i32
    return %c0_i32, %c0_i32_0 : i32, i32
  }
  func.func @transform_6(%arg0: i32) -> (i32, i32) {
    %c0_i32 = arith.constant 0 : i32
    %c0_i32_0 = arith.constant 0 : i32
    return %arg0, %c0_i32 : i32, i32
  }
  func.func @transform_7(%arg0: i32) -> (i32, i32) {
    %c0_i32 = arith.constant 0 : i32
    %c0_i32_0 = arith.constant 0 : i32
    return %arg0, %c0_i32 : i32, i32
  }
}

</mosaic_0001>

<bundles_post_ra>
// kernel: model_forward.1
= control target key start
LH: loop header
LB: loop body
LE: loop exit
PB: predicated region body
PF: predicated region fallthrough
CT: control target
= control target key end

     0   :  { %v5448_v58 = vmov 0   ;;  %s7477_s3 = inlined_call_operand.vmem [shape: bf16[512,1024], index: 3, kind: input, shape index: {}]   ;;  %s7478_s1 = inlined_call_operand.vmem [shape: bf16[8,512], index: 1, kind: input, shape index: {}]   ;;  %s7479_s2 = inlined_call_operand.vmem [shape: bf16[512,1024], index: 2, kind: input, shape index: {}]   ;;  %s7480_s0 = inlined_call_operand.vmem [shape: bf16[8,512], index: 0, kind: input, shape index: {}]   ;;  %s7481_s4 = inlined_call_operand.vmem [shape: f32[4,1024], index: 4, kind: input, shape index: {}]   ;;  %s7482_s5 = inlined_call_operand.vmem [shape: bf16[1024,128], index: 5, kind: input, shape index: {}]   ;;  %s7483_s6 = inlined_call_operand.vmem [shape: f32[8,128], index: 6, kind: output, shape index: {0}]   ;;  %s7484_s7 = inlined_call_operand.vmem [shape: f32[8,128], index: 7, kind: output, shape index: {1}]  }
   0x1   :  { %v352_v0 = vld [vmem:[%s7477_s3 + $0x1c0] sm:$0xff]  ;;  %v31_v54 = vld [vmem:[%s7478_s1 + $0x8] sm:$0xff] }
   0x2   :  { %v356_v1 = vld [vmem:[%s7477_s3 + $0x1e0] sm:$0xff]  ;;  %v5589_v60 = vmax.bf16 %v5448_v58, %v31_v54 }
   0x3   :  { %v480_v2 = vld [vmem:[%s7477_s3 + $0x5c0] sm:$0xff]  ;;  %v4765_v3 = vcombine.high %v352_v0, %v356_v1  ;;  %v4764_v5 = vcombine.low %v352_v0, %v356_v1 }
   0x4   :  { %v484_v4 = vld [vmem:[%s7477_s3 + $0x5e0] sm:$0xff]  ;;  %v5603_v1 = vcombine.high %v5589_v60, %v5589_v60 }
   0x5   :  { %v344_v6 = vld [vmem:[%s7477_s3 + $0x180] sm:$0xff]  ;;  %v4893_v8 = vcombine.high %v480_v2, %v484_v4  ;;  %v4892_v9 = vcombine.low %v480_v2, %v484_v4  ;;  %1846 = vmatprep.subr.bf16.mxu0 %v4765_v3 }
   0x6   :  { %v348_v7 = vld [vmem:[%s7477_s3 + $0x1a0] sm:$0xff]  ;;  %1847 = vmatpush1.bf16.msra.mxu0 %v4764_v5  ;;  %1919 = vmatprep.mubr.bf16.mxu1 %v5603_v1 }
   0x7   :  { %v4757_v10 = vcombine.high %v344_v6, %v348_v7  ;;  %v472_v11 = vld [vmem:[%s7477_s3 + $0x580] sm:$0xff]  ;;  %1887 = vmatprep.subr.bf16.mxu1 %v4893_v8  ;;  %v4756_v18 = vcombine.low %v344_v6, %v348_v7 }
   0x8   :  { %v476_v12 = vld [vmem:[%s7477_s3 + $0x5a0] sm:$0xff]  ;;  %1888 = vmatpush1.bf16.msra.mxu1 %v4892_v9 }
   0x9   :  { %v336_v13 = vld [vmem:[%s7477_s3 + $0x140] sm:$0xff]  ;;  %v4885_v14 = vcombine.high %v472_v11, %v476_v12  ;;  %1848 = vmatprep.subr.bf16.mxu0 %v4757_v10  ;;  %v4884_v19 = vcombine.low %v472_v11, %v476_v12 }
   0xa   :  { %v340_v15 = vld [vmem:[%s7477_s3 + $0x160] sm:$0xff]  ;;  %1849 = vmatpush1.bf16.msra.mxu0 %v4756_v18 }
   0xb   :  { %v464_v16 = vld [vmem:[%s7477_s3 + $0x540] sm:$0xff]  ;;  %v4749_v20 = vcombine.high %v336_v13, %v340_v15  ;;  %1889 = vmatprep.subr.bf16.mxu1 %v4885_v14  ;;  %v4748_v26 = vcombine.low %v336_v13, %v340_v15 }
   0xc   :  { %v468_v17 = vld [vmem:[%s7477_s3 + $0x560] sm:$0xff]  ;;  %1890 = vmatpush1.bf16.msra.mxu1 %v4884_v19 }
   0xd   :  { %v4877_v21 = vcombine.high %v464_v16, %v468_v17  ;;  %v328_v22 = vld [vmem:[%s7477_s3 + $0x100] sm:$0xff]  ;;  %1850 = vmatprep.subr.bf16.mxu0 %v4749_v20  ;;  %v4876_v27 = vcombine.low %v464_v16, %v468_v17 }
   0xe   :  { %v332_v23 = vld [vmem:[%s7477_s3 + $0x120] sm:$0xff]  ;;  %1851 = vmatpush1.bf16.msra.mxu0 %v4748_v26 }
   0xf   :  { %v456_v24 = vld [vmem:[%s7477_s3 + $0x500] sm:$0xff]  ;;  %v4741_v28 = vcombine.high %v328_v22, %v332_v23  ;;  %1891 = vmatprep.subr.bf16.mxu1 %v4877_v21  ;;  %v4740_v34 = vcombine.low %v328_v22, %v332_v23 }
  0x10   :  { %v460_v25 = vld [vmem:[%s7477_s3 + $0x520] sm:$0xff]  ;;  %1892 = vmatpush1.bf16.msra.mxu1 %v4876_v27 }
  0x11   :  { %v4869_v29 = vcombine.high %v456_v24, %v460_v25  ;;  %v320_v30 = vld [vmem:[%s7477_s3 + $0xc0] sm:$0xff]  ;;  %1852 = vmatprep.subr.bf16.mxu0 %v4741_v28  ;;  %v4868_v35 = vcombine.low %v456_v24, %v460_v25 }
  0x12   :  { %v324_v31 = vld [vmem:[%s7477_s3 + $0xe0] sm:$0xff]  ;;  %1853 = vmatpush1.bf16.msra.mxu0 %v4740_v34 }
  0x13   :  { %v448_v32 = vld [vmem:[%s7477_s3 + $0x4c0] sm:$0xff]  ;;  %v4733_v36 = vcombine.high %v320_v30, %v324_v31  ;;  %1893 = vmatprep.subr.bf16.mxu1 %v4869_v29  ;;  %v4732_v42 = vcombine.low %v320_v30, %v324_v31 }
  0x14   :  { %v452_v33 = vld [vmem:[%s7477_s3 + $0x4e0] sm:$0xff]  ;;  %1894 = vmatpush1.bf16.msra.mxu1 %v4868_v35 }
  0x15   :  { %v4861_v37 = vcombine.high %v448_v32, %v452_v33  ;;  %v312_v38 = vld [vmem:[%s7477_s3 + $0x80] sm:$0xff]  ;;  %1854 = vmatprep.subr.bf16.mxu0 %v4733_v36  ;;  %v4860_v43 = vcombine.low %v448_v32, %v452_v33 }
  0x16   :  { %v316_v39 = vld [vmem:[%s7477_s3 + $0xa0] sm:$0xff]  ;;  %1855 = vmatpush1.bf16.msra.mxu0 %v4732_v42 }
  0x17   :  { %v440_v40 = vld [vmem:[%s7477_s3 + $0x480] sm:$0xff]  ;;  %v4725_v44 = vcombine.high %v312_v38, %v316_v39  ;;  %1895 = vmatprep.subr.bf16.mxu1 %v4861_v37  ;;  %v4724_v50 = vcombine.low %v312_v38, %v316_v39 }
  0x18   :  { %v444_v41 = vld [vmem:[%s7477_s3 + $0x4a0] sm:$0xff]  ;;  %1896 = vmatpush1.bf16.msra.mxu1 %v4860_v43 }
  0x19   :  { %v4853_v45 = vcombine.high %v440_v40, %v444_v41  ;;  %v304_v46 = vld [vmem:[%s7477_s3 + $0x40] sm:$0xff]  ;;  %1856 = vmatprep.subr.bf16.mxu0 %v4725_v44  ;;  %v4852_v51 = vcombine.low %v440_v40, %v444_v41 }
  0x1a   :  { %v308_v47 = vld [vmem:[%s7477_s3 + $0x60] sm:$0xff]  ;;  %1857 = vmatpush1.bf16.msra.mxu0 %v4724_v50 }
  0x1b   :  { %v432_v48 = vld [vmem:[%s7477_s3 + $0x440] sm:$0xff]  ;;  %v4717_v52 = vcombine.high %v304_v46, %v308_v47  ;;  %1897 = vmatprep.subr.bf16.mxu1 %v4853_v45  ;;  %v4716_v63 = vcombine.low %v304_v46, %v308_v47 }
  0x1c   :  { %v436_v49 = vld [vmem:[%s7477_s3 + $0x460] sm:$0xff]  ;;  %1898 = vmatpush1.bf16.msra.mxu1 %v4852_v51 }
  0x1d   :  { %v30_v53 = vld [vmem:[%s7478_s1] sm:$0xff]  ;;  %v4845_v55 = vcombine.high %v432_v48, %v436_v49  ;;  %1858 = vmatprep.subr.bf16.mxu0 %v4717_v52  ;;  %v4844_v2 = vcombine.low %v432_v48, %v436_v49 }
  0x1e   :  { %v296_v56 = vld [vmem:[%s7477_s3] sm:$0xff]  ;;  %v5586_v59 = vmax.bf16 %v5448_v58, %v30_v53  ;;  %1859 = vmatpush1.bf16.msra.mxu0 %v4716_v63 }
  0x1f   :  { %v300_v57 = vld [vmem:[%s7477_s3 + $0x20] sm:$0xff]  ;;  %1899 = vmatprep.subr.bf16.mxu1 %v4845_v55 }
  0x20   :  { %v424_v61 = vld [vmem:[%s7477_s3 + $0x400] sm:$0xff]  ;;  %v5599_v0 = vcombine.high %v5586_v59, %v5586_v59  ;;  %v4709_v3 = vcombine.high %v296_v56, %v300_v57  ;;  %v4708_v9 = vcombine.low %v296_v56, %v300_v57  ;;  %1900 = vmatpush1.bf16.msra.mxu1 %v4844_v2 }
  0x21   :  { %v428_v62 = vld [vmem:[%s7477_s3 + $0x420] sm:$0xff] }
  0x22   :  { %v4837_v4 = vcombine.high %v424_v61, %v428_v62  ;;  %v416_v5 = vld [vmem:[%s7477_s3 + $0x3c0] sm:$0xff]  ;;  %1878 = vmatprep.mubr.bf16.mxu0 %v5599_v0  ;;  %1860 = vmatprep.subr.bf16.mxu0 %v4709_v3  ;;  %v4836_v10 = vcombine.low %v424_v61, %v428_v62 }
  0x23   :  { %v420_v6 = vld [vmem:[%s7477_s3 + $0x3e0] sm:$0xff]  ;;  %1861 = vmatpush1.bf16.msra.mxu0 %v4708_v9 }
  0x24   :  { %v544_v7 = vld [vmem:[%s7477_s3 + $0x7c0] sm:$0xff]  ;;  %v4829_v11 = vcombine.high %v416_v5, %v420_v6  ;;  %1901 = vmatprep.subr.bf16.mxu1 %v4837_v4  ;;  %v4828_v17 = vcombine.low %v416_v5, %v420_v6 }
  0x25   :  { %v548_v8 = vld [vmem:[%s7477_s3 + $0x7e0] sm:$0xff]  ;;  %1902 = vmatpush1.bf16.msra.mxu1 %v4836_v10  ;;  %v353_v10 = vld [vmem:[%s7477_s3 + $0x1c8] sm:$0xff] }
  0x26   :  { %v4957_v12 = vcombine.high %v544_v7, %v548_v8  ;;  %v408_v13 = vld [vmem:[%s7477_s3 + $0x380] sm:$0xff]  ;;  %1862 = vmatprep.subr.bf16.mxu0 %v4829_v11  ;;  %v4956_v18 = vcombine.low %v544_v7, %v548_v8  ;;  %v357_v11 = vld [vmem:[%s7477_s3 + $0x1e8] sm:$0xff] }
  0x27   :  { %v412_v14 = vld [vmem:[%s7477_s3 + $0x3a0] sm:$0xff]  ;;  %1863 = vmatpush2.bf16.msra.mxu0 %v4828_v17 }
  0x28   :  { %v536_v15 = vld [vmem:[%s7477_s3 + $0x780] sm:$0xff]  ;;  %v4821_v19 = vcombine.high %v408_v13, %v412_v14  ;;  %1903 = vmatprep.subr.bf16.mxu1 %v4957_v12  ;;  %v4820_v25 = vcombine.low %v408_v13, %v412_v14  ;;  %v481_v12 = vld [vmem:[%s7477_s3 + $0x5c8] sm:$0xff] }
  0x29   :  { %v540_v16 = vld [vmem:[%s7477_s3 + $0x7a0] sm:$0xff]  ;;  %1904 = vmatpush2.bf16.msra.mxu1 %v4956_v18  ;;  %v485_v13 = vld [vmem:[%s7477_s3 + $0x5e8] sm:$0xff] }
  0x2a   :  { %v4949_v20 = vcombine.high %v536_v15, %v540_v16  ;;  %v400_v21 = vld [vmem:[%s7477_s3 + $0x340] sm:$0xff]  ;;  %1864 = vmatprep.subr.bf16.mxu0 %v4821_v19  ;;  %v4948_v26 = vcombine.low %v536_v15, %v540_v16  ;;  %v4767_v16 = vcombine.high %v353_v10, %v357_v11  ;;  %v4895_v17 = vcombine.high %v481_v12, %v485_v13  ;;  %v345_v18 = vld [vmem:[%s7477_s3 + $0x188] sm:$0xff] }
  0x2b   :  { %v404_v22 = vld [vmem:[%s7477_s3 + $0x360] sm:$0xff]  ;;  %1865 = vmatpush2.bf16.msra.mxu0 %v4820_v25  ;;  %v349_v19 = vld [vmem:[%s7477_s3 + $0x1a8] sm:$0xff]  ;;  %v4894_v25 = vcombine.low %v481_v12, %v485_v13 }
  0x2c   :  { %v528_v23 = vld [vmem:[%s7477_s3 + $0x740] sm:$0xff]  ;;  %v4813_v27 = vcombine.high %v400_v21, %v404_v22  ;;  %1905 = vmatprep.subr.bf16.mxu1 %v4949_v20  ;;  %v4812_v33 = vcombine.low %v400_v21, %v404_v22  ;;  %v5723_v20 = vcombine.low %v5586_v59, %v5586_v59  ;;  %v473_v21 = vld [vmem:[%s7477_s3 + $0x588] sm:$0xff] }
  0x2d   :  { %v532_v24 = vld [vmem:[%s7477_s3 + $0x760] sm:$0xff]  ;;  %1906 = vmatpush2.bf16.msra.mxu1 %v4948_v26  ;;  %v477_v22 = vld [vmem:[%s7477_s3 + $0x5a8] sm:$0xff]  ;;  %v4759_v26 = vcombine.high %v345_v18, %v349_v19 }
  0x2e   :  { %v4941_v28 = vcombine.high %v528_v23, %v532_v24  ;;  %v392_v29 = vld [vmem:[%s7477_s3 + $0x300] sm:$0xff]  ;;  %1866 = vmatprep.subr.bf16.mxu0 %v4813_v27  ;;  %v4940_v34 = vcombine.low %v528_v23, %v532_v24  ;;  %v5733_v23 = vcombine.low %v5589_v60, %v5589_v60  ;;  %v4766_v24 = vcombine.low %v353_v10, %v357_v11  ;;  %v337_v27 = vld [vmem:[%s7477_s3 + $0x148] sm:$0xff] }
  0x2f   :  { %v396_v30 = vld [vmem:[%s7477_s3 + $0x320] sm:$0xff]  ;;  %1867 = vmatpush2.bf16.msra.mxu0 %v4812_v33  ;;  %v4887_v59 = vcombine.high %v473_v21, %v477_v22  ;;  %v465_v60 = vld [vmem:[%s7477_s3 + $0x548] sm:$0xff] }
  0x30   :  { %v520_v31 = vld [vmem:[%s7477_s3 + $0x700] sm:$0xff]  ;;  %v4805_v35 = vcombine.high %v392_v29, %v396_v30  ;;  %1907 = vmatprep.subr.bf16.mxu1 %v4941_v28  ;;  %v4804_v41 = vcombine.low %v392_v29, %v396_v30  ;;  %v341_v28 = vld [vmem:[%s7477_s3 + $0x168] sm:$0xff]  ;;  %v4758_v30 = vcombine.low %v345_v18, %v349_v19 }
  0x31   :  { %v524_v32 = vld [vmem:[%s7477_s3 + $0x720] sm:$0xff]  ;;  %1908 = vmatpush2.bf16.msra.mxu1 %v4940_v34  ;;  %v469_v29 = vld [vmem:[%s7477_s3 + $0x568] sm:$0xff] }
  0x32   :  { %v4933_v36 = vcombine.high %v520_v31, %v524_v32  ;;  %v384_v37 = vld [vmem:[%s7477_s3 + $0x2c0] sm:$0xff]  ;;  %1868 = vmatprep.subr.bf16.mxu0 %v4805_v35  ;;  %v4932_v42 = vcombine.low %v520_v31, %v524_v32  ;;  %v4886_v31 = vcombine.low %v473_v21, %v477_v22  ;;  %v4751_v32 = vcombine.high %v337_v27, %v341_v28  ;;  %v329_v34 = vld [vmem:[%s7477_s3 + $0x108] sm:$0xff] }
  0x33   :  { %v388_v38 = vld [vmem:[%s7477_s3 + $0x2e0] sm:$0xff]  ;;  %1869 = vmatpush2.bf16.msra.mxu0 %v4804_v41  ;;  %v4879_v33 = vcombine.high %v465_v60, %v469_v29  ;;  %v333_v35 = vld [vmem:[%s7477_s3 + $0x128] sm:$0xff] }
  0x34   :  { %v512_v39 = vld [vmem:[%s7477_s3 + $0x6c0] sm:$0xff]  ;;  %v4797_v43 = vcombine.high %v384_v37, %v388_v38  ;;  %1909 = vmatprep.subr.bf16.mxu1 %v4933_v36  ;;  %v4796_v49 = vcombine.low %v384_v37, %v388_v38  ;;  %v457_v36 = vld [vmem:[%s7477_s3 + $0x508] sm:$0xff]  ;;  %v4750_v38 = vcombine.low %v337_v27, %v341_v28 }
  0x35   :  { %v516_v40 = vld [vmem:[%s7477_s3 + $0x6e0] sm:$0xff]  ;;  %1910 = vmatpush2.bf16.msra.mxu1 %v4932_v42  ;;  %v461_v37 = vld [vmem:[%s7477_s3 + $0x528] sm:$0xff] }
  0x36   :  { %v4925_v44 = vcombine.high %v512_v39, %v516_v40  ;;  %v376_v45 = vld [vmem:[%s7477_s3 + $0x280] sm:$0xff]  ;;  %1870 = vmatprep.subr.bf16.mxu0 %v4797_v43  ;;  %v4924_v50 = vcombine.low %v512_v39, %v516_v40  ;;  %v4878_v39 = vcombine.low %v465_v60, %v469_v29  ;;  %v4743_v40 = vcombine.high %v329_v34, %v333_v35  ;;  %v321_v42 = vld [vmem:[%s7477_s3 + $0xc8] sm:$0xff] }
  0x37   :  { %v380_v46 = vld [vmem:[%s7477_s3 + $0x2a0] sm:$0xff]  ;;  %1871 = vmatpush2.bf16.msra.mxu0 %v4796_v49  ;;  %v4871_v41 = vcombine.high %v457_v36, %v461_v37  ;;  %v325_v43 = vld [vmem:[%s7477_s3 + $0xe8] sm:$0xff] }
  0x38   :  { %v504_v47 = vld [vmem:[%s7477_s3 + $0x680] sm:$0xff]  ;;  %v4789_v51 = vcombine.high %v376_v45, %v380_v46  ;;  %1911 = vmatprep.subr.bf16.mxu1 %v4925_v44  ;;  %v4788_v57 = vcombine.low %v376_v45, %v380_v46  ;;  %v449_v44 = vld [vmem:[%s7477_s3 + $0x4c8] sm:$0xff]  ;;  %v4742_v46 = vcombine.low %v329_v34, %v333_v35 }
  0x39   :  { %v508_v48 = vld [vmem:[%s7477_s3 + $0x6a0] sm:$0xff]  ;;  %1912 = vmatpush2.bf16.msra.mxu1 %v4924_v50  ;;  %v453_v45 = vld [vmem:[%s7477_s3 + $0x4e8] sm:$0xff] }
  0x3a   :  { %v4917_v52 = vcombine.high %v504_v47, %v508_v48  ;;  %v368_v53 = vld [vmem:[%s7477_s3 + $0x240] sm:$0xff]  ;;  %1872 = vmatprep.subr.bf16.mxu0 %v4789_v51  ;;  %v4916_v61 = vcombine.low %v504_v47, %v508_v48  ;;  %v4870_v47 = vcombine.low %v457_v36, %v461_v37  ;;  %v4735_v48 = vcombine.high %v321_v42, %v325_v43  ;;  %v313_v50 = vld [vmem:[%s7477_s3 + $0x88] sm:$0xff] }
  0x3b   :  { %v372_v54 = vld [vmem:[%s7477_s3 + $0x260] sm:$0xff]  ;;  %1873 = vmatpush2.bf16.msra.mxu0 %v4788_v57  ;;  %v4863_v49 = vcombine.high %v449_v44, %v453_v45  ;;  %v317_v51 = vld [vmem:[%s7477_s3 + $0xa8] sm:$0xff] }
  0x3c   :  { %v496_v55 = vld [vmem:[%s7477_s3 + $0x640] sm:$0xff]  ;;  %v4781_v62 = vcombine.high %v368_v53, %v372_v54  ;;  %1913 = vmatprep.subr.bf16.mxu1 %v4917_v52  ;;  %v4780_v6 = vcombine.low %v368_v53, %v372_v54  ;;  %v441_v52 = vld [vmem:[%s7477_s3 + $0x488] sm:$0xff]  ;;  %v4734_v54 = vcombine.low %v321_v42, %v325_v43 }
  0x3d   :  { %v500_v56 = vld [vmem:[%s7477_s3 + $0x660] sm:$0xff]  ;;  %1914 = vmatpush2.bf16.msra.mxu1 %v4916_v61  ;;  %v445_v53 = vld [vmem:[%s7477_s3 + $0x4a8] sm:$0xff] }
  0x3e   :  { %v4909_v63 = vcombine.high %v496_v55, %v500_v56  ;;  %v360_v2 = vld [vmem:[%s7477_s3 + $0x200] sm:$0xff]  ;;  %1874 = vmatprep.subr.bf16.mxu0 %v4781_v62  ;;  %v4908_v7 = vcombine.low %v496_v55, %v500_v56  ;;  %v4862_v55 = vcombine.low %v449_v44, %v453_v45  ;;  %v4727_v56 = vcombine.high %v313_v50, %v317_v51  ;;  %v305_v61 = vld [vmem:[%s7477_s3 + $0x48] sm:$0xff] }
  0x3f   :  { %v364_v3 = vld [vmem:[%s7477_s3 + $0x220] sm:$0xff]  ;;  %1875 = vmatpush2.bf16.msra.mxu0 %v4780_v6  ;;  %v4855_v57 = vcombine.high %v441_v52, %v445_v53  ;;  %v309_v62 = vld [vmem:[%s7477_s3 + $0x68] sm:$0xff] }
  0x40   :  { %v488_v4 = vld [vmem:[%s7477_s3 + $0x600] sm:$0xff]  ;;  %v4773_v8 = vcombine.high %v360_v2, %v364_v3  ;;  %1915 = vmatprep.subr.bf16.mxu1 %v4909_v63  ;;  %v4772_v14 = vcombine.low %v360_v2, %v364_v3  ;;  %v433_v63 = vld [vmem:[%s7477_s3 + $0x448] sm:$0xff]  ;;  %v4726_v3 = vcombine.low %v313_v50, %v317_v51  ;;  %v4718_v11 = vcombine.low %v305_v61, %v309_v62 }
  0x41   :  { %v492_v5 = vld [vmem:[%s7477_s3 + $0x620] sm:$0xff]  ;;  %1916 = vmatpush2.bf16.msra.mxu1 %v4908_v7  ;;  %v437_v2 = vld [vmem:[%s7477_s3 + $0x468] sm:$0xff] }
  0x42   :  { %v4901_v9 = vcombine.high %v488_v4, %v492_v5  ;;  %1876 = vmatprep.subr.bf16.mxu0 %v4773_v8  ;;  %v4900_v15 = vcombine.low %v488_v4, %v492_v5  ;;  %v4854_v4 = vcombine.low %v441_v52, %v445_v53  ;;  %v4719_v5 = vcombine.high %v305_v61, %v309_v62  ;;  %v297_v7 = vld [vmem:[%s7477_s3 + $0x8] sm:$0xff] }
  0x43   :  { %1877 = vmatpush2.bf16.msra.mxu0 %v4772_v14  ;;  %v4847_v6 = vcombine.high %v433_v63, %v437_v2  ;;  %v301_v8 = vld [vmem:[%s7477_s3 + $0x28] sm:$0xff]  ;;  %v4846_v12 = vcombine.low %v433_v63, %v437_v2 }
  0x44   :  { %1917 = vmatprep.subr.bf16.mxu1 %v4901_v9  ;;  %1928 = vmatprep.subr.bf16.mxu0 %v4767_v16  ;;  %v425_v9 = vld [vmem:[%s7477_s3 + $0x408] sm:$0xff]  ;;  %v4711_v13 = vcombine.high %v297_v7, %v301_v8  ;;  %v4710_v19 = vcombine.low %v297_v7, %v301_v8 }
  0x45   :  { %1918 = vmatpush2.bf16.msra.mxu1 %v4900_v15  ;;  %v429_v10 = vld [vmem:[%s7477_s3 + $0x428] sm:$0xff] }
  0x46   :  { %1969 = vmatprep.subr.bf16.mxu1 %v4895_v17  ;;  %1879 = vmatmul.mubr.bf16.vlgmr.msra.gmra.mxu0 %v5723_v20  ;;  %v4839_v14 = vcombine.high %v425_v9, %v429_v10  ;;  %v417_v15 = vld [vmem:[%s7477_s3 + $0x3c8] sm:$0xff]  ;;  %v4838_v21 = vcombine.low %v425_v9, %v429_v10 }
  0x47   :  { %1929 = vmatpush1.bf16.msra.mxu0 %v4766_v24  ;;  %1960 = vmatprep.mubr.bf16.mxu0 %v5599_v0  ;;  %v421_v16 = vld [vmem:[%s7477_s3 + $0x3e8] sm:$0xff] }
  0x48   :  { %1920 = vmatmul.mubr.bf16.vlgmr.msra.gmra.mxu1 %v5733_v23  ;;  %1930 = vmatprep.subr.bf16.mxu0 %v4759_v26  ;;  %v545_v17 = vld [vmem:[%s7477_s3 + $0x7c8] sm:$0xff]  ;;  %v4831_v22 = vcombine.high %v417_v15, %v421_v16  ;;  %v4830_v28 = vcombine.low %v417_v15, %v421_v16 }
  0x49   :  { %1970 = vmatpush1.bf16.msra.mxu1 %v4894_v25  ;;  %2001 = vmatprep.mubr.bf16.mxu1 %v5603_v1  ;;  %v549_v18 = vld [vmem:[%s7477_s3 + $0x7e8] sm:$0xff] }
  0x4a   :  { %1971 = vmatprep.subr.bf16.mxu1 %v4887_v59  ;;  %v4959_v24 = vcombine.high %v545_v17, %v549_v18  ;;  %v409_v25 = vld [vmem:[%s7477_s3 + $0x388] sm:$0xff]  ;;  %v4958_v60 = vcombine.low %v545_v17, %v549_v18 }
  0x4b   :  { %1931 = vmatpush1.bf16.msra.mxu0 %v4758_v30  ;;  %v413_v26 = vld [vmem:[%s7477_s3 + $0x3a8] sm:$0xff] }
  0x4c   :  { %1932 = vmatprep.subr.bf16.mxu0 %v4751_v32  ;;  %v537_v59 = vld [vmem:[%s7477_s3 + $0x788] sm:$0xff]  ;;  %v4823_v29 = vcombine.high %v409_v25, %v413_v26  ;;  %v4822_v35 = vcombine.low %v409_v25, %v413_v26  ;;  %v486_v25 = vld [vmem:[%s7477_s3 + $0x5f0] sm:$0xff] }
  0x4d   :  { %1972 = vmatpush1.bf16.msra.mxu1 %v4886_v31  ;;  %v541_v27 = vld [vmem:[%s7477_s3 + $0x7a8] sm:$0xff] }
  0x4e   :  { %1973 = vmatprep.subr.bf16.mxu1 %v4879_v33  ;;  %v4951_v30 = vcombine.high %v537_v59, %v541_v27  ;;  %v401_v31 = vld [vmem:[%s7477_s3 + $0x348] sm:$0xff]  ;;  %v4950_v36 = vcombine.low %v537_v59, %v541_v27 }
  0x4f   :  { %1933 = vmatpush1.bf16.msra.mxu0 %v4750_v38  ;;  %v405_v32 = vld [vmem:[%s7477_s3 + $0x368] sm:$0xff] }
  0x50   :  { %1934 = vmatprep.subr.bf16.mxu0 %v4743_v40  ;;  %v529_v33 = vld [vmem:[%s7477_s3 + $0x748] sm:$0xff]  ;;  %v4815_v37 = vcombine.high %v401_v31, %v405_v32  ;;  %v4814_v43 = vcombine.low %v401_v31, %v405_v32  ;;  %v478_v31 = vld [vmem:[%s7477_s3 + $0x5b0] sm:$0xff] }
  0x51   :  { %1974 = vmatpush1.bf16.msra.mxu1 %v4878_v39  ;;  %v533_v34 = vld [vmem:[%s7477_s3 + $0x768] sm:$0xff] }
  0x52   :  { %1975 = vmatprep.subr.bf16.mxu1 %v4871_v41  ;;  %v4943_v38 = vcombine.high %v529_v33, %v533_v34  ;;  %v393_v39 = vld [vmem:[%s7477_s3 + $0x308] sm:$0xff]  ;;  %v4942_v44 = vcombine.low %v529_v33, %v533_v34 }
  0x53   :  { %1935 = vmatpush1.bf16.msra.mxu0 %v4742_v46  ;;  %v397_v40 = vld [vmem:[%s7477_s3 + $0x328] sm:$0xff] }
  0x54   :  { %1936 = vmatprep.subr.bf16.mxu0 %v4735_v48  ;;  %v521_v41 = vld [vmem:[%s7477_s3 + $0x708] sm:$0xff]  ;;  %v4807_v45 = vcombine.high %v393_v39, %v397_v40  ;;  %v4806_v51 = vcombine.low %v393_v39, %v397_v40  ;;  %v470_v39 = vld [vmem:[%s7477_s3 + $0x570] sm:$0xff] }
  0x55   :  { %1976 = vmatpush1.bf16.msra.mxu1 %v4870_v47  ;;  %v525_v42 = vld [vmem:[%s7477_s3 + $0x728] sm:$0xff] }
  0x56   :  { %1977 = vmatprep.subr.bf16.mxu1 %v4863_v49  ;;  %v4935_v46 = vcombine.high %v521_v41, %v525_v42  ;;  %v385_v47 = vld [vmem:[%s7477_s3 + $0x2c8] sm:$0xff]  ;;  %v4934_v52 = vcombine.low %v521_v41, %v525_v42 }
  0x57   :  { %1937 = vmatpush1.bf16.msra.mxu0 %v4734_v54  ;;  %v389_v48 = vld [vmem:[%s7477_s3 + $0x2e8] sm:$0xff] }
  0x58   :  { %1938 = vmatprep.subr.bf16.mxu0 %v4727_v56  ;;  %v513_v49 = vld [vmem:[%s7477_s3 + $0x6c8] sm:$0xff]  ;;  %v4799_v53 = vcombine.high %v385_v47, %v389_v48  ;;  %v4798_v62 = vcombine.low %v385_v47, %v389_v48  ;;  %v462_v47 = vld [vmem:[%s7477_s3 + $0x530] sm:$0xff] }
  0x59   :  { %1978 = vmatpush1.bf16.msra.mxu1 %v4862_v55  ;;  %v517_v50 = vld [vmem:[%s7477_s3 + $0x6e8] sm:$0xff] }
  0x5a   :  { %1979 = vmatprep.subr.bf16.mxu1 %v4855_v57  ;;  %v4927_v54 = vcombine.high %v513_v49, %v517_v50  ;;  %v377_v55 = vld [vmem:[%s7477_s3 + $0x288] sm:$0xff]  ;;  %v4926_v63 = vcombine.low %v513_v49, %v517_v50 }
  0x5b   :  { %1939 = vmatpush1.bf16.msra.mxu0 %v4726_v3  ;;  %v381_v56 = vld [vmem:[%s7477_s3 + $0x2a8] sm:$0xff] }
  0x5c   :  { %1940 = vmatprep.subr.bf16.mxu0 %v4719_v5  ;;  %v505_v57 = vld [vmem:[%s7477_s3 + $0x688] sm:$0xff]  ;;  %v4791_v2 = vcombine.high %v377_v55, %v381_v56  ;;  %v4790_v8 = vcombine.low %v377_v55, %v381_v56  ;;  %v454_v55 = vld [vmem:[%s7477_s3 + $0x4f0] sm:$0xff] }
  0x5d   :  { %1980 = vmatpush1.bf16.msra.mxu1 %v4854_v4  ;;  %v509_v61 = vld [vmem:[%s7477_s3 + $0x6a8] sm:$0xff] }
  0x5e   :  { %1981 = vmatprep.subr.bf16.mxu1 %v4847_v6  ;;  %v4919_v3 = vcombine.high %v505_v57, %v509_v61  ;;  %v369_v4 = vld [vmem:[%s7477_s3 + $0x248] sm:$0xff]  ;;  %v4918_v9 = vcombine.low %v505_v57, %v509_v61 }
  0x5f   :  { %1941 = vmatpush1.bf16.msra.mxu0 %v4718_v11  ;;  %v373_v5 = vld [vmem:[%s7477_s3 + $0x268] sm:$0xff] }
  0x60   :  { %1942 = vmatprep.subr.bf16.mxu0 %v4711_v13  ;;  %v497_v6 = vld [vmem:[%s7477_s3 + $0x648] sm:$0xff]  ;;  %v4783_v10 = vcombine.high %v369_v4, %v373_v5  ;;  %v4782_v16 = vcombine.low %v369_v4, %v373_v5  ;;  %v446_v4 = vld [vmem:[%s7477_s3 + $0x4b0] sm:$0xff] }
  0x61   :  { %1982 = vmatpush1.bf16.msra.mxu1 %v4846_v12  ;;  %v501_v7 = vld [vmem:[%s7477_s3 + $0x668] sm:$0xff] }
  0x62   :  { %1983 = vmatprep.subr.bf16.mxu1 %v4839_v14  ;;  %v4911_v11 = vcombine.high %v497_v6, %v501_v7  ;;  %v361_v12 = vld [vmem:[%s7477_s3 + $0x208] sm:$0xff]  ;;  %v4910_v17 = vcombine.low %v497_v6, %v501_v7 }
  0x63   :  { %1943 = vmatpush1.bf16.msra.mxu0 %v4710_v19  ;;  %v365_v13 = vld [vmem:[%s7477_s3 + $0x228] sm:$0xff] }
  0x64   :  { %1944 = vmatprep.subr.bf16.mxu0 %v4831_v22  ;;  %v489_v14 = vld [vmem:[%s7477_s3 + $0x608] sm:$0xff]  ;;  %v4775_v18 = vcombine.high %v361_v12, %v365_v13  ;;  %v358_v22 = vld [vmem:[%s7477_s3 + $0x1f0] sm:$0xff]  ;;  %v4774_v26 = vcombine.low %v361_v12, %v365_v13 }
  0x65   :  { %1984 = vmatpush1.bf16.msra.mxu1 %v4838_v21  ;;  %v493_v15 = vld [vmem:[%s7477_s3 + $0x628] sm:$0xff]  ;;  %v354_v21 = vld [vmem:[%s7477_s3 + $0x1d0] sm:$0xff] }
  0x66   :  { %1985 = vmatprep.subr.bf16.mxu1 %v4959_v24  ;;  %v4903_v19 = vcombine.high %v489_v14, %v493_v15  ;;  %v482_v24 = vld [vmem:[%s7477_s3 + $0x5d0] sm:$0xff]  ;;  %v4902_v59 = vcombine.low %v489_v14, %v493_v15  ;;  %v4769_v27 = vcombine.high %v354_v21, %v358_v22  ;;  %v4768_v32 = vcombine.low %v354_v21, %v358_v22 }
  0x67   :  { %1945 = vmatpush2.bf16.msra.mxu0 %v4830_v28  ;;  %v4897_v28 = vcombine.high %v482_v24, %v486_v25  ;;  %v4896_v33 = vcombine.low %v482_v24, %v486_v25  ;;  %v438_v12 = vld [vmem:[%s7477_s3 + $0x470] sm:$0xff] }
  0x68   :  { %1946 = vmatprep.subr.bf16.mxu0 %v4823_v29  ;;  %v350_v29 = vld [vmem:[%s7477_s3 + $0x1b0] sm:$0xff] }
  0x69   :  { %1986 = vmatpush2.bf16.msra.mxu1 %v4958_v60  ;;  %v346_v60 = vld [vmem:[%s7477_s3 + $0x190] sm:$0xff] }
  0x6a   :  { %1987 = vmatprep.subr.bf16.mxu1 %v4951_v30  ;;  %v474_v30 = vld [vmem:[%s7477_s3 + $0x590] sm:$0xff]  ;;  %v4761_v34 = vcombine.high %v346_v60, %v350_v29  ;;  %v4760_v40 = vcombine.low %v346_v60, %v350_v29 }
  0x6b   :  { %1947 = vmatpush2.bf16.msra.mxu0 %v4822_v35  ;;  %v4889_v35 = vcombine.high %v474_v30, %v478_v31  ;;  %v4888_v41 = vcombine.low %v474_v30, %v478_v31  ;;  %v430_v21 = vld [vmem:[%s7477_s3 + $0x430] sm:$0xff] }
  0x6c   :  { %1948 = vmatprep.subr.bf16.mxu0 %v4815_v37  ;;  %v342_v37 = vld [vmem:[%s7477_s3 + $0x170] sm:$0xff] }
  0x6d   :  { %1988 = vmatpush2.bf16.msra.mxu1 %v4950_v36  ;;  %v338_v36 = vld [vmem:[%s7477_s3 + $0x150] sm:$0xff] }
  0x6e   :  { %1989 = vmatprep.subr.bf16.mxu1 %v4943_v38  ;;  %v466_v38 = vld [vmem:[%s7477_s3 + $0x550] sm:$0xff]  ;;  %v4753_v42 = vcombine.high %v338_v36, %v342_v37  ;;  %v4752_v48 = vcombine.low %v338_v36, %v342_v37 }
  0x6f   :  { %1949 = vmatpush2.bf16.msra.mxu0 %v4814_v43  ;;  %v4881_v43 = vcombine.high %v466_v38, %v470_v39  ;;  %v4880_v49 = vcombine.low %v466_v38, %v470_v39  ;;  %v550_v60 = vld [vmem:[%s7477_s3 + $0x7f0] sm:$0xff] }
  0x70   :  { %1950 = vmatprep.subr.bf16.mxu0 %v4807_v45  ;;  %v334_v45 = vld [vmem:[%s7477_s3 + $0x130] sm:$0xff] }
  0x71   :  { %1990 = vmatpush2.bf16.msra.mxu1 %v4942_v44  ;;  %v330_v44 = vld [vmem:[%s7477_s3 + $0x110] sm:$0xff] }
  0x72   :  { %1991 = vmatprep.subr.bf16.mxu1 %v4935_v46  ;;  %v458_v46 = vld [vmem:[%s7477_s3 + $0x510] sm:$0xff]  ;;  %v4745_v50 = vcombine.high %v330_v44, %v334_v45  ;;  %v4744_v56 = vcombine.low %v330_v44, %v334_v45 }
  0x73   :  { %1951 = vmatpush2.bf16.msra.mxu0 %v4806_v51  ;;  %v4873_v51 = vcombine.high %v458_v46, %v462_v47  ;;  %v4872_v57 = vcombine.low %v458_v46, %v462_v47  ;;  %v542_v36 = vld [vmem:[%s7477_s3 + $0x7b0] sm:$0xff] }
  0x74   :  { %1952 = vmatprep.subr.bf16.mxu0 %v4799_v53  ;;  %v326_v53 = vld [vmem:[%s7477_s3 + $0xf0] sm:$0xff] }
  0x75   :  { %1992 = vmatpush2.bf16.msra.mxu1 %v4934_v52  ;;  %v322_v52 = vld [vmem:[%s7477_s3 + $0xd0] sm:$0xff] }
  0x76   :  { %1993 = vmatprep.subr.bf16.mxu1 %v4927_v54  ;;  %v450_v54 = vld [vmem:[%s7477_s3 + $0x4d0] sm:$0xff]  ;;  %v4737_v61 = vcombine.high %v322_v52, %v326_v53  ;;  %v4736_v5 = vcombine.low %v322_v52, %v326_v53 }
  0x77   :  { %1953 = vmatpush2.bf16.msra.mxu0 %v4798_v62  ;;  %v4865_v62 = vcombine.high %v450_v54, %v454_v55  ;;  %v4864_v6 = vcombine.low %v450_v54, %v454_v55  ;;  %v534_v44 = vld [vmem:[%s7477_s3 + $0x770] sm:$0xff] }
  0x78   :  { %1954 = vmatprep.subr.bf16.mxu0 %v4791_v2  ;;  %v318_v2 = vld [vmem:[%s7477_s3 + $0xb0] sm:$0xff] }
  0x79   :  { %1994 = vmatpush2.bf16.msra.mxu1 %v4926_v63  ;;  %v314_v63 = vld [vmem:[%s7477_s3 + $0x90] sm:$0xff] }
  0x7a   :  { %1995 = vmatprep.subr.bf16.mxu1 %v4919_v3  ;;  %v442_v3 = vld [vmem:[%s7477_s3 + $0x490] sm:$0xff]  ;;  %v4729_v7 = vcombine.high %v314_v63, %v318_v2  ;;  %v4728_v13 = vcombine.low %v314_v63, %v318_v2 }
  0x7b   :  { %1955 = vmatpush2.bf16.msra.mxu0 %v4790_v8  ;;  %v4857_v8 = vcombine.high %v442_v3, %v446_v4  ;;  %v4856_v14 = vcombine.low %v442_v3, %v446_v4  ;;  %v526_v52 = vld [vmem:[%s7477_s3 + $0x730] sm:$0xff] }
  0x7c   :  { %1956 = vmatprep.subr.bf16.mxu0 %v4783_v10  ;;  %v310_v10 = vld [vmem:[%s7477_s3 + $0x70] sm:$0xff] }
  0x7d   :  { %1996 = vmatpush2.bf16.msra.mxu1 %v4918_v9  ;;  %v306_v9 = vld [vmem:[%s7477_s3 + $0x50] sm:$0xff] }
  0x7e   :  { %1997 = vmatprep.subr.bf16.mxu1 %v4911_v11  ;;  %v434_v11 = vld [vmem:[%s7477_s3 + $0x450] sm:$0xff]  ;;  %v4721_v15 = vcombine.high %v306_v9, %v310_v10  ;;  %v4720_v22 = vcombine.low %v306_v9, %v310_v10 }
  0x7f   :  { %1957 = vmatpush2.bf16.msra.mxu0 %v4782_v16  ;;  %v4849_v16 = vcombine.high %v434_v11, %v438_v12  ;;  %v4848_v24 = vcombine.low %v434_v11, %v438_v12  ;;  %v518_v63 = vld [vmem:[%s7477_s3 + $0x6f0] sm:$0xff] }
  0x80   :  { %1958 = vmatprep.subr.bf16.mxu0 %v4775_v18  ;;  %v302_v18 = vld [vmem:[%s7477_s3 + $0x30] sm:$0xff] }
  0x81   :  { %1998 = vmatpush2.bf16.msra.mxu1 %v4910_v17  ;;  %v298_v17 = vld [vmem:[%s7477_s3 + $0x10] sm:$0xff] }
  0x82   :  { %1999 = vmatprep.subr.bf16.mxu1 %v4903_v19  ;;  %v426_v19 = vld [vmem:[%s7477_s3 + $0x410] sm:$0xff]  ;;  %v4713_v25 = vcombine.high %v298_v17, %v302_v18  ;;  %v4712_v29 = vcombine.low %v298_v17, %v302_v18 }
  0x83   :  { %1959 = vmatpush2.bf16.msra.mxu0 %v4774_v26  ;;  %v4841_v26 = vcombine.high %v426_v19, %v430_v21  ;;  %v4840_v30 = vcombine.low %v426_v19, %v430_v21  ;;  %v510_v9 = vld [vmem:[%s7477_s3 + $0x6b0] sm:$0xff] }
  0x84   :  { %2010 = vmatprep.subr.bf16.mxu0 %v4769_v27  ;;  %v422_v27 = vld [vmem:[%s7477_s3 + $0x3f0] sm:$0xff] }
  0x85   :  { %2000 = vmatpush2.bf16.msra.mxu1 %v4902_v59  ;;  %v418_v59 = vld [vmem:[%s7477_s3 + $0x3d0] sm:$0xff] }
  0x86   :  { %2051 = vmatprep.subr.bf16.mxu1 %v4897_v28  ;;  %1961 = vmatmul.mubr.bf16.vlgmr.msra.gmra.mxu0 %v5723_v20  ;;  %v546_v28 = vld [vmem:[%s7477_s3 + $0x7d0] sm:$0xff]  ;;  %v4833_v31 = vcombine.high %v418_v59, %v422_v27  ;;  %v4832_v37 = vcombine.low %v418_v59, %v422_v27 }
  0x87   :  { %2011 = vmatpush1.bf16.msra.mxu0 %v4768_v32  ;;  %2042 = vmatprep.mubr.bf16.mxu0 %v5599_v0  ;;  %v4961_v32 = vcombine.high %v546_v28, %v550_v60  ;;  %v4960_v38 = vcombine.low %v546_v28, %v550_v60  ;;  %v502_v17 = vld [vmem:[%s7477_s3 + $0x670] sm:$0xff] }
  0x88   :  { %2002 = vmatmul.mubr.bf16.vlgmr.msra.gmra.mxu1 %v5733_v23  ;;  %2012 = vmatprep.subr.bf16.mxu0 %v4761_v34  ;;  %v414_v34 = vld [vmem:[%s7477_s3 + $0x3b0] sm:$0xff] }
  0x89   :  { %2052 = vmatpush1.bf16.msra.mxu1 %v4896_v33  ;;  %2083 = vmatprep.mubr.bf16.mxu1 %v5603_v1  ;;  %v410_v33 = vld [vmem:[%s7477_s3 + $0x390] sm:$0xff] }
  0x8a   :  { %2053 = vmatprep.subr.bf16.mxu1 %v4889_v35  ;;  %v538_v35 = vld [vmem:[%s7477_s3 + $0x790] sm:$0xff]  ;;  %v4825_v39 = vcombine.high %v410_v33, %v414_v34  ;;  %v4824_v45 = vcombine.low %v410_v33, %v414_v34  ;;  %v487_v33 = vld [vmem:[%s7477_s3 + $0x5f8] sm:$0xff] }
  0x8b   :  { %2013 = vmatpush1.bf16.msra.mxu0 %v4760_v40  ;;  %v4953_v40 = vcombine.high %v538_v35, %v542_v36  ;;  %v4952_v46 = vcombine.low %v538_v35, %v542_v36  ;;  %v494_v59 = vld [vmem:[%s7477_s3 + $0x630] sm:$0xff] }
  0x8c   :  { %2014 = vmatprep.subr.bf16.mxu0 %v4753_v42  ;;  %v406_v42 = vld [vmem:[%s7477_s3 + $0x370] sm:$0xff] }
  0x8d   :  { %2054 = vmatpush1.bf16.msra.mxu1 %v4888_v41  ;;  %v402_v41 = vld [vmem:[%s7477_s3 + $0x350] sm:$0xff] }
  0x8e   :  { %2055 = vmatprep.subr.bf16.mxu1 %v4881_v43  ;;  %v530_v43 = vld [vmem:[%s7477_s3 + $0x750] sm:$0xff]  ;;  %v4817_v47 = vcombine.high %v402_v41, %v406_v42  ;;  %v4816_v53 = vcombine.low %v402_v41, %v406_v42  ;;  %v479_v41 = vld [vmem:[%s7477_s3 + $0x5b8] sm:$0xff] }
  0x8f   :  { %2015 = vmatpush1.bf16.msra.mxu0 %v4752_v48  ;;  %v4945_v48 = vcombine.high %v530_v43, %v534_v44  ;;  %v4944_v54 = vcombine.low %v530_v43, %v534_v44 }
  0x90   :  { %2016 = vmatprep.subr.bf16.mxu0 %v4745_v50  ;;  %v398_v50 = vld [vmem:[%s7477_s3 + $0x330] sm:$0xff] }
  0x91   :  { %2056 = vmatpush1.bf16.msra.mxu1 %v4880_v49  ;;  %v394_v49 = vld [vmem:[%s7477_s3 + $0x310] sm:$0xff] }
  0x92   :  { %2057 = vmatprep.subr.bf16.mxu1 %v4873_v51  ;;  %v522_v51 = vld [vmem:[%s7477_s3 + $0x710] sm:$0xff]  ;;  %v4809_v55 = vcombine.high %v394_v49, %v398_v50  ;;  %v4808_v2 = vcombine.low %v394_v49, %v398_v50  ;;  %v471_v49 = vld [vmem:[%s7477_s3 + $0x578] sm:$0xff] }
  0x93   :  { %2017 = vmatpush1.bf16.msra.mxu0 %v4744_v56  ;;  %v4937_v56 = vcombine.high %v522_v51, %v526_v52  ;;  %v4936_v3 = vcombine.low %v522_v51, %v526_v52 }
  0x94   :  { %2018 = vmatprep.subr.bf16.mxu0 %v4737_v61  ;;  %v390_v61 = vld [vmem:[%s7477_s3 + $0x2f0] sm:$0xff] }
  0x95   :  { %2058 = vmatpush1.bf16.msra.mxu1 %v4872_v57  ;;  %v386_v57 = vld [vmem:[%s7477_s3 + $0x2d0] sm:$0xff] }
  0x96   :  { %2059 = vmatprep.subr.bf16.mxu1 %v4865_v62  ;;  %v514_v62 = vld [vmem:[%s7477_s3 + $0x6d0] sm:$0xff]  ;;  %v4801_v4 = vcombine.high %v386_v57, %v390_v61  ;;  %v4800_v10 = vcombine.low %v386_v57, %v390_v61  ;;  %v463_v57 = vld [vmem:[%s7477_s3 + $0x538] sm:$0xff] }
  0x97   :  { %2019 = vmatpush1.bf16.msra.mxu0 %v4736_v5  ;;  %v4929_v5 = vcombine.high %v514_v62, %v518_v63  ;;  %v4928_v11 = vcombine.low %v514_v62, %v518_v63 }
  0x98   :  { %2020 = vmatprep.subr.bf16.mxu0 %v4729_v7  ;;  %v382_v7 = vld [vmem:[%s7477_s3 + $0x2b0] sm:$0xff] }
  0x99   :  { %2060 = vmatpush1.bf16.msra.mxu1 %v4864_v6  ;;  %v378_v6 = vld [vmem:[%s7477_s3 + $0x290] sm:$0xff] }
  0x9a   :  { %2061 = vmatprep.subr.bf16.mxu1 %v4857_v8  ;;  %v506_v8 = vld [vmem:[%s7477_s3 + $0x690] sm:$0xff]  ;;  %v4793_v12 = vcombine.high %v378_v6, %v382_v7  ;;  %v4792_v18 = vcombine.low %v378_v6, %v382_v7 }
  0x9b   :  { %2021 = vmatpush1.bf16.msra.mxu0 %v4728_v13  ;;  %v4921_v13 = vcombine.high %v506_v8, %v510_v9  ;;  %v4920_v19 = vcombine.low %v506_v8, %v510_v9  ;;  %v315_v9 = vld [vmem:[%s7477_s3 + $0x98] sm:$0xff] }
  0x9c   :  { %2022 = vmatprep.subr.bf16.mxu0 %v4721_v15  ;;  %v374_v15 = vld [vmem:[%s7477_s3 + $0x270] sm:$0xff] }
  0x9d   :  { %2062 = vmatpush1.bf16.msra.mxu1 %v4856_v14  ;;  %v370_v14 = vld [vmem:[%s7477_s3 + $0x250] sm:$0xff] }
  0x9e   :  { %2063 = vmatprep.subr.bf16.mxu1 %v4849_v16  ;;  %v498_v16 = vld [vmem:[%s7477_s3 + $0x650] sm:$0xff]  ;;  %v4785_v21 = vcombine.high %v370_v14, %v374_v15  ;;  %v4784_v27 = vcombine.low %v370_v14, %v374_v15 }
  0x9f   :  { %2023 = vmatpush1.bf16.msra.mxu0 %v4720_v22  ;;  %v4913_v22 = vcombine.high %v498_v16, %v502_v17  ;;  %v4912_v28 = vcombine.low %v498_v16, %v502_v17  ;;  %v307_v17 = vld [vmem:[%s7477_s3 + $0x58] sm:$0xff] }
  0xa0   :  { %2024 = vmatprep.subr.bf16.mxu0 %v4713_v25  ;;  %v366_v25 = vld [vmem:[%s7477_s3 + $0x230] sm:$0xff] }
  0xa1   :  { %2064 = vmatpush1.bf16.msra.mxu1 %v4848_v24  ;;  %v362_v24 = vld [vmem:[%s7477_s3 + $0x210] sm:$0xff] }
  0xa2   :  { %2065 = vmatprep.subr.bf16.mxu1 %v4841_v26  ;;  %v490_v26 = vld [vmem:[%s7477_s3 + $0x610] sm:$0xff]  ;;  %v4777_v60 = vcombine.high %v362_v24, %v366_v25  ;;  %v4776_v34 = vcombine.low %v362_v24, %v366_v25 }
  0xa3   :  { %2025 = vmatpush1.bf16.msra.mxu0 %v4712_v29  ;;  %v4905_v29 = vcombine.high %v490_v26, %v494_v59  ;;  %v4904_v35 = vcombine.low %v490_v26, %v494_v59  ;;  %v299_v59 = vld [vmem:[%s7477_s3 + $0x18] sm:$0xff] }
  0xa4   :  { %2026 = vmatprep.subr.bf16.mxu0 %v4833_v31  ;;  %v359_v31 = vld [vmem:[%s7477_s3 + $0x1f8] sm:$0xff] }
  0xa5   :  { %2066 = vmatpush1.bf16.msra.mxu1 %v4840_v30  ;;  %v355_v30 = vld [vmem:[%s7477_s3 + $0x1d8] sm:$0xff] }
  0xa6   :  { %2067 = vmatprep.subr.bf16.mxu1 %v4961_v32  ;;  %v483_v32 = vld [vmem:[%s7477_s3 + $0x5d8] sm:$0xff]  ;;  %v4771_v36 = vcombine.high %v355_v30, %v359_v31  ;;  %v4770_v42 = vcombine.low %v355_v30, %v359_v31 }
  0xa7   :  { %2027 = vmatpush2.bf16.msra.mxu0 %v4832_v37  ;;  %v4899_v37 = vcombine.high %v483_v32, %v487_v33  ;;  %v4898_v43 = vcombine.low %v483_v32, %v487_v33  ;;  %v419_v33 = vld [vmem:[%s7477_s3 + $0x3d8] sm:$0xff] }
  0xa8   :  { %2028 = vmatprep.subr.bf16.mxu0 %v4825_v39  ;;  %v351_v39 = vld [vmem:[%s7477_s3 + $0x1b8] sm:$0xff] }
  0xa9   :  { %2068 = vmatpush2.bf16.msra.mxu1 %v4960_v38  ;;  %v347_v38 = vld [vmem:[%s7477_s3 + $0x198] sm:$0xff] }
  0xaa   :  { %2069 = vmatprep.subr.bf16.mxu1 %v4953_v40  ;;  %v475_v40 = vld [vmem:[%s7477_s3 + $0x598] sm:$0xff]  ;;  %v4763_v44 = vcombine.high %v347_v38, %v351_v39  ;;  %v4762_v50 = vcombine.low %v347_v38, %v351_v39 }
  0xab   :  { %2029 = vmatpush2.bf16.msra.mxu0 %v4824_v45  ;;  %v4891_v45 = vcombine.high %v475_v40, %v479_v41  ;;  %v4890_v51 = vcombine.low %v475_v40, %v479_v41  ;;  %v411_v41 = vld [vmem:[%s7477_s3 + $0x398] sm:$0xff] }
  0xac   :  { %2030 = vmatprep.subr.bf16.mxu0 %v4817_v47  ;;  %v343_v47 = vld [vmem:[%s7477_s3 + $0x178] sm:$0xff] }
  0xad   :  { %2070 = vmatpush2.bf16.msra.mxu1 %v4952_v46  ;;  %v339_v46 = vld [vmem:[%s7477_s3 + $0x158] sm:$0xff] }
  0xae   :  { %2071 = vmatprep.subr.bf16.mxu1 %v4945_v48  ;;  %v467_v48 = vld [vmem:[%s7477_s3 + $0x558] sm:$0xff]  ;;  %v4755_v52 = vcombine.high %v339_v46, %v343_v47  ;;  %v4754_v61 = vcombine.low %v339_v46, %v343_v47 }
  0xaf   :  { %2031 = vmatpush2.bf16.msra.mxu0 %v4816_v53  ;;  %v4883_v53 = vcombine.high %v467_v48, %v471_v49  ;;  %v4882_v62 = vcombine.low %v467_v48, %v471_v49  ;;  %v403_v49 = vld [vmem:[%s7477_s3 + $0x358] sm:$0xff] }
  0xb0   :  { %2032 = vmatprep.subr.bf16.mxu0 %v4809_v55  ;;  %v335_v55 = vld [vmem:[%s7477_s3 + $0x138] sm:$0xff] }
  0xb1   :  { %2072 = vmatpush2.bf16.msra.mxu1 %v4944_v54  ;;  %v331_v54 = vld [vmem:[%s7477_s3 + $0x118] sm:$0xff] }
  0xb2   :  { %2073 = vmatprep.subr.bf16.mxu1 %v4937_v56  ;;  %v459_v56 = vld [vmem:[%s7477_s3 + $0x518] sm:$0xff]  ;;  %v4747_v63 = vcombine.high %v331_v54, %v335_v55 }
  0xb3   :  { %2033 = vmatpush2.bf16.msra.mxu0 %v4808_v2  ;;  %v4875_v2 = vcombine.high %v459_v56, %v463_v57  ;;  %v4874_v6 = vcombine.low %v459_v56, %v463_v57  ;;  %v395_v57 = vld [vmem:[%s7477_s3 + $0x318] sm:$0xff] }
  0xb4   :  { %2034 = vmatprep.subr.bf16.mxu0 %v4801_v4  ;;  %v455_v4 = vld [vmem:[%s7477_s3 + $0x4f8] sm:$0xff] }
  0xb5   :  { %2074 = vmatpush2.bf16.msra.mxu1 %v4936_v3  ;;  %v327_v3 = vld [vmem:[%s7477_s3 + $0xf8] sm:$0xff] }
  0xb6   :  { %2075 = vmatprep.subr.bf16.mxu1 %v4929_v5  ;;  %v4746_v5 = vcombine.low %v331_v54, %v335_v55 }
  0xb7   :  { %2035 = vmatpush2.bf16.msra.mxu0 %v4800_v10  ;;  %v319_v10 = vld [vmem:[%s7477_s3 + $0xb8] sm:$0xff] }
  0xb8   :  { %2036 = vmatprep.subr.bf16.mxu0 %v4793_v12  ;;  %v447_v12 = vld [vmem:[%s7477_s3 + $0x4b8] sm:$0xff]  ;;  %v4731_v15 = vcombine.high %v315_v9, %v319_v10 }
  0xb9   :  { %2076 = vmatpush2.bf16.msra.mxu1 %v4928_v11  ;;  %v443_v11 = vld [vmem:[%s7477_s3 + $0x498] sm:$0xff] }
  0xba   :  { %2077 = vmatprep.subr.bf16.mxu1 %v4921_v13  ;;  %v4859_v16 = vcombine.high %v443_v11, %v447_v12  ;;  %v4858_v24 = vcombine.low %v443_v11, %v447_v12  ;;  %v379_v12 = vld [vmem:[%s7477_s3 + $0x298] sm:$0xff] }
  0xbb   :  { %2037 = vmatpush2.bf16.msra.mxu0 %v4792_v18  ;;  %v311_v18 = vld [vmem:[%s7477_s3 + $0x78] sm:$0xff] }
  0xbc   :  { %2038 = vmatprep.subr.bf16.mxu0 %v4785_v21  ;;  %v439_v21 = vld [vmem:[%s7477_s3 + $0x478] sm:$0xff]  ;;  %v4723_v25 = vcombine.high %v307_v17, %v311_v18 }
  0xbd   :  { %2078 = vmatpush2.bf16.msra.mxu1 %v4920_v19  ;;  %v435_v19 = vld [vmem:[%s7477_s3 + $0x458] sm:$0xff] }
  0xbe   :  { %2079 = vmatprep.subr.bf16.mxu1 %v4913_v22  ;;  %v4730_v22 = vcombine.low %v315_v9, %v319_v10  ;;  %v4851_v26 = vcombine.high %v435_v19, %v439_v21  ;;  %v4850_v30 = vcombine.low %v435_v19, %v439_v21  ;;  %v371_v21 = vld [vmem:[%s7477_s3 + $0x258] sm:$0xff] }
  0xbf   :  { %2039 = vmatpush2.bf16.msra.mxu0 %v4784_v27  ;;  %v303_v27 = vld [vmem:[%s7477_s3 + $0x38] sm:$0xff] }
  0xc0   :  { %2040 = vmatprep.subr.bf16.mxu0 %v4777_v60  ;;  %v431_v60 = vld [vmem:[%s7477_s3 + $0x438] sm:$0xff]  ;;  %v4715_v31 = vcombine.high %v299_v59, %v303_v27 }
  0xc1   :  { %2080 = vmatpush2.bf16.msra.mxu1 %v4912_v28  ;;  %v427_v28 = vld [vmem:[%s7477_s3 + $0x418] sm:$0xff] }
  0xc2   :  { %2081 = vmatprep.subr.bf16.mxu1 %v4905_v29  ;;  %v4722_v29 = vcombine.low %v307_v17, %v311_v18  ;;  %v4843_v32 = vcombine.high %v427_v28, %v431_v60  ;;  %v4842_v38 = vcombine.low %v427_v28, %v431_v60  ;;  %v363_v60 = vld [vmem:[%s7477_s3 + $0x218] sm:$0xff] }
  0xc3   :  { %2041 = vmatpush2.bf16.msra.mxu0 %v4776_v34  ;;  %v423_v34 = vld [vmem:[%s7477_s3 + $0x3f8] sm:$0xff] }
  0xc4   :  { %2092 = vmatprep.subr.bf16.mxu0 %v4771_v36  ;;  %v551_v36 = vld [vmem:[%s7477_s3 + $0x7f8] sm:$0xff]  ;;  %v4835_v39 = vcombine.high %v419_v33, %v423_v34 }
  0xc5   :  { %2082 = vmatpush2.bf16.msra.mxu1 %v4904_v35  ;;  %v547_v35 = vld [vmem:[%s7477_s3 + $0x7d8] sm:$0xff] }
  0xc6   :  { %2133 = vmatprep.subr.bf16.mxu1 %v4899_v37  ;;  %2043 = vmatmul.mubr.bf16.vlgmr.msra.gmra.mxu0 %v5723_v20  ;;  %v4714_v37 = vcombine.low %v299_v59, %v303_v27  ;;  %v4963_v40 = vcombine.high %v547_v35, %v551_v36  ;;  %v4962_v46 = vcombine.low %v547_v35, %v551_v36  ;;  %v96_v36 = vld [vmem:[%s7479_s2 + $0x1c0] sm:$0xff] }
  0xc7   :  { %2093 = vmatpush1.bf16.msra.mxu0 %v4770_v42  ;;  %2124 = vmatprep.mubr.bf16.mxu0 %v5599_v0  ;;  %v323_v0 = vld [vmem:[%s7477_s3 + $0xd8] sm:$0xff] }
  0xc8   :  { %2084 = vmatmul.mubr.bf16.vlgmr.msra.gmra.mxu1 %v5733_v23  ;;  %2094 = vmatprep.subr.bf16.mxu0 %v4763_v44  ;;  %v4739_v7 = vcombine.high %v323_v0, %v327_v3  ;;  %v4738_v13 = vcombine.low %v323_v0, %v327_v3  ;;  %v415_v42 = vld [vmem:[%s7477_s3 + $0x3b8] sm:$0xff] }
  0xc9   :  { %2134 = vmatpush1.bf16.msra.mxu1 %v4898_v43  ;;  %2165 = vmatprep.mubr.bf16.mxu1 %v5603_v1  ;;  %v451_v1 = vld [vmem:[%s7477_s3 + $0x4d8] sm:$0xff]  ;;  %v4827_v47 = vcombine.high %v411_v41, %v415_v42 }
  0xca   :  { %2135 = vmatprep.subr.bf16.mxu1 %v4891_v45  ;;  %v4867_v8 = vcombine.high %v451_v1, %v455_v4  ;;  %v4866_v14 = vcombine.low %v451_v1, %v455_v4  ;;  %v539_v43 = vld [vmem:[%s7477_s3 + $0x798] sm:$0xff]  ;;  %v4834_v45 = vcombine.low %v419_v33, %v423_v34 }
  0xcb   :  { %2095 = vmatpush1.bf16.msra.mxu0 %v4762_v50  ;;  %v543_v44 = vld [vmem:[%s7477_s3 + $0x7b8] sm:$0xff] }
  0xcc   :  { %2096 = vmatprep.subr.bf16.mxu0 %v4755_v52  ;;  %v4955_v48 = vcombine.high %v539_v43, %v543_v44  ;;  %v407_v50 = vld [vmem:[%s7477_s3 + $0x378] sm:$0xff]  ;;  %v4954_v54 = vcombine.low %v539_v43, %v543_v44 }
  0xcd   :  { %2136 = vmatpush1.bf16.msra.mxu1 %v4890_v51  ;;  %v531_v51 = vld [vmem:[%s7477_s3 + $0x758] sm:$0xff]  ;;  %v4819_v55 = vcombine.high %v403_v49, %v407_v50 }
  0xce   :  { %2137 = vmatprep.subr.bf16.mxu1 %v4883_v53  ;;  %v535_v52 = vld [vmem:[%s7477_s3 + $0x778] sm:$0xff]  ;;  %v4826_v53 = vcombine.low %v411_v41, %v415_v42  ;;  %v27_v42 = vld [vmem:[%s7480_s0 + $0x8] sm:$0xff] }
  0xcf   :  { %2097 = vmatpush1.bf16.msra.mxu0 %v4754_v61  ;;  %v4947_v56 = vcombine.high %v531_v51, %v535_v52  ;;  %v399_v61 = vld [vmem:[%s7477_s3 + $0x338] sm:$0xff]  ;;  %v4946_v0 = vcombine.low %v531_v51, %v535_v52  ;;  %v6333_v51 = vmax.bf16 %v5448_v58, %v27_v42 }
  0xd0   :  { %2098 = vmatprep.subr.bf16.mxu0 %v4747_v63  ;;  %v527_v63 = vld [vmem:[%s7477_s3 + $0x738] sm:$0xff]  ;;  %v4811_v3 = vcombine.high %v395_v57, %v399_v61 }
  0xd1   :  { %2138 = vmatpush1.bf16.msra.mxu1 %v4882_v62  ;;  %v523_v62 = vld [vmem:[%s7477_s3 + $0x718] sm:$0xff] }
  0xd2   :  { %2139 = vmatprep.subr.bf16.mxu1 %v4875_v2  ;;  %v4818_v2 = vcombine.low %v403_v49, %v407_v50  ;;  %v4939_v1 = vcombine.high %v523_v62, %v527_v63  ;;  %v387_v4 = vld [vmem:[%s7477_s3 + $0x2d8] sm:$0xff]  ;;  %v4938_v9 = vcombine.low %v523_v62, %v527_v63  ;;  %v216_v49 = vld [vmem:[%s7479_s2 + $0x580] sm:$0xff] }
  0xd3   :  { %2099 = vmatpush1.bf16.msra.mxu0 %v4746_v5  ;;  %v391_v5 = vld [vmem:[%s7477_s3 + $0x2f8] sm:$0xff]  ;;  %v220_v50 = vld [vmem:[%s7479_s2 + $0x5a0] sm:$0xff] }
  0xd4   :  { %2100 = vmatprep.subr.bf16.mxu0 %v4739_v7  ;;  %v519_v7 = vld [vmem:[%s7477_s3 + $0x6f8] sm:$0xff]  ;;  %v4803_v10 = vcombine.high %v387_v4, %v391_v5  ;;  %v208_v62 = vld [vmem:[%s7479_s2 + $0x540] sm:$0xff] }
  0xd5   :  { %2140 = vmatpush1.bf16.msra.mxu1 %v4874_v6  ;;  %v515_v6 = vld [vmem:[%s7477_s3 + $0x6d8] sm:$0xff]  ;;  %v212_v63 = vld [vmem:[%s7479_s2 + $0x560] sm:$0xff] }
  0xd6   :  { %2141 = vmatprep.subr.bf16.mxu1 %v4867_v8  ;;  %v4810_v8 = vcombine.low %v395_v57, %v399_v61  ;;  %v4931_v11 = vcombine.high %v515_v6, %v519_v7  ;;  %v4930_v17 = vcombine.low %v515_v6, %v519_v7  ;;  %v84_v57 = vld [vmem:[%s7479_s2 + $0x160] sm:$0xff]  ;;  %v5137_v7 = vcombine.high %v208_v62, %v212_v63 }
  0xd7   :  { %2101 = vmatpush1.bf16.msra.mxu0 %v4738_v13  ;;  %v383_v13 = vld [vmem:[%s7477_s3 + $0x2b8] sm:$0xff] }
  0xd8   :  { %2102 = vmatprep.subr.bf16.mxu0 %v4731_v15  ;;  %v511_v15 = vld [vmem:[%s7477_s3 + $0x6b8] sm:$0xff]  ;;  %v4795_v18 = vcombine.high %v379_v12, %v383_v13 }
  0xd9   :  { %2142 = vmatpush1.bf16.msra.mxu1 %v4866_v14  ;;  %v507_v14 = vld [vmem:[%s7477_s3 + $0x698] sm:$0xff] }
  0xda   :  { %2143 = vmatprep.subr.bf16.mxu1 %v4859_v16  ;;  %v4802_v16 = vcombine.low %v387_v4, %v391_v5  ;;  %v4923_v19 = vcombine.high %v507_v14, %v511_v15  ;;  %v4922_v59 = vcombine.low %v507_v14, %v511_v15  ;;  %v5144_v4 = vcombine.low %v216_v49, %v220_v50 }
  0xdb   :  { %2103 = vmatpush1.bf16.msra.mxu0 %v4730_v22  ;;  %v375_v22 = vld [vmem:[%s7477_s3 + $0x278] sm:$0xff] }
  0xdc   :  { %2104 = vmatprep.subr.bf16.mxu0 %v4723_v25  ;;  %v503_v25 = vld [vmem:[%s7477_s3 + $0x678] sm:$0xff]  ;;  %v4787_v27 = vcombine.high %v371_v21, %v375_v22 }
  0xdd   :  { %2144 = vmatpush1.bf16.msra.mxu1 %v4858_v24  ;;  %v499_v24 = vld [vmem:[%s7477_s3 + $0x658] sm:$0xff] }
  0xde   :  { %2145 = vmatprep.subr.bf16.mxu1 %v4851_v26  ;;  %v4794_v26 = vcombine.low %v379_v12, %v383_v13  ;;  %v4915_v28 = vcombine.high %v499_v24, %v503_v25  ;;  %v4914_v33 = vcombine.low %v499_v24, %v503_v25  ;;  %v204_v12 = vld [vmem:[%s7479_s2 + $0x520] sm:$0xff] }
  0xdf   :  { %2105 = vmatpush1.bf16.msra.mxu0 %v4722_v29  ;;  %v367_v29 = vld [vmem:[%s7477_s3 + $0x238] sm:$0xff]  ;;  %v192_v24 = vld [vmem:[%s7479_s2 + $0x4c0] sm:$0xff] }
  0xe0   :  { %2106 = vmatprep.subr.bf16.mxu0 %v4715_v31  ;;  %v495_v31 = vld [vmem:[%s7477_s3 + $0x638] sm:$0xff]  ;;  %v4779_v34 = vcombine.high %v363_v60, %v367_v29  ;;  %v4778_v41 = vcombine.low %v363_v60, %v367_v29  ;;  %v196_v25 = vld [vmem:[%s7479_s2 + $0x4e0] sm:$0xff] }
  0xe1   :  { %2146 = vmatpush1.bf16.msra.mxu1 %v4850_v30  ;;  %v491_v30 = vld [vmem:[%s7477_s3 + $0x618] sm:$0xff]  ;;  %v56_v60 = vld [vmem:[%s7479_s2 + $0x80] sm:$0xff] }
  0xe2   :  { %2147 = vmatprep.subr.bf16.mxu1 %v4843_v32  ;;  %v4786_v32 = vcombine.low %v371_v21, %v375_v22  ;;  %v4907_v35 = vcombine.high %v491_v30, %v495_v31  ;;  %v4906_v43 = vcombine.low %v491_v30, %v495_v31  ;;  %v64_v21 = vld [vmem:[%s7479_s2 + $0xc0] sm:$0xff] }
  0xe3   :  { %2107 = vmatpush1.bf16.msra.mxu0 %v4714_v37  ;;  %v100_v37 = vld [vmem:[%s7479_s2 + $0x1e0] sm:$0xff] }
  0xe4   :  { %2108 = vmatprep.subr.bf16.mxu0 %v4835_v39  ;;  %v228_v39 = vld [vmem:[%s7479_s2 + $0x5e0] sm:$0xff]  ;;  %v5025_v44 = vcombine.high %v96_v36, %v100_v37  ;;  %v5024_v52 = vcombine.low %v96_v36, %v100_v37 }
  0xe5   :  { %2148 = vmatpush1.bf16.msra.mxu1 %v4842_v38  ;;  %v224_v38 = vld [vmem:[%s7479_s2 + $0x5c0] sm:$0xff] }
  0xe6   :  { %2149 = vmatprep.subr.bf16.mxu1 %v4963_v40  ;;  %v26_v40 = vld [vmem:[%s7480_s0] sm:$0xff] }
  0xe7   :  { %2109 = vmatpush2.bf16.msra.mxu0 %v4834_v45  ;;  %v5153_v45 = vcombine.high %v224_v38, %v228_v39  ;;  %v68_v22 = vld [vmem:[%s7479_s2 + $0xe0] sm:$0xff] }
  0xe8   :  { %2110 = vmatprep.subr.bf16.mxu0 %v4827_v47  ;;  %v92_v47 = vld [vmem:[%s7479_s2 + $0x1a0] sm:$0xff] }
  0xe9   :  { %2150 = vmatpush2.bf16.msra.mxu1 %v4962_v46  ;;  %v88_v46 = vld [vmem:[%s7479_s2 + $0x180] sm:$0xff] }
  0xea   :  { %2151 = vmatprep.subr.bf16.mxu1 %v4955_v48  ;;  %v6324_v48 = vmax.bf16 %v5448_v58, %v26_v40  ;;  %v60_v29 = vld [vmem:[%s7479_s2 + $0xa0] sm:$0xff] }
  0xeb   :  { %2111 = vmatpush2.bf16.msra.mxu0 %v4826_v53  ;;  %v5152_v53 = vcombine.low %v224_v38, %v228_v39  ;;  %v184_v30 = vld [vmem:[%s7479_s2 + $0x480] sm:$0xff]  ;;  %v4984_v40 = vcombine.low %v56_v60, %v60_v29 }
  0xec   :  { %2112 = vmatprep.subr.bf16.mxu0 %v4819_v55  ;;  %v5145_v55 = vcombine.high %v216_v49, %v220_v50  ;;  %v6343_v58 = vcombine.high %v6324_v48, %v6324_v48  ;;  %v188_v31 = vld [vmem:[%s7479_s2 + $0x4a0] sm:$0xff] }
  0xed   :  { %2152 = vmatpush2.bf16.msra.mxu1 %v4954_v54  ;;  %v5017_v54 = vcombine.high %v88_v46, %v92_v47  ;;  %v48_v36 = vld [vmem:[%s7479_s2 + $0x40] sm:$0xff] }
  0xee   :  { %2153 = vmatprep.subr.bf16.mxu1 %v4947_v56  ;;  %v80_v56 = vld [vmem:[%s7479_s2 + $0x140] sm:$0xff] }
  0xef   :  { %2113 = vmatpush2.bf16.msra.mxu0 %v4818_v2  ;;  %v6354_v2 = vcombine.high %v6333_v51, %v6333_v51  ;;  %v5009_v5 = vcombine.high %v80_v56, %v84_v57  ;;  %v5008_v14 = vcombine.low %v80_v56, %v84_v57  ;;  %v52_v37 = vld [vmem:[%s7479_s2 + $0x60] sm:$0xff] }
  0xf0   :  { %2114 = vmatprep.subr.bf16.mxu0 %v4811_v3  ;;  %v5016_v3 = vcombine.low %v88_v46, %v92_v47  ;;  %v176_v38 = vld [vmem:[%s7479_s2 + $0x440] sm:$0xff]  ;;  %v4977_v42 = vcombine.high %v48_v36, %v52_v37  ;;  %v4976_v49 = vcombine.low %v48_v36, %v52_v37 }
  0xf1   :  { %2154 = vmatpush2.bf16.msra.mxu1 %v4946_v0  ;;  %v180_v39 = vld [vmem:[%s7479_s2 + $0x460] sm:$0xff] }
  0xf2   :  { %2155 = vmatprep.subr.bf16.mxu1 %v4939_v1  ;;  %v168_v46 = vld [vmem:[%s7479_s2 + $0x400] sm:$0xff]  ;;  %v5104_v50 = vcombine.low %v176_v38, %v180_v39 }
  0xf3   :  { %2115 = vmatpush2.bf16.msra.mxu0 %v4810_v8  ;;  %v72_v8 = vld [vmem:[%s7479_s2 + $0x100] sm:$0xff] }
  0xf4   :  { %2116 = vmatprep.subr.bf16.mxu0 %v4803_v10  ;;  %v172_v47 = vld [vmem:[%s7479_s2 + $0x420] sm:$0xff] }
  0xf5   :  { %2156 = vmatpush2.bf16.msra.mxu1 %v4938_v9  ;;  %v288_v56 = vld [vmem:[%s7479_s2 + $0x7c0] sm:$0xff] }
  0xf6   :  { %2157 = vmatprep.subr.bf16.mxu1 %v4931_v11  ;;  %v200_v11 = vld [vmem:[%s7479_s2 + $0x500] sm:$0xff] }
  0xf7   :  { %2117 = vmatpush2.bf16.msra.mxu0 %v4802_v16  ;;  %v5136_v16 = vcombine.low %v208_v62, %v212_v63  ;;  %v292_v57 = vld [vmem:[%s7479_s2 + $0x7e0] sm:$0xff]  ;;  %v5096_v62 = vcombine.low %v168_v46, %v172_v47 }
  0xf8   :  { %2118 = vmatprep.subr.bf16.mxu0 %v4795_v18  ;;  %v248_v36 = vld [vmem:[%s7479_s2 + $0x680] sm:$0xff] }
  0xf9   :  { %2158 = vmatpush2.bf16.msra.mxu1 %v4930_v17  ;;  %v252_v37 = vld [vmem:[%s7479_s2 + $0x6a0] sm:$0xff] }
  0xfa   :  { %2159 = vmatprep.subr.bf16.mxu1 %v4923_v19  ;;  %v5129_v19 = vcombine.high %v200_v11, %v204_v12 }
  0xfb   :  { %2119 = vmatpush2.bf16.msra.mxu0 %v4794_v26 }
  0xfc   :  { %2120 = vmatprep.subr.bf16.mxu0 %v4787_v27  ;;  %v4993_v27 = vcombine.high %v64_v21, %v68_v22 }
  0xfd   :  { %2160 = vmatpush2.bf16.msra.mxu1 %v4922_v59  ;;  %v5128_v59 = vcombine.low %v200_v11, %v204_v12  ;;  %v148_v11 = vld [vmem:[%s7479_s2 + $0x360] sm:$0xff] }
  0xfe   :  { %2161 = vmatprep.subr.bf16.mxu1 %v4915_v28  ;;  %v5121_v28 = vcombine.high %v192_v24, %v196_v25  ;;  %v272_v12 = vld [vmem:[%s7479_s2 + $0x740] sm:$0xff] }
  0xff   :  { %2121 = vmatpush2.bf16.msra.mxu0 %v4786_v32  ;;  %v4992_v32 = vcombine.low %v64_v21, %v68_v22  ;;  %v264_v21 = vld [vmem:[%s7479_s2 + $0x700] sm:$0xff] }
 0x100   :  { %2122 = vmatprep.subr.bf16.mxu0 %v4779_v34  ;;  %v4985_v34 = vcombine.high %v56_v60, %v60_v29  ;;  %v268_v22 = vld [vmem:[%s7479_s2 + $0x720] sm:$0xff] }
 0x101   :  { %2162 = vmatpush2.bf16.msra.mxu1 %v4914_v33  ;;  %v5120_v33 = vcombine.low %v192_v24, %v196_v25  ;;  %v256_v60 = vld [vmem:[%s7479_s2 + $0x6c0] sm:$0xff] }
 0x102   :  { %2163 = vmatprep.subr.bf16.mxu1 %v4907_v35  ;;  %v5113_v35 = vcombine.high %v184_v30, %v188_v31  ;;  %v260_v29 = vld [vmem:[%s7479_s2 + $0x6e0] sm:$0xff] }
 0x103   :  { %2123 = vmatpush2.bf16.msra.mxu0 %v4778_v41  ;;  %v5112_v41 = vcombine.low %v184_v30, %v188_v31  ;;  %v5192_v31 = vcombine.low %v264_v21, %v268_v22 }
 0x104   :  { %3468 = vmatprep.subr.bf16.mxu0 %v5025_v44  ;;  %v40_v44 = vld [vmem:[%s7479_s2] sm:$0xff] }
 0x105   :  { %2164 = vmatpush2.bf16.msra.mxu1 %v4906_v43  ;;  %v5105_v43 = vcombine.high %v176_v38, %v180_v39  ;;  %v5184_v39 = vcombine.low %v256_v60, %v260_v29 }
 0x106   :  { %3509 = vmatprep.subr.bf16.mxu1 %v5153_v45  ;;  %v1880_v61 = vpop.f32.mrf.mxu0  ;;  %2125 = vmatmul.mubr.bf16.vlgmr.msra.gmra.mxu0 %v5723_v20  ;;  %v44_v45 = vld [vmem:[%s7479_s2 + $0x20] sm:$0xff] }
 0x107   :  { %3469 = vmatpush1.bf16.msra.mxu0 %v5024_v52  ;;  %3500 = vmatprep.mubr.bf16.mxu0 %v6343_v58  ;;  %v4969_v52 = vcombine.high %v40_v44, %v44_v45 }
 0x108   :  { %v1921_v0 = vpop.f32.mrf.mxu1  ;;  %2166 = vmatmul.mubr.bf16.vlgmr.msra.gmra.mxu1 %v5733_v23  ;;  %v1882_v20 = vpop.f32.mrf.mxu0  ;;  %3470 = vmatprep.subr.bf16.mxu0 %v5017_v54  ;;  %v76_v23 = vld [vmem:[%s7479_s2 + $0x120] sm:$0xff] }
 0x109   :  { %v6357_v1 = vadd.f32 %v1921_v0, %v1880_v61  ;;  %3510 = vmatpush1.bf16.msra.mxu1 %v5152_v53  ;;  %3541 = vmatprep.mubr.bf16.mxu1 %v6354_v2  ;;  %v5001_v17 = vcombine.high %v72_v8, %v76_v23  ;;  %v5000_v26 = vcombine.low %v72_v8, %v76_v23  ;;  %v160_v54 = vld [vmem:[%s7479_s2 + $0x3c0] sm:$0xff] }
 0x10a   :  { %v1923_v6 = vpop.f32.mrf.mxu1  ;;  %3511 = vmatprep.subr.bf16.mxu1 %v5145_v55  ;;  %v1884_v10 = vpop.f32.mrf.mxu0  ;;  %v5097_v53 = vcombine.high %v168_v46, %v172_v47  ;;  %v164_v55 = vld [vmem:[%s7479_s2 + $0x3e0] sm:$0xff]  ;;  %v4968_v61 = vcombine.low %v40_v44, %v44_v45  ;;  %v5217_v0 = vcombine.high %v288_v56, %v292_v57  ;;  %v5176_v47 = vcombine.low %v248_v36, %v252_v37 }
 0x10b   :  { %v6366_v9 = vadd.f32 %v1923_v6, %v1882_v20  ;;  %3471 = vmatpush1.bf16.msra.mxu0 %v5016_v3  ;;  %v5089_v63 = vcombine.high %v160_v54, %v164_v55  ;;  %v152_v3 = vld [vmem:[%s7479_s2 + $0x380] sm:$0xff]  ;;  %v5088_v6 = vcombine.low %v160_v54, %v164_v55 }
 0x10c   :  { %v1925_v13 = vpop.f32.mrf.mxu1  ;;  %v1885_v15 = vpop.f32.mrf.mxu0  ;;  %3472 = vmatprep.subr.bf16.mxu0 %v5009_v5  ;;  %v156_v20 = vld [vmem:[%s7479_s2 + $0x3a0] sm:$0xff] }
 0x10d   :  { %3512 = vmatpush1.bf16.msra.mxu1 %v5144_v4  ;;  %v280_v4 = vld [vmem:[%s7479_s2 + $0x780] sm:$0xff]  ;;  %v5081_v8 = vcombine.high %v152_v3, %v156_v20 }
 0x10e   :  { %v1926_v18 = vpop.f32.mrf.mxu1  ;;  %3513 = vmatprep.subr.bf16.mxu1 %v5137_v7  ;;  %v284_v5 = vld [vmem:[%s7479_s2 + $0x7a0] sm:$0xff]  ;;  %v5216_v7 = vcombine.low %v288_v56, %v292_v57 }
 0x10f   :  { %3473 = vmatpush1.bf16.msra.mxu0 %v5008_v14  ;;  %v5209_v23 = vcombine.high %v280_v4, %v284_v5  ;;  %v144_v10 = vld [vmem:[%s7479_s2 + $0x340] sm:$0xff]  ;;  %v5080_v14 = vcombine.low %v152_v3, %v156_v20  ;;  %v5208_v15 = vcombine.low %v280_v4, %v284_v5  ;;  %v225_v3 = vld [vmem:[%s7479_s2 + $0x5c8] sm:$0xff] }
 0x110   :  { %3474 = vmatprep.subr.bf16.mxu0 %v5001_v17  ;;  %v276_v13 = vld [vmem:[%s7479_s2 + $0x760] sm:$0xff]  ;;  %v5072_v24 = vcombine.low %v144_v10, %v148_v11  ;;  %v229_v20 = vld [vmem:[%s7479_s2 + $0x5e8] sm:$0xff] }
 0x111   :  { %3514 = vmatpush1.bf16.msra.mxu1 %v5136_v16  ;;  %v5073_v16 = vcombine.high %v144_v10, %v148_v11  ;;  %v5201_v17 = vcombine.high %v272_v12, %v276_v13  ;;  %v136_v18 = vld [vmem:[%s7479_s2 + $0x300] sm:$0xff]  ;;  %v5200_v25 = vcombine.low %v272_v12, %v276_v13  ;;  %v6539_v10 = vcombine.low %v6324_v48, %v6324_v48  ;;  %v217_v11 = vld [vmem:[%s7479_s2 + $0x588] sm:$0xff] }
 0x112   :  { %3515 = vmatprep.subr.bf16.mxu1 %v5129_v19  ;;  %v140_v19 = vld [vmem:[%s7479_s2 + $0x320] sm:$0xff]  ;;  %v221_v12 = vld [vmem:[%s7479_s2 + $0x5a8] sm:$0xff]  ;;  %v6549_v13 = vcombine.low %v6333_v51, %v6333_v51 }
 0x113   :  { %3475 = vmatpush1.bf16.msra.mxu0 %v5000_v26  ;;  %v5065_v26 = vcombine.high %v136_v18, %v140_v19  ;;  %v5064_v30 = vcombine.low %v136_v18, %v140_v19  ;;  %v240_v44 = vld [vmem:[%s7479_s2 + $0x640] sm:$0xff]  ;;  %v5147_v48 = vcombine.high %v217_v11, %v221_v12  ;;  %v85_v18 = vld [vmem:[%s7479_s2 + $0x168] sm:$0xff] }
 0x114   :  { %3476 = vmatprep.subr.bf16.mxu0 %v4993_v27  ;;  %v128_v27 = vld [vmem:[%s7479_s2 + $0x2c0] sm:$0xff]  ;;  %v209_v51 = vld [vmem:[%s7479_s2 + $0x548] sm:$0xff] }
 0x115   :  { %3516 = vmatpush1.bf16.msra.mxu1 %v5128_v59  ;;  %v5193_v59 = vcombine.high %v264_v21, %v268_v22  ;;  %v244_v45 = vld [vmem:[%s7479_s2 + $0x660] sm:$0xff]  ;;  %v213_v21 = vld [vmem:[%s7479_s2 + $0x568] sm:$0xff] }
 0x116   :  { %3517 = vmatprep.subr.bf16.mxu1 %v5121_v28  ;;  %v132_v28 = vld [vmem:[%s7479_s2 + $0x2e0] sm:$0xff]  ;;  %v5168_v57 = vcombine.low %v240_v44, %v244_v45 }
 0x117   :  { %3477 = vmatpush1.bf16.msra.mxu0 %v4992_v32  ;;  %v5057_v32 = vcombine.high %v128_v27, %v132_v28  ;;  %v5056_v38 = vcombine.low %v128_v27, %v132_v28  ;;  %v232_v54 = vld [vmem:[%s7479_s2 + $0x600] sm:$0xff] }
 0x118   :  { %3478 = vmatprep.subr.bf16.mxu0 %v4985_v34  ;;  %v120_v34 = vld [vmem:[%s7479_s2 + $0x280] sm:$0xff] }
 0x119   :  { %3518 = vmatpush1.bf16.msra.mxu1 %v5120_v33  ;;  %v5185_v33 = vcombine.high %v256_v60, %v260_v29  ;;  %v236_v55 = vld [vmem:[%s7479_s2 + $0x620] sm:$0xff]  ;;  %v5139_v60 = vcombine.high %v209_v51, %v213_v21  ;;  %v73_v29 = vld [vmem:[%s7479_s2 + $0x108] sm:$0xff] }
 0x11a   :  { %3519 = vmatprep.subr.bf16.mxu1 %v5113_v35  ;;  %v124_v35 = vld [vmem:[%s7479_s2 + $0x2a0] sm:$0xff]  ;;  %v5160_v5 = vcombine.low %v232_v54, %v236_v55 }
 0x11b   :  { %3479 = vmatpush1.bf16.msra.mxu0 %v4984_v40  ;;  %v5049_v40 = vcombine.high %v120_v34, %v124_v35  ;;  %v5048_v46 = vcombine.low %v120_v34, %v124_v35  ;;  %v205_v34 = vld [vmem:[%s7479_s2 + $0x528] sm:$0xff] }
 0x11c   :  { %3480 = vmatprep.subr.bf16.mxu0 %v4977_v42  ;;  %v112_v42 = vld [vmem:[%s7479_s2 + $0x240] sm:$0xff] }
 0x11d   :  { %3520 = vmatpush1.bf16.msra.mxu1 %v5112_v41  ;;  %v5177_v41 = vcombine.high %v248_v36, %v252_v37 }
 0x11e   :  { %3521 = vmatprep.subr.bf16.mxu1 %v5105_v43  ;;  %v116_v43 = vld [vmem:[%s7479_s2 + $0x260] sm:$0xff] }
 0x11f   :  { %3481 = vmatpush1.bf16.msra.mxu0 %v4976_v49  ;;  %v5041_v49 = vcombine.high %v112_v42, %v116_v43  ;;  %v5040_v56 = vcombine.low %v112_v42, %v116_v43  ;;  %v65_v42 = vld [vmem:[%s7479_s2 + $0xc8] sm:$0xff] }
 0x120   :  { %3482 = vmatprep.subr.bf16.mxu0 %v4969_v52  ;;  %v104_v52 = vld [vmem:[%s7479_s2 + $0x200] sm:$0xff]  ;;  %v69_v43 = vld [vmem:[%s7479_s2 + $0xe8] sm:$0xff] }
 0x121   :  { %3522 = vmatpush1.bf16.msra.mxu1 %v5104_v50  ;;  %v5169_v50 = vcombine.high %v240_v44, %v244_v45  ;;  %v193_v44 = vld [vmem:[%s7479_s2 + $0x4c8] sm:$0xff] }
 0x122   :  { %3523 = vmatprep.subr.bf16.mxu1 %v5097_v53  ;;  %v108_v53 = vld [vmem:[%s7479_s2 + $0x220] sm:$0xff]  ;;  %v197_v45 = vld [vmem:[%s7479_s2 + $0x4e8] sm:$0xff] }
 0x123   :  { %3483 = vmatpush1.bf16.msra.mxu0 %v4968_v61  ;;  %v5033_v61 = vcombine.high %v104_v52, %v108_v53  ;;  %v5032_v4 = vcombine.low %v104_v52, %v108_v53  ;;  %v57_v52 = vld [vmem:[%s7479_s2 + $0x88] sm:$0xff] }
 0x124   :  { %3484 = vmatprep.subr.bf16.mxu0 %v5089_v63  ;;  %v97_v63 = vld [vmem:[%s7479_s2 + $0x1c8] sm:$0xff] }
 0x125   :  { %3524 = vmatpush1.bf16.msra.mxu1 %v5096_v62  ;;  %v5161_v62 = vcombine.high %v232_v54, %v236_v55  ;;  %v61_v53 = vld [vmem:[%s7479_s2 + $0xa8] sm:$0xff] }
 0x126   :  { %3525 = vmatprep.subr.bf16.mxu1 %v5217_v0  ;;  %v101_v0 = vld [vmem:[%s7479_s2 + $0x1e8] sm:$0xff] }
 0x127   :  { %3485 = vmatpush2.bf16.msra.mxu0 %v5088_v6  ;;  %v5027_v6 = vcombine.high %v97_v63, %v101_v0  ;;  %v185_v54 = vld [vmem:[%s7479_s2 + $0x488] sm:$0xff] }
 0x128   :  { %3486 = vmatprep.subr.bf16.mxu0 %v5081_v8  ;;  %v89_v8 = vld [vmem:[%s7479_s2 + $0x188] sm:$0xff] }
 0x129   :  { %3526 = vmatpush2.bf16.msra.mxu1 %v5216_v7  ;;  %v5155_v7 = vcombine.high %v225_v3, %v229_v20  ;;  %v189_v55 = vld [vmem:[%s7479_s2 + $0x4a8] sm:$0xff] }
 0x12a   :  { %3527 = vmatprep.subr.bf16.mxu1 %v5209_v23  ;;  %v93_v23 = vld [vmem:[%s7479_s2 + $0x1a8] sm:$0xff] }
 0x12b   :  { %3487 = vmatpush2.bf16.msra.mxu0 %v5080_v14  ;;  %v5026_v14 = vcombine.low %v97_v63, %v101_v0  ;;  %v49_v63 = vld [vmem:[%s7479_s2 + $0x48] sm:$0xff] }
 0x12c   :  { %3488 = vmatprep.subr.bf16.mxu0 %v5073_v16  ;;  %v5019_v16 = vcombine.high %v89_v8, %v93_v23  ;;  %v53_v0 = vld [vmem:[%s7479_s2 + $0x68] sm:$0xff] }
 0x12d   :  { %3528 = vmatpush2.bf16.msra.mxu1 %v5208_v15  ;;  %v5154_v15 = vcombine.low %v225_v3, %v229_v20  ;;  %v177_v3 = vld [vmem:[%s7479_s2 + $0x448] sm:$0xff] }
 0x12e   :  { %3529 = vmatprep.subr.bf16.mxu1 %v5201_v17  ;;  %v81_v17 = vld [vmem:[%s7479_s2 + $0x148] sm:$0xff] }
 0x12f   :  { %3489 = vmatpush2.bf16.msra.mxu0 %v5072_v24  ;;  %v5018_v24 = vcombine.low %v89_v8, %v93_v23  ;;  %v5011_v27 = vcombine.high %v81_v17, %v85_v18  ;;  %v5010_v36 = vcombine.low %v81_v17, %v85_v18  ;;  %v181_v20 = vld [vmem:[%s7479_s2 + $0x468] sm:$0xff] }
 0x130   :  { %3490 = vmatprep.subr.bf16.mxu0 %v5065_v26  ;;  %v41_v8 = vld [vmem:[%s7479_s2 + $0x8] sm:$0xff] }
 0x131   :  { %3530 = vmatpush2.bf16.msra.mxu1 %v5200_v25  ;;  %v45_v23 = vld [vmem:[%s7479_s2 + $0x28] sm:$0xff] }
 0x132   :  { %3531 = vmatprep.subr.bf16.mxu1 %v5193_v59  ;;  %v5146_v59 = vcombine.low %v217_v11, %v221_v12  ;;  %v169_v11 = vld [vmem:[%s7479_s2 + $0x408] sm:$0xff] }
 0x133   :  { %3491 = vmatpush2.bf16.msra.mxu0 %v5064_v30  ;;  %v77_v30 = vld [vmem:[%s7479_s2 + $0x128] sm:$0xff] }
 0x134   :  { %3492 = vmatprep.subr.bf16.mxu0 %v5057_v32  ;;  %v173_v12 = vld [vmem:[%s7479_s2 + $0x428] sm:$0xff] }
 0x135   :  { %3532 = vmatpush2.bf16.msra.mxu1 %v5192_v31  ;;  %v161_v17 = vld [vmem:[%s7479_s2 + $0x3c8] sm:$0xff] }
 0x136   :  { %3533 = vmatprep.subr.bf16.mxu1 %v5185_v33  ;;  %v201_v33 = vld [vmem:[%s7479_s2 + $0x508] sm:$0xff] }
 0x137   :  { %3493 = vmatpush2.bf16.msra.mxu0 %v5056_v38  ;;  %v5138_v38 = vcombine.low %v209_v51, %v213_v21  ;;  %v165_v18 = vld [vmem:[%s7479_s2 + $0x3e8] sm:$0xff]  ;;  %v4970_v21 = vcombine.low %v41_v8, %v45_v23 }
 0x138   :  { %3494 = vmatprep.subr.bf16.mxu0 %v5049_v40  ;;  %v293_v51 = vld [vmem:[%s7479_s2 + $0x7e8] sm:$0xff] }
 0x139   :  { %3534 = vmatpush2.bf16.msra.mxu1 %v5184_v39  ;;  %v5003_v39 = vcombine.high %v73_v29, %v77_v30 }
 0x13a   :  { %3535 = vmatprep.subr.bf16.mxu1 %v5177_v41  ;;  %v5131_v41 = vcombine.high %v201_v33, %v205_v34 }
 0x13b   :  { %3495 = vmatpush2.bf16.msra.mxu0 %v5048_v46  ;;  %v5002_v46 = vcombine.low %v73_v29, %v77_v30  ;;  %v5090_v29 = vcombine.low %v161_v17, %v165_v18 }
 0x13c   :  { %3496 = vmatprep.subr.bf16.mxu0 %v5041_v49  ;;  %v4995_v49 = vcombine.high %v65_v42, %v69_v43 }
 0x13d   :  { %3536 = vmatpush2.bf16.msra.mxu1 %v5176_v47  ;;  %v5130_v47 = vcombine.low %v201_v33, %v205_v34  ;;  %v145_v34 = vld [vmem:[%s7479_s2 + $0x348] sm:$0xff] }
 0x13e   :  { %3537 = vmatprep.subr.bf16.mxu1 %v5169_v50  ;;  %v5123_v50 = vcombine.high %v193_v44, %v197_v45 }
 0x13f   :  { %3497 = vmatpush2.bf16.msra.mxu0 %v5040_v56  ;;  %v4994_v56 = vcombine.low %v65_v42, %v69_v43  ;;  %v137_v42 = vld [vmem:[%s7479_s2 + $0x308] sm:$0xff] }
 0x140   :  { %3498 = vmatprep.subr.bf16.mxu0 %v5033_v61  ;;  %v4987_v61 = vcombine.high %v57_v52, %v61_v53  ;;  %v141_v43 = vld [vmem:[%s7479_s2 + $0x328] sm:$0xff] }
 0x141   :  { %3538 = vmatpush2.bf16.msra.mxu1 %v5168_v57  ;;  %v5122_v57 = vcombine.low %v193_v44, %v197_v45  ;;  %v265_v44 = vld [vmem:[%s7479_s2 + $0x708] sm:$0xff] }
 0x142   :  { %3539 = vmatprep.subr.bf16.mxu1 %v5161_v62  ;;  %v5115_v62 = vcombine.high %v185_v54, %v189_v55  ;;  %v269_v45 = vld [vmem:[%s7479_s2 + $0x728] sm:$0xff] }
 0x143   :  { %3499 = vmatpush2.bf16.msra.mxu0 %v5032_v4  ;;  %v4986_v4 = vcombine.low %v57_v52, %v61_v53  ;;  %v129_v52 = vld [vmem:[%s7479_s2 + $0x2c8] sm:$0xff] }
 0x144   :  { %3550 = vmatprep.subr.bf16.mxu0 %v5027_v6  ;;  %v4979_v6 = vcombine.high %v49_v63, %v53_v0  ;;  %v133_v53 = vld [vmem:[%s7479_s2 + $0x2e8] sm:$0xff] }
 0x145   :  { %3540 = vmatpush2.bf16.msra.mxu1 %v5160_v5  ;;  %v5114_v5 = vcombine.low %v185_v54, %v189_v55  ;;  %v257_v54 = vld [vmem:[%s7479_s2 + $0x6c8] sm:$0xff] }
 0x146   :  { %3591 = vmatprep.subr.bf16.mxu1 %v5155_v7  ;;  %v1962_v19 = vpop.f32.mrf.mxu0  ;;  %3501 = vmatmul.mubr.bf16.vlgmr.msra.gmra.mxu0 %v6539_v10  ;;  %v5107_v7 = vcombine.high %v177_v3, %v181_v20  ;;  %v261_v55 = vld [vmem:[%s7479_s2 + $0x6e8] sm:$0xff] }
 0x147   :  { %3551 = vmatpush1.bf16.msra.mxu0 %v5026_v14  ;;  %3582 = vmatprep.mubr.bf16.mxu0 %v6343_v58  ;;  %v4978_v14 = vcombine.low %v49_v63, %v53_v0  ;;  %v121_v63 = vld [vmem:[%s7479_s2 + $0x288] sm:$0xff] }
 0x148   :  { %v2003_v22 = vpop.f32.mrf.mxu1  ;;  %3542 = vmatmul.mubr.bf16.vlgmr.msra.gmra.mxu1 %v6549_v13  ;;  %v1964_v26 = vpop.f32.mrf.mxu0  ;;  %3552 = vmatprep.subr.bf16.mxu0 %v5019_v16  ;;  %v4971_v16 = vcombine.high %v41_v8, %v45_v23  ;;  %v125_v0 = vld [vmem:[%s7479_s2 + $0x2a8] sm:$0xff] }
 0x149   :  { %v6565_v25 = vadd.f32 %v2003_v22, %v1962_v19  ;;  %3592 = vmatpush1.bf16.msra.mxu1 %v5154_v15  ;;  %3623 = vmatprep.mubr.bf16.mxu1 %v6354_v2  ;;  %v5106_v15 = vcombine.low %v177_v3, %v181_v20  ;;  %v289_v19 = vld [vmem:[%s7479_s2 + $0x7c8] sm:$0xff]  ;;  %v5098_v22 = vcombine.low %v169_v11, %v173_v12 }
 0x14a   :  { %v2005_v28 = vpop.f32.mrf.mxu1  ;;  %3593 = vmatprep.subr.bf16.mxu1 %v5147_v48  ;;  %v1966_v32 = vpop.f32.mrf.mxu0  ;;  %v5099_v48 = vcombine.high %v169_v11, %v173_v12  ;;  %v5218_v30 = vcombine.low %v289_v19, %v293_v51  ;;  %v249_v3 = vld [vmem:[%s7479_s2 + $0x688] sm:$0xff] }
 0x14b   :  { %v6574_v31 = vadd.f32 %v2005_v28, %v1964_v26  ;;  %3553 = vmatpush1.bf16.msra.mxu0 %v5018_v24  ;;  %v5091_v24 = vcombine.high %v161_v17, %v165_v18  ;;  %v5219_v26 = vcombine.high %v289_v19, %v293_v51  ;;  %v281_v28 = vld [vmem:[%s7479_s2 + $0x788] sm:$0xff] }
 0x14c   :  { %v2007_v35 = vpop.f32.mrf.mxu1  ;;  %v1967_v37 = vpop.f32.mrf.mxu0  ;;  %3554 = vmatprep.subr.bf16.mxu0 %v5011_v27  ;;  %v157_v27 = vld [vmem:[%s7479_s2 + $0x3a8] sm:$0xff] }
 0x14d   :  { %3594 = vmatpush1.bf16.msra.mxu1 %v5146_v59  ;;  %v153_v59 = vld [vmem:[%s7479_s2 + $0x388] sm:$0xff] }
 0x14e   :  { %v2008_v40 = vpop.f32.mrf.mxu1  ;;  %3595 = vmatprep.subr.bf16.mxu1 %v5139_v60  ;;  %v285_v60 = vld [vmem:[%s7479_s2 + $0x7a8] sm:$0xff]  ;;  %v5083_v32 = vcombine.high %v153_v59, %v157_v27 }
 0x14f   :  { %3555 = vmatpush1.bf16.msra.mxu0 %v5010_v36  ;;  %v5211_v33 = vcombine.high %v281_v28, %v285_v60  ;;  %v149_v35 = vld [vmem:[%s7479_s2 + $0x368] sm:$0xff] }
 0x150   :  { %3556 = vmatprep.subr.bf16.mxu0 %v5003_v39  ;;  %v273_v36 = vld [vmem:[%s7479_s2 + $0x748] sm:$0xff]  ;;  %v5210_v39 = vcombine.low %v281_v28, %v285_v60  ;;  %v5075_v40 = vcombine.high %v145_v34, %v149_v35  ;;  %v226_v28 = vld [vmem:[%s7479_s2 + $0x5d0] sm:$0xff] }
 0x151   :  { %3596 = vmatpush1.bf16.msra.mxu1 %v5138_v38  ;;  %v277_v37 = vld [vmem:[%s7479_s2 + $0x768] sm:$0xff]  ;;  %v5082_v38 = vcombine.low %v153_v59, %v157_v27  ;;  %v98_v59 = vld [vmem:[%s7479_s2 + $0x1d0] sm:$0xff] }
 0x152   :  { %3597 = vmatprep.subr.bf16.mxu1 %v5131_v41  ;;  %v5203_v41 = vcombine.high %v273_v36, %v277_v37  ;;  %v253_v20 = vld [vmem:[%s7479_s2 + $0x6a8] sm:$0xff]  ;;  %v102_v27 = vld [vmem:[%s7479_s2 + $0x1f0] sm:$0xff] }
 0x153   :  { %3557 = vmatpush1.bf16.msra.mxu0 %v5002_v46  ;;  %v5074_v46 = vcombine.low %v145_v34, %v149_v35  ;;  %v113_v8 = vld [vmem:[%s7479_s2 + $0x248] sm:$0xff]  ;;  %v230_v60 = vld [vmem:[%s7479_s2 + $0x5f0] sm:$0xff] }
 0x154   :  { %3558 = vmatprep.subr.bf16.mxu0 %v4995_v49  ;;  %v5067_v49 = vcombine.high %v137_v42, %v141_v43  ;;  %v117_v23 = vld [vmem:[%s7479_s2 + $0x268] sm:$0xff]  ;;  %v90_v34 = vld [vmem:[%s7479_s2 + $0x190] sm:$0xff] }
 0x155   :  { %3598 = vmatpush1.bf16.msra.mxu1 %v5130_v47  ;;  %v5202_v47 = vcombine.low %v273_v36, %v277_v37  ;;  %v241_v11 = vld [vmem:[%s7479_s2 + $0x648] sm:$0xff]  ;;  %v94_v35 = vld [vmem:[%s7479_s2 + $0x1b0] sm:$0xff] }
 0x156   :  { %3599 = vmatprep.subr.bf16.mxu1 %v5123_v50  ;;  %v5195_v50 = vcombine.high %v265_v44, %v269_v45  ;;  %v245_v12 = vld [vmem:[%s7479_s2 + $0x668] sm:$0xff]  ;;  %v218_v36 = vld [vmem:[%s7479_s2 + $0x590] sm:$0xff] }
 0x157   :  { %3559 = vmatpush1.bf16.msra.mxu0 %v4994_v56  ;;  %v5066_v56 = vcombine.low %v137_v42, %v141_v43  ;;  %v105_v17 = vld [vmem:[%s7479_s2 + $0x208] sm:$0xff]  ;;  %v222_v37 = vld [vmem:[%s7479_s2 + $0x5b0] sm:$0xff] }
 0x158   :  { %3560 = vmatprep.subr.bf16.mxu0 %v4987_v61  ;;  %v5059_v61 = vcombine.high %v129_v52, %v133_v53  ;;  %v109_v18 = vld [vmem:[%s7479_s2 + $0x228] sm:$0xff]  ;;  %v82_v42 = vld [vmem:[%s7479_s2 + $0x150] sm:$0xff] }
 0x159   :  { %3600 = vmatpush1.bf16.msra.mxu1 %v5122_v57  ;;  %v5194_v57 = vcombine.low %v265_v44, %v269_v45  ;;  %v233_v19 = vld [vmem:[%s7479_s2 + $0x608] sm:$0xff]  ;;  %v86_v43 = vld [vmem:[%s7479_s2 + $0x170] sm:$0xff] }
 0x15a   :  { %3601 = vmatprep.subr.bf16.mxu1 %v5115_v62  ;;  %v5187_v62 = vcombine.high %v257_v54, %v261_v55  ;;  %v237_v51 = vld [vmem:[%s7479_s2 + $0x628] sm:$0xff]  ;;  %v210_v45 = vld [vmem:[%s7479_s2 + $0x550] sm:$0xff] }
 0x15b   :  { %3561 = vmatpush1.bf16.msra.mxu0 %v4986_v4  ;;  %v5058_v4 = vcombine.low %v129_v52, %v133_v53  ;;  %v5148_v53 = vcombine.low %v218_v36, %v222_v37 }
 0x15c   :  { %3562 = vmatprep.subr.bf16.mxu0 %v4979_v6  ;;  %v5051_v6 = vcombine.high %v121_v63, %v125_v0 }
 0x15d   :  { %3602 = vmatpush1.bf16.msra.mxu1 %v5114_v5  ;;  %v5186_v5 = vcombine.low %v257_v54, %v261_v55  ;;  %v5013_v54 = vcombine.high %v82_v42, %v86_v43 }
 0x15e   :  { %3603 = vmatprep.subr.bf16.mxu1 %v5107_v7  ;;  %v5179_v7 = vcombine.high %v249_v3, %v253_v20 }
 0x15f   :  { %3563 = vmatpush1.bf16.msra.mxu0 %v4978_v14  ;;  %v5050_v14 = vcombine.low %v121_v63, %v125_v0  ;;  %v202_v0 = vld [vmem:[%s7479_s2 + $0x510] sm:$0xff] }
 0x160   :  { %3564 = vmatprep.subr.bf16.mxu0 %v4971_v16  ;;  %v5043_v16 = vcombine.high %v113_v8, %v117_v23 }
 0x161   :  { %3604 = vmatpush1.bf16.msra.mxu1 %v5106_v15  ;;  %v5178_v15 = vcombine.low %v249_v3, %v253_v20  ;;  %v206_v3 = vld [vmem:[%s7479_s2 + $0x530] sm:$0xff] }
 0x162   :  { %3605 = vmatprep.subr.bf16.mxu1 %v5099_v48  ;;  %v5171_v48 = vcombine.high %v241_v11, %v245_v12 }
 0x163   :  { %3565 = vmatpush1.bf16.msra.mxu0 %v4970_v21  ;;  %v5042_v21 = vcombine.low %v113_v8, %v117_v23  ;;  %v5133_v23 = vcombine.high %v202_v0, %v206_v3 }
 0x164   :  { %3566 = vmatprep.subr.bf16.mxu0 %v5091_v24  ;;  %v5035_v24 = vcombine.high %v105_v17, %v109_v18 }
 0x165   :  { %3606 = vmatpush1.bf16.msra.mxu1 %v5098_v22  ;;  %v5170_v22 = vcombine.low %v241_v11, %v245_v12  ;;  %v66_v11 = vld [vmem:[%s7479_s2 + $0xd0] sm:$0xff] }
 0x166   :  { %3607 = vmatprep.subr.bf16.mxu1 %v5219_v26  ;;  %v5163_v26 = vcombine.high %v233_v19, %v237_v51  ;;  %v70_v12 = vld [vmem:[%s7479_s2 + $0xf0] sm:$0xff] }
 0x167   :  { %3567 = vmatpush2.bf16.msra.mxu0 %v5090_v29  ;;  %v5034_v29 = vcombine.low %v105_v17, %v109_v18  ;;  %v4997_v17 = vcombine.high %v66_v11, %v70_v12 }
 0x168   :  { %3568 = vmatprep.subr.bf16.mxu0 %v5083_v32  ;;  %v5029_v32 = vcombine.high %v98_v59, %v102_v27 }
 0x169   :  { %3608 = vmatpush2.bf16.msra.mxu1 %v5218_v30  ;;  %v5162_v30 = vcombine.low %v233_v19, %v237_v51  ;;  %v58_v19 = vld [vmem:[%s7479_s2 + $0x90] sm:$0xff] }
 0x16a   :  { %3609 = vmatprep.subr.bf16.mxu1 %v5211_v33  ;;  %v5157_v33 = vcombine.high %v226_v28, %v230_v60  ;;  %v62_v51 = vld [vmem:[%s7479_s2 + $0xb0] sm:$0xff] }
 0x16b   :  { %3569 = vmatpush2.bf16.msra.mxu0 %v5082_v38  ;;  %v5028_v38 = vcombine.low %v98_v59, %v102_v27  ;;  %v4989_v59 = vcombine.high %v58_v19, %v62_v51 }
 0x16c   :  { %3570 = vmatprep.subr.bf16.mxu0 %v5075_v40  ;;  %v5021_v40 = vcombine.high %v90_v34, %v94_v35 }
 0x16d   :  { %3610 = vmatpush2.bf16.msra.mxu1 %v5210_v39  ;;  %v5156_v39 = vcombine.low %v226_v28, %v230_v60  ;;  %v50_v28 = vld [vmem:[%s7479_s2 + $0x50] sm:$0xff] }
 0x16e   :  { %3611 = vmatprep.subr.bf16.mxu1 %v5203_v41  ;;  %v5149_v41 = vcombine.high %v218_v36, %v222_v37  ;;  %v54_v60 = vld [vmem:[%s7479_s2 + $0x70] sm:$0xff] }
 0x16f   :  { %3571 = vmatpush2.bf16.msra.mxu0 %v5074_v46  ;;  %v214_v46 = vld [vmem:[%s7479_s2 + $0x570] sm:$0xff] }
 0x170   :  { %3572 = vmatprep.subr.bf16.mxu0 %v5067_v49  ;;  %v5020_v49 = vcombine.low %v90_v34, %v94_v35  ;;  %v4981_v34 = vcombine.high %v50_v28, %v54_v60  ;;  %v42_v36 = vld [vmem:[%s7479_s2 + $0x10] sm:$0xff] }
 0x171   :  { %3612 = vmatpush2.bf16.msra.mxu1 %v5202_v47  ;;  %v46_v37 = vld [vmem:[%s7479_s2 + $0x30] sm:$0xff] }
 0x172   :  { %3613 = vmatprep.subr.bf16.mxu1 %v5195_v50 }
 0x173   :  { %3573 = vmatpush2.bf16.msra.mxu0 %v5066_v56  ;;  %v5141_v56 = vcombine.high %v210_v45, %v214_v46 }
 0x174   :  { %3574 = vmatprep.subr.bf16.mxu0 %v5059_v61  ;;  %v78_v61 = vld [vmem:[%s7479_s2 + $0x130] sm:$0xff] }
 0x175   :  { %3614 = vmatpush2.bf16.msra.mxu1 %v5194_v57  ;;  %v74_v57 = vld [vmem:[%s7479_s2 + $0x110] sm:$0xff] }
 0x176   :  { %3615 = vmatprep.subr.bf16.mxu1 %v5187_v62 }
 0x177   :  { %3575 = vmatpush2.bf16.msra.mxu0 %v5058_v4  ;;  %v5012_v4 = vcombine.low %v82_v42, %v86_v43  ;;  %v4973_v42 = vcombine.high %v42_v36, %v46_v37 }
 0x178   :  { %3576 = vmatprep.subr.bf16.mxu0 %v5051_v6  ;;  %v5140_v6 = vcombine.low %v210_v45, %v214_v46  ;;  %v166_v45 = vld [vmem:[%s7479_s2 + $0x3f0] sm:$0xff] }
 0x179   :  { %3616 = vmatpush2.bf16.msra.mxu1 %v5186_v5  ;;  %v290_v46 = vld [vmem:[%s7479_s2 + $0x7d0] sm:$0xff] }
 0x17a   :  { %3617 = vmatprep.subr.bf16.mxu1 %v5179_v7  ;;  %v5005_v7 = vcombine.high %v74_v57, %v78_v61 }
 0x17b   :  { %3577 = vmatpush2.bf16.msra.mxu0 %v5050_v14  ;;  %v194_v14 = vld [vmem:[%s7479_s2 + $0x4d0] sm:$0xff] }
 0x17c   :  { %3578 = vmatprep.subr.bf16.mxu0 %v5043_v16  ;;  %v5004_v16 = vcombine.low %v74_v57, %v78_v61  ;;  %v282_v57 = vld [vmem:[%s7479_s2 + $0x790] sm:$0xff] }
 0x17d   :  { %3618 = vmatpush2.bf16.msra.mxu1 %v5178_v15  ;;  %v198_v15 = vld [vmem:[%s7479_s2 + $0x4f0] sm:$0xff] }
 0x17e   :  { %3619 = vmatprep.subr.bf16.mxu1 %v5171_v48  ;;  %v5132_v48 = vcombine.low %v202_v0, %v206_v3  ;;  %v5125_v18 = vcombine.high %v194_v14, %v198_v15  ;;  %v286_v61 = vld [vmem:[%s7479_s2 + $0x7b0] sm:$0xff] }
 0x17f   :  { %3579 = vmatpush2.bf16.msra.mxu0 %v5042_v21  ;;  %v186_v21 = vld [vmem:[%s7479_s2 + $0x490] sm:$0xff] }
 0x180   :  { %3580 = vmatprep.subr.bf16.mxu0 %v5035_v24  ;;  %v4996_v24 = vcombine.low %v66_v11, %v70_v12 }
 0x181   :  { %3620 = vmatpush2.bf16.msra.mxu1 %v5170_v22  ;;  %v190_v22 = vld [vmem:[%s7479_s2 + $0x4b0] sm:$0xff] }
 0x182   :  { %3621 = vmatprep.subr.bf16.mxu1 %v5163_v26  ;;  %v5124_v26 = vcombine.low %v194_v14, %v198_v15  ;;  %v5117_v27 = vcombine.high %v186_v21, %v190_v22  ;;  %v138_v14 = vld [vmem:[%s7479_s2 + $0x310] sm:$0xff] }
 0x183   :  { %3581 = vmatpush2.bf16.msra.mxu0 %v5034_v29  ;;  %v178_v29 = vld [vmem:[%s7479_s2 + $0x450] sm:$0xff] }
 0x184   :  { %3632 = vmatprep.subr.bf16.mxu0 %v5029_v32  ;;  %v4988_v32 = vcombine.low %v58_v19, %v62_v51  ;;  %v142_v15 = vld [vmem:[%s7479_s2 + $0x330] sm:$0xff] }
 0x185   :  { %3622 = vmatpush2.bf16.msra.mxu1 %v5162_v30  ;;  %v182_v30 = vld [vmem:[%s7479_s2 + $0x470] sm:$0xff]  ;;  %v5069_v19 = vcombine.high %v138_v14, %v142_v15 }
 0x186   :  { %3673 = vmatprep.subr.bf16.mxu1 %v5157_v33  ;;  %v2044_v44 = vpop.f32.mrf.mxu0  ;;  %3583 = vmatmul.mubr.bf16.vlgmr.msra.gmra.mxu0 %v6539_v10  ;;  %v5116_v33 = vcombine.low %v186_v21, %v190_v22  ;;  %v5109_v35 = vcombine.high %v178_v29, %v182_v30  ;;  %v130_v21 = vld [vmem:[%s7479_s2 + $0x2d0] sm:$0xff] }
 0x187   :  { %3633 = vmatpush1.bf16.msra.mxu0 %v5028_v38  ;;  %3664 = vmatprep.mubr.bf16.mxu0 %v6343_v58  ;;  %v170_v38 = vld [vmem:[%s7479_s2 + $0x410] sm:$0xff] }
 0x188   :  { %v2085_v47 = vpop.f32.mrf.mxu1  ;;  %3624 = vmatmul.mubr.bf16.vlgmr.msra.gmra.mxu1 %v6549_v13  ;;  %v2046_v52 = vpop.f32.mrf.mxu0  ;;  %3634 = vmatprep.subr.bf16.mxu0 %v5021_v40  ;;  %v4980_v40 = vcombine.low %v50_v28, %v54_v60  ;;  %v134_v22 = vld [vmem:[%s7479_s2 + $0x2f0] sm:$0xff] }
 0x189   :  { %v6765_v50 = vadd.f32 %v2085_v47, %v2044_v44  ;;  %3674 = vmatpush1.bf16.msra.mxu1 %v5156_v39  ;;  %3705 = vmatprep.mubr.bf16.mxu1 %v6354_v2  ;;  %v174_v39 = vld [vmem:[%s7479_s2 + $0x430] sm:$0xff]  ;;  %v5061_v28 = vcombine.high %v130_v21, %v134_v22 }
 0x18a   :  { %v2087_v55 = vpop.f32.mrf.mxu1  ;;  %3675 = vmatprep.subr.bf16.mxu1 %v5149_v41  ;;  %v2048_v63 = vpop.f32.mrf.mxu0  ;;  %v5108_v41 = vcombine.low %v178_v29, %v182_v30  ;;  %v5101_v43 = vcombine.high %v170_v38, %v174_v39  ;;  %v162_v44 = vld [vmem:[%s7479_s2 + $0x3d0] sm:$0xff] }
 0x18b   :  { %v6774_v62 = vadd.f32 %v2087_v55, %v2046_v52  ;;  %3635 = vmatpush1.bf16.msra.mxu0 %v5020_v49  ;;  %v294_v47 = vld [vmem:[%s7479_s2 + $0x7f0] sm:$0xff]  ;;  %v4972_v49 = vcombine.low %v42_v36, %v46_v37  ;;  %v5100_v52 = vcombine.low %v170_v38, %v174_v39  ;;  %v5092_v63 = vcombine.low %v162_v44, %v166_v45 }
 0x18c   :  { %v2089_v20 = vpop.f32.mrf.mxu1  ;;  %v2049_v5 = vpop.f32.mrf.mxu0  ;;  %3636 = vmatprep.subr.bf16.mxu0 %v5013_v54  ;;  %v5221_v54 = vcombine.high %v290_v46, %v294_v47  ;;  %v154_v55 = vld [vmem:[%s7479_s2 + $0x390] sm:$0xff]  ;;  %v5220_v0 = vcombine.low %v290_v46, %v294_v47 }
 0x18d   :  { %3676 = vmatpush1.bf16.msra.mxu1 %v5148_v53  ;;  %v5093_v53 = vcombine.high %v162_v44, %v166_v45  ;;  %v5213_v20 = vcombine.high %v282_v57, %v286_v61  ;;  %v150_v5 = vld [vmem:[%s7479_s2 + $0x370] sm:$0xff] }
 0x18e   :  { %v2090_v8 = vpop.f32.mrf.mxu1  ;;  %3677 = vmatprep.subr.bf16.mxu1 %v5141_v56  ;;  %v158_v56 = vld [vmem:[%s7479_s2 + $0x3b0] sm:$0xff] }
 0x18f   :  { %3637 = vmatpush1.bf16.msra.mxu0 %v5012_v4  ;;  %v5085_v3 = vcombine.high %v154_v55, %v158_v56  ;;  %v146_v4 = vld [vmem:[%s7479_s2 + $0x350] sm:$0xff]  ;;  %v5084_v8 = vcombine.low %v154_v55, %v158_v56 }
 0x190   :  { %3638 = vmatprep.subr.bf16.mxu0 %v5005_v7  ;;  %v278_v7 = vld [vmem:[%s7479_s2 + $0x770] sm:$0xff]  ;;  %v5077_v11 = vcombine.high %v146_v4, %v150_v5 }
 0x191   :  { %3678 = vmatpush1.bf16.msra.mxu1 %v5140_v6  ;;  %v274_v6 = vld [vmem:[%s7479_s2 + $0x750] sm:$0xff] }
 0x192   :  { %3679 = vmatprep.subr.bf16.mxu1 %v5133_v23  ;;  %v5212_v23 = vcombine.low %v282_v57, %v286_v61  ;;  %v5205_v12 = vcombine.high %v274_v6, %v278_v7  ;;  %v122_v29 = vld [vmem:[%s7479_s2 + $0x290] sm:$0xff]  ;;  %v99_v57 = vld [vmem:[%s7479_s2 + $0x1d8] sm:$0xff] }
 0x193   :  { %3639 = vmatpush1.bf16.msra.mxu0 %v5004_v16  ;;  %v266_v16 = vld [vmem:[%s7479_s2 + $0x710] sm:$0xff]  ;;  %v103_v61 = vld [vmem:[%s7479_s2 + $0x1f8] sm:$0xff] }
 0x194   :  { %3640 = vmatprep.subr.bf16.mxu0 %v4997_v17  ;;  %v5076_v17 = vcombine.low %v146_v4, %v150_v5  ;;  %v126_v30 = vld [vmem:[%s7479_s2 + $0x2b0] sm:$0xff]  ;;  %v5031_v4 = vcombine.high %v99_v57, %v103_v61 }
 0x195   :  { %3680 = vmatpush1.bf16.msra.mxu1 %v5132_v48  ;;  %v270_v48 = vld [vmem:[%s7479_s2 + $0x730] sm:$0xff]  ;;  %v5053_v36 = vcombine.high %v122_v29, %v126_v30 }
 0x196   :  { %3681 = vmatprep.subr.bf16.mxu1 %v5125_v18  ;;  %v5204_v18 = vcombine.low %v274_v6, %v278_v7  ;;  %v5197_v51 = vcombine.high %v266_v16, %v270_v48  ;;  %v114_v38 = vld [vmem:[%s7479_s2 + $0x250] sm:$0xff]  ;;  %v91_v6 = vld [vmem:[%s7479_s2 + $0x198] sm:$0xff] }
 0x197   :  { %3641 = vmatpush1.bf16.msra.mxu0 %v4996_v24  ;;  %v258_v24 = vld [vmem:[%s7479_s2 + $0x6d0] sm:$0xff]  ;;  %v95_v7 = vld [vmem:[%s7479_s2 + $0x1b8] sm:$0xff] }
 0x198   :  { %3642 = vmatprep.subr.bf16.mxu0 %v4989_v59  ;;  %v5068_v59 = vcombine.low %v138_v14, %v142_v15  ;;  %v118_v39 = vld [vmem:[%s7479_s2 + $0x270] sm:$0xff]  ;;  %v5023_v14 = vcombine.high %v91_v6, %v95_v7 }
 0x199   :  { %3682 = vmatpush1.bf16.msra.mxu1 %v5124_v26  ;;  %v262_v26 = vld [vmem:[%s7479_s2 + $0x6f0] sm:$0xff]  ;;  %v5045_v44 = vcombine.high %v114_v38, %v118_v39 }
 0x19a   :  { %3683 = vmatprep.subr.bf16.mxu1 %v5117_v27  ;;  %v5196_v27 = vcombine.low %v266_v16, %v270_v48  ;;  %v5189_v60 = vcombine.high %v258_v24, %v262_v26  ;;  %v106_v46 = vld [vmem:[%s7479_s2 + $0x210] sm:$0xff]  ;;  %v83_v16 = vld [vmem:[%s7479_s2 + $0x158] sm:$0xff] }
 0x19b   :  { %3643 = vmatpush1.bf16.msra.mxu0 %v4988_v32  ;;  %v250_v32 = vld [vmem:[%s7479_s2 + $0x690] sm:$0xff]  ;;  %v87_v48 = vld [vmem:[%s7479_s2 + $0x178] sm:$0xff] }
 0x19c   :  { %3644 = vmatprep.subr.bf16.mxu0 %v4981_v34  ;;  %v5060_v34 = vcombine.low %v130_v21, %v134_v22  ;;  %v110_v47 = vld [vmem:[%s7479_s2 + $0x230] sm:$0xff]  ;;  %v5022_v21 = vcombine.low %v91_v6, %v95_v7 }
 0x19d   :  { %3684 = vmatpush1.bf16.msra.mxu1 %v5116_v33  ;;  %v254_v33 = vld [vmem:[%s7479_s2 + $0x6b0] sm:$0xff]  ;;  %v5037_v55 = vcombine.high %v106_v46, %v110_v47 }
 0x19e   :  { %3685 = vmatprep.subr.bf16.mxu1 %v5109_v35  ;;  %v5188_v35 = vcombine.low %v258_v24, %v262_v26  ;;  %v5181_v37 = vcombine.high %v250_v32, %v254_v33 }
 0x19f   :  { %3645 = vmatpush1.bf16.msra.mxu0 %v4980_v40  ;;  %v242_v40 = vld [vmem:[%s7479_s2 + $0x650] sm:$0xff] }
 0x1a0   :  { %3646 = vmatprep.subr.bf16.mxu0 %v4973_v42  ;;  %v5052_v42 = vcombine.low %v122_v29, %v126_v30  ;;  %v79_v29 = vld [vmem:[%s7479_s2 + $0x138] sm:$0xff] }
 0x1a1   :  { %3686 = vmatpush1.bf16.msra.mxu1 %v5108_v41  ;;  %v246_v41 = vld [vmem:[%s7479_s2 + $0x670] sm:$0xff] }
 0x1a2   :  { %3687 = vmatprep.subr.bf16.mxu1 %v5101_v43  ;;  %v5180_v43 = vcombine.low %v250_v32, %v254_v33  ;;  %v5173_v45 = vcombine.high %v242_v40, %v246_v41  ;;  %v203_v33 = vld [vmem:[%s7479_s2 + $0x518] sm:$0xff] }
 0x1a3   :  { %3647 = vmatpush1.bf16.msra.mxu0 %v4972_v49  ;;  %v234_v49 = vld [vmem:[%s7479_s2 + $0x610] sm:$0xff] }
 0x1a4   :  { %3648 = vmatprep.subr.bf16.mxu0 %v5093_v53  ;;  %v5044_v53 = vcombine.low %v114_v38, %v118_v39 }
 0x1a5   :  { %3688 = vmatpush1.bf16.msra.mxu1 %v5100_v52  ;;  %v238_v52 = vld [vmem:[%s7479_s2 + $0x630] sm:$0xff] }
 0x1a6   :  { %3689 = vmatprep.subr.bf16.mxu1 %v5221_v54  ;;  %v5172_v54 = vcombine.low %v242_v40, %v246_v41  ;;  %v5165_v56 = vcombine.high %v234_v49, %v238_v52  ;;  %v67_v41 = vld [vmem:[%s7479_s2 + $0xd8] sm:$0xff] }
 0x1a7   :  { %3649 = vmatpush2.bf16.msra.mxu0 %v5092_v63  ;;  %v227_v63 = vld [vmem:[%s7479_s2 + $0x5d8] sm:$0xff] }
 0x1a8   :  { %3650 = vmatprep.subr.bf16.mxu0 %v5085_v3  ;;  %v5036_v3 = vcombine.low %v106_v46, %v110_v47 }
 0x1a9   :  { %3690 = vmatpush2.bf16.msra.mxu1 %v5220_v0  ;;  %v231_v0 = vld [vmem:[%s7479_s2 + $0x5f8] sm:$0xff] }
 0x1aa   :  { %3691 = vmatprep.subr.bf16.mxu1 %v5213_v20  ;;  %v5164_v20 = vcombine.low %v234_v49, %v238_v52  ;;  %v5159_v5 = vcombine.high %v227_v63, %v231_v0  ;;  %v59_v49 = vld [vmem:[%s7479_s2 + $0x98] sm:$0xff] }
 0x1ab   :  { %3651 = vmatpush2.bf16.msra.mxu0 %v5084_v8  ;;  %v219_v8 = vld [vmem:[%s7479_s2 + $0x598] sm:$0xff] }
 0x1ac   :  { %3652 = vmatprep.subr.bf16.mxu0 %v5077_v11  ;;  %v5030_v11 = vcombine.low %v99_v57, %v103_v61  ;;  %v63_v52 = vld [vmem:[%s7479_s2 + $0xb8] sm:$0xff] }
 0x1ad   :  { %3692 = vmatpush2.bf16.msra.mxu1 %v5212_v23  ;;  %v223_v23 = vld [vmem:[%s7479_s2 + $0x5b8] sm:$0xff]  ;;  %v4991_v57 = vcombine.high %v59_v49, %v63_v52 }
 0x1ae   :  { %3693 = vmatprep.subr.bf16.mxu1 %v5205_v12  ;;  %v5158_v12 = vcombine.low %v227_v63, %v231_v0  ;;  %v5151_v15 = vcombine.high %v219_v8, %v223_v23  ;;  %v5150_v26 = vcombine.low %v219_v8, %v223_v23  ;;  %v51_v63 = vld [vmem:[%s7479_s2 + $0x58] sm:$0xff] }
 0x1af   :  { %3653 = vmatpush2.bf16.msra.mxu0 %v5076_v17  ;;  %v55_v0 = vld [vmem:[%s7479_s2 + $0x78] sm:$0xff] }
 0x1b0   :  { %3654 = vmatprep.subr.bf16.mxu0 %v5069_v19  ;;  %v215_v19 = vld [vmem:[%s7479_s2 + $0x578] sm:$0xff]  ;;  %v4983_v6 = vcombine.high %v51_v63, %v55_v0 }
 0x1b1   :  { %3694 = vmatpush2.bf16.msra.mxu1 %v5204_v18  ;;  %v211_v18 = vld [vmem:[%s7479_s2 + $0x558] sm:$0xff] }
 0x1b2   :  { %3695 = vmatprep.subr.bf16.mxu1 %v5197_v51  ;;  %v43_v8 = vld [vmem:[%s7479_s2 + $0x18] sm:$0xff] }
 0x1b3   :  { %3655 = vmatpush2.bf16.msra.mxu0 %v5068_v59  ;;  %v5015_v59 = vcombine.high %v83_v16, %v87_v48  ;;  %v47_v23 = vld [vmem:[%s7479_s2 + $0x38] sm:$0xff] }
 0x1b4   :  { %3656 = vmatprep.subr.bf16.mxu0 %v5061_v28  ;;  %v5143_v28 = vcombine.high %v211_v18, %v215_v19 }
 0x1b5   :  { %3696 = vmatpush2.bf16.msra.mxu1 %v5196_v27 }
 0x1b6   :  { %3697 = vmatprep.subr.bf16.mxu1 %v5189_v60  ;;  %v75_v60 = vld [vmem:[%s7479_s2 + $0x118] sm:$0xff] }
 0x1b7   :  { %3657 = vmatpush2.bf16.msra.mxu0 %v5060_v34  ;;  %v207_v34 = vld [vmem:[%s7479_s2 + $0x538] sm:$0xff]  ;;  %v5007_v38 = vcombine.high %v75_v60, %v79_v29 }
 0x1b8   :  { %3658 = vmatprep.subr.bf16.mxu0 %v5053_v36  ;;  %v5014_v36 = vcombine.low %v83_v16, %v87_v48  ;;  %v5135_v40 = vcombine.high %v203_v33, %v207_v34  ;;  %v4975_v16 = vcombine.high %v43_v8, %v47_v23 }
 0x1b9   :  { %3698 = vmatpush2.bf16.msra.mxu1 %v5188_v35 }
 0x1ba   :  { %3699 = vmatprep.subr.bf16.mxu1 %v5181_v37 }
 0x1bb   :  { %3659 = vmatpush2.bf16.msra.mxu0 %v5052_v42  ;;  %v71_v42 = vld [vmem:[%s7479_s2 + $0xf8] sm:$0xff] }
 0x1bc   :  { %3660 = vmatprep.subr.bf16.mxu0 %v5045_v44  ;;  %v5006_v44 = vcombine.low %v75_v60, %v79_v29  ;;  %v4999_v46 = vcombine.high %v67_v41, %v71_v42  ;;  %v283_v60 = vld [vmem:[%s7479_s2 + $0x798] sm:$0xff] }
 0x1bd   :  { %3700 = vmatpush2.bf16.msra.mxu1 %v5180_v43  ;;  %v199_v43 = vld [vmem:[%s7479_s2 + $0x4f8] sm:$0xff] }
 0x1be   :  { %3701 = vmatprep.subr.bf16.mxu1 %v5173_v45  ;;  %v5134_v45 = vcombine.low %v203_v33, %v207_v34  ;;  %v287_v29 = vld [vmem:[%s7479_s2 + $0x7b8] sm:$0xff] }
 0x1bf   :  { %3661 = vmatpush2.bf16.msra.mxu0 %v5044_v53  ;;  %v187_v53 = vld [vmem:[%s7479_s2 + $0x498] sm:$0xff] }
 0x1c0   :  { %3662 = vmatprep.subr.bf16.mxu0 %v5037_v55  ;;  %v4998_v55 = vcombine.low %v67_v41, %v71_v42 }
 0x1c1   :  { %3702 = vmatpush2.bf16.msra.mxu1 %v5172_v54  ;;  %v191_v54 = vld [vmem:[%s7479_s2 + $0x4b8] sm:$0xff] }
 0x1c2   :  { %3703 = vmatprep.subr.bf16.mxu1 %v5165_v56  ;;  %v5119_v61 = vcombine.high %v187_v53, %v191_v54 }
 0x1c3   :  { %3663 = vmatpush2.bf16.msra.mxu0 %v5036_v3  ;;  %v179_v3 = vld [vmem:[%s7479_s2 + $0x458] sm:$0xff] }
 0x1c4   :  { %3714 = vmatprep.subr.bf16.mxu0 %v5031_v4  ;;  %v4990_v4 = vcombine.low %v59_v49, %v63_v52 }
 0x1c5   :  { %3704 = vmatpush2.bf16.msra.mxu1 %v5164_v20  ;;  %v183_v20 = vld [vmem:[%s7479_s2 + $0x478] sm:$0xff] }
 0x1c6   :  { %3755 = vmatprep.subr.bf16.mxu1 %v5159_v5  ;;  %v2126_v17 = vpop.f32.mrf.mxu0  ;;  %3665 = vmatmul.mubr.bf16.vlgmr.msra.gmra.mxu0 %v6539_v10  ;;  %v5118_v5 = vcombine.low %v187_v53, %v191_v54  ;;  %v5111_v7 = vcombine.high %v179_v3, %v183_v20  ;;  %v131_v53 = vld [vmem:[%s7479_s2 + $0x2d8] sm:$0xff] }
 0x1c7   :  { %3715 = vmatpush1.bf16.msra.mxu0 %v5030_v11  ;;  %3746 = vmatprep.mubr.bf16.mxu0 %v6343_v58  ;;  %v5142_v58 = vcombine.low %v211_v18, %v215_v19  ;;  %v171_v11 = vld [vmem:[%s7479_s2 + $0x418] sm:$0xff] }
 0x1c8   :  { %v2167_v51 = vpop.f32.mrf.mxu1  ;;  %3706 = vmatmul.mubr.bf16.vlgmr.msra.gmra.mxu1 %v6549_v13  ;;  %v2128_v24 = vpop.f32.mrf.mxu0  ;;  %3716 = vmatprep.subr.bf16.mxu0 %v5023_v14  ;;  %v4982_v14 = vcombine.low %v51_v63, %v55_v0  ;;  %v167_v18 = vld [vmem:[%s7479_s2 + $0x3f8] sm:$0xff] }
 0x1c9   :  { %v6965_v22 = vadd.f32 %v2167_v51, %v2126_v17  ;;  %3756 = vmatpush1.bf16.msra.mxu1 %v5158_v12  ;;  %3787 = vmatprep.mubr.bf16.mxu1 %v6354_v2  ;;  %v195_v2 = vld [vmem:[%s7479_s2 + $0x4d8] sm:$0xff] }
 0x1ca   :  { %v2169_v27 = vpop.f32.mrf.mxu1  ;;  %3757 = vmatprep.subr.bf16.mxu1 %v5151_v15  ;;  %v2130_v32 = vpop.f32.mrf.mxu0  ;;  %v5127_v47 = vcombine.high %v195_v2, %v199_v43  ;;  %v5126_v56 = vcombine.low %v195_v2, %v199_v43  ;;  %v175_v12 = vld [vmem:[%s7479_s2 + $0x438] sm:$0xff]  ;;  %v5110_v15 = vcombine.low %v179_v3, %v183_v20 }
 0x1cb   :  { %v6974_v30 = vadd.f32 %v2169_v27, %v2128_v24  ;;  %3717 = vmatpush1.bf16.msra.mxu0 %v5022_v21  ;;  %v5103_v48 = vcombine.high %v171_v11, %v175_v12  ;;  %v163_v17 = vld [vmem:[%s7479_s2 + $0x3d8] sm:$0xff]  ;;  %v4974_v21 = vcombine.low %v43_v8, %v47_v23  ;;  %v5102_v24 = vcombine.low %v171_v11, %v175_v12 }
 0x1cc   :  { %v2171_v35 = vpop.f32.mrf.mxu1  ;;  %v2131_v37 = vpop.f32.mrf.mxu0  ;;  %3718 = vmatprep.subr.bf16.mxu0 %v5015_v59  ;;  %v291_v19 = vld [vmem:[%s7479_s2 + $0x7d8] sm:$0xff]  ;;  %v5094_v32 = vcombine.low %v163_v17, %v167_v18 }
 0x1cd   :  { %3758 = vmatpush1.bf16.msra.mxu1 %v5150_v26  ;;  %v295_v51 = vld [vmem:[%s7479_s2 + $0x7f8] sm:$0xff]  ;;  %v5095_v26 = vcombine.high %v163_v17, %v167_v18  ;;  %v5215_v35 = vcombine.high %v283_v60, %v287_v29 }
 0x1ce   :  { %v2172_v39 = vpop.f32.mrf.mxu1  ;;  %3759 = vmatprep.subr.bf16.mxu1 %v5143_v28  ;;  %v5223_v59 = vcombine.high %v291_v19, %v295_v51  ;;  %v155_v27 = vld [vmem:[%s7479_s2 + $0x398] sm:$0xff]  ;;  %v5222_v33 = vcombine.low %v291_v19, %v295_v51 }
 0x1cf   :  { %3719 = vmatpush1.bf16.msra.mxu0 %v5014_v36  ;;  %v159_v28 = vld [vmem:[%s7479_s2 + $0x3b8] sm:$0xff] }
 0x1d0   :  { %3720 = vmatprep.subr.bf16.mxu0 %v5007_v38  ;;  %v5087_v34 = vcombine.high %v155_v27, %v159_v28  ;;  %v147_v36 = vld [vmem:[%s7479_s2 + $0x358] sm:$0xff]  ;;  %v5086_v39 = vcombine.low %v155_v27, %v159_v28 }
 0x1d1   :  { %3760 = vmatpush1.bf16.msra.mxu1 %v5142_v58  ;;  %v151_v37 = vld [vmem:[%s7479_s2 + $0x378] sm:$0xff] }
 0x1d2   :  { %3761 = vmatprep.subr.bf16.mxu1 %v5135_v40  ;;  %v275_v58 = vld [vmem:[%s7479_s2 + $0x758] sm:$0xff]  ;;  %v5214_v40 = vcombine.low %v283_v60, %v287_v29  ;;  %v5079_v41 = vcombine.high %v147_v36, %v151_v37 }
 0x1d3   :  { %3721 = vmatpush1.bf16.msra.mxu0 %v5006_v44  ;;  %v279_v38 = vld [vmem:[%s7479_s2 + $0x778] sm:$0xff] }
 0x1d4   :  { %3722 = vmatprep.subr.bf16.mxu0 %v4999_v46  ;;  %v5207_v42 = vcombine.high %v275_v58, %v279_v38  ;;  %v139_v2 = vld [vmem:[%s7479_s2 + $0x318] sm:$0xff]  ;;  %v5078_v46 = vcombine.low %v147_v36, %v151_v37 }
 0x1d5   :  { %3762 = vmatpush1.bf16.msra.mxu1 %v5134_v45  ;;  %v143_v43 = vld [vmem:[%s7479_s2 + $0x338] sm:$0xff] }
 0x1d6   :  { %3763 = vmatprep.subr.bf16.mxu1 %v5127_v47  ;;  %v267_v44 = vld [vmem:[%s7479_s2 + $0x718] sm:$0xff]  ;;  %v5206_v47 = vcombine.low %v275_v58, %v279_v38  ;;  %v5071_v49 = vcombine.high %v139_v2, %v143_v43 }
 0x1d7   :  { %3723 = vmatpush1.bf16.msra.mxu0 %v4998_v55  ;;  %v271_v45 = vld [vmem:[%s7479_s2 + $0x738] sm:$0xff] }
 0x1d8   :  { %3724 = vmatprep.subr.bf16.mxu0 %v4991_v57  ;;  %v5199_v52 = vcombine.high %v267_v44, %v271_v45  ;;  %v135_v54 = vld [vmem:[%s7479_s2 + $0x2f8] sm:$0xff]  ;;  %v5070_v57 = vcombine.low %v139_v2, %v143_v43 }
 0x1d9   :  { %3764 = vmatpush1.bf16.msra.mxu1 %v5126_v56  ;;  %v259_v55 = vld [vmem:[%s7479_s2 + $0x6d8] sm:$0xff]  ;;  %v5063_v63 = vcombine.high %v131_v53, %v135_v54 }
 0x1da   :  { %3765 = vmatprep.subr.bf16.mxu1 %v5119_v61  ;;  %v263_v56 = vld [vmem:[%s7479_s2 + $0x6f8] sm:$0xff]  ;;  %v5198_v61 = vcombine.low %v267_v44, %v271_v45 }
 0x1db   :  { %3725 = vmatpush1.bf16.msra.mxu0 %v4990_v4  ;;  %v5191_v0 = vcombine.high %v259_v55, %v263_v56  ;;  %v123_v3 = vld [vmem:[%s7479_s2 + $0x298] sm:$0xff] }
 0x1dc   :  { %3726 = vmatprep.subr.bf16.mxu0 %v4983_v6  ;;  %v127_v20 = vld [vmem:[%s7479_s2 + $0x2b8] sm:$0xff]  ;;  %v5062_v6 = vcombine.low %v131_v53, %v135_v54 }
 0x1dd   :  { %3766 = vmatpush1.bf16.msra.mxu1 %v5118_v5  ;;  %v251_v4 = vld [vmem:[%s7479_s2 + $0x698] sm:$0xff]  ;;  %v5055_v8 = vcombine.high %v123_v3, %v127_v20 }
 0x1de   :  { %3767 = vmatprep.subr.bf16.mxu1 %v5111_v7  ;;  %v255_v5 = vld [vmem:[%s7479_s2 + $0x6b8] sm:$0xff]  ;;  %v5190_v7 = vcombine.low %v259_v55, %v263_v56 }
 0x1df   :  { %3727 = vmatpush1.bf16.msra.mxu0 %v4982_v14  ;;  %v5183_v23 = vcombine.high %v251_v4, %v255_v5  ;;  %v115_v11 = vld [vmem:[%s7479_s2 + $0x258] sm:$0xff] }
 0x1e0   :  { %3728 = vmatprep.subr.bf16.mxu0 %v4975_v16  ;;  %v119_v12 = vld [vmem:[%s7479_s2 + $0x278] sm:$0xff]  ;;  %v5054_v16 = vcombine.low %v123_v3, %v127_v20 }
 0x1e1   :  { %3768 = vmatpush1.bf16.msra.mxu1 %v5110_v15  ;;  %v243_v14 = vld [vmem:[%s7479_s2 + $0x658] sm:$0xff]  ;;  %v5047_v17 = vcombine.high %v115_v11, %v119_v12 }
 0x1e2   :  { %3769 = vmatprep.subr.bf16.mxu1 %v5103_v48  ;;  %v247_v15 = vld [vmem:[%s7479_s2 + $0x678] sm:$0xff]  ;;  %v5182_v48 = vcombine.low %v251_v4, %v255_v5 }
 0x1e3   :  { %3729 = vmatpush1.bf16.msra.mxu0 %v4974_v21  ;;  %v5175_v18 = vcombine.high %v243_v14, %v247_v15  ;;  %v107_v19 = vld [vmem:[%s7479_s2 + $0x218] sm:$0xff] }
 0x1e4   :  { %3730 = vmatprep.subr.bf16.mxu0 %v5095_v26  ;;  %v111_v51 = vld [vmem:[%s7479_s2 + $0x238] sm:$0xff]  ;;  %v5046_v26 = vcombine.low %v115_v11, %v119_v12 }
 0x1e5   :  { %3770 = vmatpush1.bf16.msra.mxu1 %v5102_v24  ;;  %v235_v21 = vld [vmem:[%s7479_s2 + $0x618] sm:$0xff]  ;;  %v5039_v27 = vcombine.high %v107_v19, %v111_v51  ;;  %v5038_v60 = vcombine.low %v107_v19, %v111_v51 }
 0x1e6   :  { %3771 = vmatprep.subr.bf16.mxu1 %v5223_v59  ;;  %v239_v24 = vld [vmem:[%s7479_s2 + $0x638] sm:$0xff]  ;;  %v5174_v59 = vcombine.low %v243_v14, %v247_v15 }
 0x1e7   :  { %3731 = vmatpush2.bf16.msra.mxu0 %v5094_v32  ;;  %v5167_v28 = vcombine.high %v235_v21, %v239_v24  ;;  %v5166_v29 = vcombine.low %v235_v21, %v239_v24  ;;  %v34_v5 = vld [vmem:[%s7481_s4] ss:$4 sm:$0xff] }
 0x1e8   :  { %3732 = vmatprep.subr.bf16.mxu0 %v5087_v34 }
 0x1e9   :  { %3772 = vmatpush2.bf16.msra.mxu1 %v5222_v33 }
 0x1ea   :  { %3773 = vmatprep.subr.bf16.mxu1 %v5215_v35 }
 0x1eb   :  { %3733 = vmatpush2.bf16.msra.mxu0 %v5086_v39 }
 0x1ec   :  { %3734 = vmatprep.subr.bf16.mxu0 %v5079_v41 }
 0x1ed   :  { %3774 = vmatpush2.bf16.msra.mxu1 %v5214_v40 }
 0x1ee   :  { %3775 = vmatprep.subr.bf16.mxu1 %v5207_v42 }
 0x1ef   :  { %3735 = vmatpush2.bf16.msra.mxu0 %v5078_v46 }
 0x1f0   :  { %3736 = vmatprep.subr.bf16.mxu0 %v5071_v49 }
 0x1f1   :  { %3776 = vmatpush2.bf16.msra.mxu1 %v5206_v47 }
 0x1f2   :  { %3777 = vmatprep.subr.bf16.mxu1 %v5199_v52 }
 0x1f3   :  { %3737 = vmatpush2.bf16.msra.mxu0 %v5070_v57 }
 0x1f4   :  { %3738 = vmatprep.subr.bf16.mxu0 %v5063_v63 }
 0x1f5   :  { %3778 = vmatpush2.bf16.msra.mxu1 %v5198_v61 }
 0x1f6   :  { %3779 = vmatprep.subr.bf16.mxu1 %v5191_v0 }
 0x1f7   :  { %3739 = vmatpush2.bf16.msra.mxu0 %v5062_v6 }
 0x1f8   :  { %3740 = vmatprep.subr.bf16.mxu0 %v5055_v8 }
 0x1f9   :  { %3780 = vmatpush2.bf16.msra.mxu1 %v5190_v7 }
 0x1fa   :  { %3781 = vmatprep.subr.bf16.mxu1 %v5183_v23 }
 0x1fb   :  { %3741 = vmatpush2.bf16.msra.mxu0 %v5054_v16 }
 0x1fc   :  { %3742 = vmatprep.subr.bf16.mxu0 %v5047_v17 }
 0x1fd   :  { %3782 = vmatpush2.bf16.msra.mxu1 %v5182_v48 }
 0x1fe   :  { %3783 = vmatprep.subr.bf16.mxu1 %v5175_v18 }
 0x1ff   :  { %3743 = vmatpush2.bf16.msra.mxu0 %v5046_v26 }
 0x200   :  { %3744 = vmatprep.subr.bf16.mxu0 %v5039_v27 }
 0x201   :  { %3784 = vmatpush2.bf16.msra.mxu1 %v5174_v59 }
 0x202   :  { %3785 = vmatprep.subr.bf16.mxu1 %v5167_v28 }
 0x203   :  { %3745 = vmatpush2.bf16.msra.mxu0 %v5038_v60 }
 0x205   :  { %3786 = vmatpush2.bf16.msra.mxu1 %v5166_v29 }
 0x206   :  { %v3502_v32 = vpop.f32.mrf.mxu0  ;;  %3747 = vmatmul.mubr.bf16.vlgmr.msra.gmra.mxu0 %v6539_v10 }
 0x207   :  { %v3503_v33 = vadd.f32 %v3502_v32, %v6357_v1 }
 0x208   :  { %v3543_v34 = vpop.f32.mrf.mxu1  ;;  %3788 = vmatmul.mubr.bf16.vlgmr.msra.gmra.mxu1 %v6549_v13  ;;  %v3504_v35 = vpop.f32.mrf.mxu0 }
 0x209   :  { %v3544_v36 = vadd.f32 %v3543_v34, %v3503_v33  ;;  %v3505_v37 = vadd.f32 %v3504_v35, %v6366_v9 }
 0x20a   :  { %v3545_v58 = vpop.f32.mrf.mxu1  ;;  %v3506_v38 = vpop.f32.mrf.mxu0 }
 0x20b   :  { %v3546_v39 = vadd.f32 %v3545_v58, %v3505_v37 }
 0x20c   :  { %v3547_v40 = vpop.f32.mrf.mxu1  ;;  %v3507_v41 = vpop.f32.mrf.mxu0 }
 0x20e   :  { %v3548_v42 = vpop.f32.mrf.mxu1 }
 0x246   :  { %v3584_v2 = vpop.f32.mrf.mxu0 }
 0x247   :  { %v3585_v43 = vadd.f32 %v3584_v2, %v6565_v25  ;;  %v3797_v25 = vlaneseq }
 0x248   :  { %v3625_v44 = vpop.f32.mrf.mxu1  ;;  %v3586_v10 = vpop.f32.mrf.mxu0 }
 0x249   :  { %v3626_v45 = vadd.f32 %v3625_v44, %v3585_v43  ;;  %v3587_v1 = vadd.f32 %v3586_v10, %v6574_v31  ;;  %v3798_v3 = vshrl.u32 %v3797_v25, 7 }
 0x24a   :  { %v3627_v46 = vpop.f32.mrf.mxu1  ;;  %v3588_v13 = vpop.f32.mrf.mxu0 }
 0x24b   :  { %v3628_v47 = vadd.f32 %v3627_v46, %v3587_v1  ;;  %v7133_v20 = vsub.s32 1, %v3798_v3  ;;  %v7135_v4 = vsub.s32 0, %v3798_v3  ;;  %v7137_v31 = vsub.s32 2, %v3798_v3 }
 0x24c   :  { %v3629_v49 = vpop.f32.mrf.mxu1  ;;  %v3589_v52 = vpop.f32.mrf.mxu0  ;;  %v7145_v23 = vsub.s32 3, %v3798_v3  ;;  %v7150_v14 = vsub.s32 4, %v3798_v3  ;;  %v7157_v17 = vsub.s32 5, %v3798_v3  ;;  %v7177_v34 = vsub.s32 6, %v3798_v3 }
 0x24d   :  { %v3804_v6 = vrot.slane %v34_v5, %v7133_v20  ;;  %v3800_v7 = vrot.slane %v34_v5, %v7135_v4  ;;  %v3808_v8 = vrot.slane %v34_v5, %v7137_v31  ;;  %v7179_v35 = vsub.s32 7, %v3798_v3  ;;  %v5378_v3 = vld [vmem:[%s7482_s5 + $0x78] sm:$0xff]  }
 0x24e   :  { %v3630_v9 = vpop.f32.mrf.mxu1  ;;  %v3812_v48 = vrot.slane %v34_v5, %v7145_v23  ;;  %v3816_v51 = vrot.slane %v34_v5, %v7150_v14  ;;  %v3820_v27 = vrot.slane %v34_v5, %v7157_v17  ;;  %v3824_v42 = vrot.slane %v34_v5, %v7177_v34  ;;  %5289 = vmatprep.subr.bf16.mxu0 %v5378_v3 }
 0x24f   :  { %v7147_v11 = vadd.f32 %v3804_v6, %v3546_v39  ;;  %v7152_v15 = vadd.f32 %v3800_v7, %v3544_v36  ;;  %v7154_v16 = vadd.f32 %v3808_v8, %v3626_v45  ;;  %v3828_v44 = vrot.slane %v34_v5, %v7179_v35  ;;  %v5379_v5 = vld [vmem:[%s7482_s5 + $0xf8] sm:$0xff]   ;;  %v5382_v8 = vld [vmem:[%s7482_s5 + $0x70] sm:$0xff]  }
 0x250   :  { %v7169_v59 = vadd.f32 %v3812_v48, %v3628_v47  ;;  %v5380_v6 = vld [vmem:[%s7482_s5 + $0x38] sm:$0xff]   ;;  %5311 = vmatprep.subr.bf16.mxu1 %v5379_v5  ;;  %v5384_v48 = vld [vmem:[%s7482_s5 + $0x30] sm:$0xff]  }
 0x251   :  { %v3856_v18 = vmul.f32 %v7147_v11, %v7147_v11  ;;  %v3845_v24 = vadd.f32 %v7147_v11, %v7152_v15  ;;  %v3857_v26 = vmul.f32 %v7154_v16, %v7154_v16  ;;  %v5381_v7 = vld [vmem:[%s7482_s5 + $0xb8] sm:$0xff]   ;;  %5290 = vmatpush3.bf16.msra.mxu0 %v5380_v6 }
 0x252   :  { %v3858_v33 = vmul.f32 %v7169_v59, %v7169_v59  ;;  %5312 = vmatpush3.bf16.msra.mxu1 %v5381_v7  ;;  %5291 = vmatprep.subr.bf16.mxu0 %v5382_v8 }
 0x253   :  { %v3846_v60 = vadd.f32 %v3845_v24, %v7154_v16  ;;  %v5390_v24 = vld [vmem:[%s7482_s5 + $0x60] sm:$0xff]  }
 0x255   :  { %v3847_v36 = vadd.f32 %v3846_v60, %v7169_v59  ;;  %5292 = vmatpush3.bf16.msra.mxu0 %v5384_v48  ;;  %v5394_v60 = vld [vmem:[%s7482_s5 + $0x58] sm:$0xff]  }
 0x286   :  { %v3666_v53 = vpop.f32.mrf.mxu0 }
 0x287   :  { %v3667_v12 = vadd.f32 %v3666_v53, %v6765_v50  ;;  %v3855_v50 = vmul.f32 %v7152_v15, %v7152_v15 }
 0x288   :  { %v3707_v54 = vpop.f32.mrf.mxu1  ;;  %v3668_v55 = vpop.f32.mrf.mxu0 }
 0x289   :  { %v3708_v19 = vadd.f32 %v3707_v54, %v3667_v12  ;;  %v3669_v21 = vadd.f32 %v3668_v55, %v6774_v62  ;;  %v3863_v28 = vadd.f32 %v3856_v18, %v3855_v50  ;;  %v5383_v12 = vld [vmem:[%s7482_s5 + $0xf0] sm:$0xff]   ;;  %v5389_v50 = vld [vmem:[%s7482_s5 + $0xa8] sm:$0xff]  }
 0x28a   :  { %v3709_v56 = vpop.f32.mrf.mxu1  ;;  %v3670_v57 = vpop.f32.mrf.mxu0  ;;  %5313 = vmatprep.subr.bf16.mxu1 %v5383_v12  ;;  %v5385_v18 = vld [vmem:[%s7482_s5 + $0xb0] sm:$0xff]  }
 0x28b   :  { %v7173_v29 = vadd.f32 %v3816_v51, %v3708_v19  ;;  %v3710_v32 = vadd.f32 %v3709_v56, %v3669_v21  ;;  %v3864_v62 = vadd.f32 %v3863_v28, %v3857_v26  ;;  %v5386_v19 = vld [vmem:[%s7482_s5 + $0x68] sm:$0xff]   ;;  %5314 = vmatpush3.bf16.msra.mxu1 %v5385_v18  ;;  %v5391_v26 = vld [vmem:[%s7482_s5 + $0xe0] sm:$0xff]  }
 0x28c   :  { %v3711_v61 = vpop.f32.mrf.mxu1  ;;  %v3671_v63 = vpop.f32.mrf.mxu0  ;;  %v5387_v51 = vld [vmem:[%s7482_s5 + $0xe8] sm:$0xff]   ;;  %5293 = vmatprep.subr.bf16.mxu0 %v5386_v19  ;;  %v5393_v28 = vld [vmem:[%s7482_s5 + $0xa0] sm:$0xff]  }
 0x28d   :  { %v3859_v37 = vmul.f32 %v7173_v29, %v7173_v29  ;;  %v7184_v58 = vadd.f32 %v3820_v27, %v3710_v32  ;;  %v3865_v39 = vadd.f32 %v3864_v62, %v3858_v33  ;;  %v3848_v2 = vadd.f32 %v3847_v36, %v7173_v29  ;;  %v5388_v21 = vld [vmem:[%s7482_s5 + $0x28] sm:$0xff]   ;;  %5315 = vmatprep.subr.bf16.mxu1 %v5387_v51  ;;  %v5392_v27 = vld [vmem:[%s7482_s5 + $0x20] sm:$0xff]   ;;  %v5395_v32 = vld [vmem:[%s7482_s5 + $0xd8] sm:$0xff]  }
 0x28e   :  { %v3712_v0 = vpop.f32.mrf.mxu1  ;;  %5294 = vmatpush3.bf16.msra.mxu0 %v5388_v21  ;;  %v5396_v62 = vld [vmem:[%s7482_s5 + $0x18] sm:$0xff]   ;;  %v5398_v36 = vld [vmem:[%s7482_s5 + $0x50] sm:$0xff]  }
 0x28f   :  { %v3860_v10 = vmul.f32 %v7184_v58, %v7184_v58  ;;  %v3866_v13 = vadd.f32 %v3865_v39, %v3859_v37  ;;  %v3849_v9 = vadd.f32 %v3848_v2, %v7184_v58  ;;  %5316 = vmatpush3.bf16.msra.mxu1 %v5389_v50  ;;  %5295 = vmatprep.subr.bf16.mxu0 %v5390_v24  ;;  %v5397_v33 = vld [vmem:[%s7482_s5 + $0x98] sm:$0xff]   ;;  %v5399_v37 = vld [vmem:[%s7482_s5 + $0xd0] sm:$0xff]   ;;  %v5405_v2 = vld [vmem:[%s7482_s5 + $0x88] sm:$0xff]  }
 0x290   :  { %5317 = vmatprep.subr.bf16.mxu1 %v5391_v26  ;;  %v5401_v39 = vld [vmem:[%s7482_s5 + $0x90] sm:$0xff]  }
 0x291   :  { %v3867_v61 = vadd.f32 %v3866_v13, %v3860_v10  ;;  %v5408_v10 = vld [vmem:[%s7482_s5] sm:$0xff]  }
 0x292   :  { %5296 = vmatpush3.bf16.msra.mxu0 %v5392_v27 }
 0x293   :  { %5318 = vmatpush3.bf16.msra.mxu1 %v5393_v28  ;;  %5297 = vmatprep.subr.bf16.mxu0 %v5394_v60 }
 0x294   :  { %5319 = vmatprep.subr.bf16.mxu1 %v5395_v32 }
 0x296   :  { %5298 = vmatpush3.bf16.msra.mxu0 %v5396_v62 }
 0x297   :  { %5320 = vmatpush3.bf16.msra.mxu1 %v5397_v33  ;;  %5299 = vmatprep.subr.bf16.mxu0 %v5398_v36 }
 0x298   :  { %5321 = vmatprep.subr.bf16.mxu1 %v5399_v37 }
 0x29b   :  { %5322 = vmatpush3.bf16.msra.mxu1 %v5401_v39 }
 0x2c6   :  { %v3748_v38 = vpop.f32.mrf.mxu0 }
 0x2c7   :  { %v3749_v40 = vadd.f32 %v3748_v38, %v6965_v22  ;;  %v5400_v38 = vld [vmem:[%s7482_s5 + $0x10] sm:$0xff]  }
 0x2c8   :  { %v3789_v41 = vpop.f32.mrf.mxu1  ;;  %v3750_v43 = vpop.f32.mrf.mxu0  ;;  %5300 = vmatpush3.bf16.msra.mxu0 %v5400_v38 }
 0x2c9   :  { %v3790_v45 = vadd.f32 %v3789_v41, %v3749_v40  ;;  %v3751_v1 = vadd.f32 %v3750_v43, %v6974_v30  ;;  %v5402_v40 = vld [vmem:[%s7482_s5 + $0x48] sm:$0xff]   ;;  %v5406_v43 = vld [vmem:[%s7482_s5 + $0x40] sm:$0xff]  }
 0x2ca   :  { %v3791_v46 = vpop.f32.mrf.mxu1  ;;  %v3752_v47 = vpop.f32.mrf.mxu0  ;;  %v5403_v41 = vld [vmem:[%s7482_s5 + $0xc8] sm:$0xff]   ;;  %5301 = vmatprep.subr.bf16.mxu0 %v5402_v40 }
 0x2cb   :  { %v7193_v49 = vadd.f32 %v3824_v42, %v3790_v45  ;;  %v3792_v22 = vadd.f32 %v3791_v46, %v3751_v1  ;;  %v5404_v42 = vld [vmem:[%s7482_s5 + $0x8] sm:$0xff]   ;;  %5323 = vmatprep.subr.bf16.mxu1 %v5403_v41  ;;  %v5409_v45 = vld [vmem:[%s7482_s5 + $0x80] sm:$0xff]   ;;  %v5410_v1 = vld [vmem:[%s7482_s5 + $0x178] sm:$0xff]  }
 0x2cc   :  { %v3793_v52 = vpop.f32.mrf.mxu1  ;;  %v3753_v53 = vpop.f32.mrf.mxu0  ;;  %5302 = vmatpush3.bf16.msra.mxu0 %v5404_v42  ;;  %5324 = vmatpush3.bf16.msra.mxu1 %v5405_v2  ;;  %v5411_v46 = vld [vmem:[%s7482_s5 + $0x1f8] sm:$0xff]  }
 0x2cd   :  { %v7196_v54 = vadd.f32 %v3828_v44, %v3792_v22  ;;  %v3850_v56 = vadd.f32 %v3849_v9, %v7193_v49  ;;  %v3861_v57 = vmul.f32 %v7193_v49, %v7193_v49  ;;  %v5407_v44 = vld [vmem:[%s7482_s5 + $0xc0] sm:$0xff]   ;;  %5303 = vmatprep.subr.bf16.mxu0 %v5406_v43 }
 0x2ce   :  { %v3794_v55 = vpop.f32.mrf.mxu1  ;;  %5325 = vmatprep.subr.bf16.mxu1 %v5407_v44 }
 0x2cf   :  { %v3851_v30 = vadd.f32 %v3850_v56, %v7196_v54  ;;  %v3862_v63 = vmul.f32 %v7196_v54, %v7196_v54  ;;  %v3868_v0 = vadd.f32 %v3867_v61, %v3861_v57  ;;  %v7313_v56 = vld [vmem:[%s7481_s4 + $0x1] ss:$4 sm:$0xff]  ;;  %v7318_v57 = vld [vmem:[%s7481_s4 + $0x2] ss:$4 sm:$0xff] }
 0x2d0   :  { %5304 = vmatpush3.bf16.msra.mxu0 %v5408_v10  ;;  %5326 = vmatpush3.bf16.msra.mxu1 %v5409_v45  ;;  %v3881_v61 = vrot.slane %v7313_v56, %v7135_v4  ;;  %v3958_v3 = vrot.slane %v7318_v57, %v7145_v23  ;;  %v3901_v5 = vrot.slane %v7313_v56, %v7157_v17  ;;  %v5412_v10 = vld [vmem:[%s7482_s5 + $0x138] sm:$0xff]  }
 0x2d1   :  { %3852 = vadd.xlane.f32.xlu0 %v3851_v30  ;;  %v3869_v25 = vadd.f32 %v3868_v0, %v3862_v63  ;;  %5333 = vmatprep.subr.bf16.mxu0 %v5410_v1  ;;  %v3889_v30 = vrot.slane %v7313_v56, %v7137_v31  ;;  %v3885_v63 = vrot.slane %v7313_v56, %v7133_v20  ;;  %v5413_v45 = vld [vmem:[%s7482_s5 + $0x1b8] sm:$0xff]   ;;  %v5414_v1 = vld [vmem:[%s7482_s5 + $0x170] sm:$0xff]  }
 0x2d2   :  { %5355 = vmatprep.subr.bf16.mxu1 %v5411_v46  ;;  %v3893_v0 = vrot.slane %v7313_v56, %v7145_v23  ;;  %v3909_v6 = vrot.slane %v7313_v56, %v7179_v35  ;;  %v3946_v7 = vrot.slane %v7318_v57, %v7135_v4  ;;  %v3954_v8 = vrot.slane %v7318_v57, %v7137_v31  ;;  %v5415_v46 = vld [vmem:[%s7482_s5 + $0x1f0] sm:$0xff]  }
 0x2d3   :  { %v3966_v12 = vrot.slane %v7318_v57, %v7157_v17 }
 0x2d5   :  { %3870 = vadd.xlane.f32.xlu0 %v3869_v25  ;;  %v3950_v25 = vrot.slane %v7318_v57, %v7133_v20  ;;  %v3974_v20 = vrot.slane %v7318_v57, %v7179_v35 }
 0x35a   :  { %v3853_v13 = vpop.xlane.xlu0 %3852 }
 0x35b   :  { %v7306_v47 = vmul.f32 0.0009765625, %v3853_v13 }
 0x35d   :  { %v3873_v52 = vmul.f32 %v7306_v47, %v7306_v47  ;;  %v3927_v23 = vsub.f32 %v7147_v11, %v7306_v47  ;;  %v3929_v18 = vsub.f32 %v7169_v59, %v7306_v47  ;;  %v3926_v4 = vsub.f32 %v7152_v15, %v7306_v47 }
 0x35e   :  { %v3871_v22 = vpop.xlane.xlu0 %3870  ;;  %v3928_v31 = vsub.f32 %v7154_v16, %v7306_v47  ;;  %v3931_v11 = vsub.f32 %v7184_v58, %v7306_v47  ;;  %v3933_v15 = vsub.f32 %v7196_v54, %v7306_v47 }
 0x35f   :  { %v3872_v9 = vmul.f32 0.0009765625, %v3871_v22 }
 0x361   :  { %v3874_v53 = vsub.f32 %v3872_v9, %v3873_v52  ;;  %v5416_v52 = vld [vmem:[%s7482_s5 + $0x130] sm:$0xff]  }
 0x362   :  { %v5417_v9 = vld [vmem:[%s7482_s5 + $0x1b0] sm:$0xff]  }
 0x363   :  { %v3875_v55 = vadd.f32 1e-05, %v3874_v53  ;;  %v5418_v53 = vld [vmem:[%s7482_s5 + $0x168] sm:$0xff]  }
 0x365   :  { %5442 = vrsqrt.f32 %v3875_v55  ;;  %v5419_v55 = vld [vmem:[%s7482_s5 + $0x1e8] sm:$0xff]  }
 0x372   :  { %v7344_v48 = vpop.eup %5442 }
 0x373   :  { %v3919_v19 = vmul.f32 %v7344_v48, %v3885_v63  ;;  %v3921_v17 = vmul.f32 %v7344_v48, %v3893_v0  ;;  %v3918_v35 = vmul.f32 %v7344_v48, %v3881_v61  ;;  %v3920_v51 = vmul.f32 %v7344_v48, %v3889_v30  ;;  %v5420_v61 = vld [vmem:[%s7482_s5 + $0x128] sm:$0xff]   ;;  %v5422_v63 = vld [vmem:[%s7482_s5 + $0x160] sm:$0xff]  }
 0x374   :  { %v3923_v21 = vmul.f32 %v7344_v48, %v3901_v5  ;;  %v3925_v59 = vmul.f32 %v7344_v48, %v3909_v6  ;;  %v5421_v30 = vld [vmem:[%s7482_s5 + $0x1a8] sm:$0xff]   ;;  %v5423_v0 = vld [vmem:[%s7482_s5 + $0x1e0] sm:$0xff]   ;;  %v3897_v5 = vrot.slane %v7313_v56, %v7150_v14  ;;  %v3905_v6 = vrot.slane %v7313_v56, %v7177_v34  ;;  %v5429_v56 = vld [vmem:[%s7482_s5 + $0x198] sm:$0xff]  }
 0x375   :  { %v3935_v50 = vmul.f32 %v3927_v23, %v3919_v19  ;;  %v3937_v16 = vmul.f32 %v3929_v18, %v3921_v17  ;;  %v3934_v24 = vmul.f32 %v3926_v4, %v3918_v35  ;;  %v3936_v26 = vmul.f32 %v3928_v31, %v3920_v51  ;;  %v5431_v23 = vld [vmem:[%s7482_s5 + $0x1d0] sm:$0xff]  }
 0x376   :  { %v3939_v27 = vmul.f32 %v3931_v11, %v3923_v21  ;;  %v3941_v28 = vmul.f32 %v3933_v15, %v3925_v59  ;;  %v3922_v18 = vmul.f32 %v7344_v48, %v3897_v5  ;;  %v3924_v4 = vmul.f32 %v7344_v48, %v3905_v6  ;;  %v5432_v17 = vld [vmem:[%s7482_s5 + $0x110] sm:$0xff]   ;;  %v5437_v11 = vld [vmem:[%s7482_s5 + $0x188] sm:$0xff]   ;;  %v5438_v59 = vld [vmem:[%s7482_s5 + $0x140] sm:$0xff]  }
 0x377   :  { %v3984_v60 = vadd.f32 %v3950_v25, %v3935_v50  ;;  %v3986_v32 = vadd.f32 %v3958_v3, %v3937_v16  ;;  %v3983_v62 = vadd.f32 %v3946_v7, %v3934_v24  ;;  %v3985_v33 = vadd.f32 %v3954_v8, %v3936_v26  ;;  %v5424_v25 = vld [vmem:[%s7482_s5 + $0x120] sm:$0xff]   ;;  %v5426_v7 = vld [vmem:[%s7482_s5 + $0x158] sm:$0xff]   ;;  %v5433_v35 = vld [vmem:[%s7482_s5 + $0x190] sm:$0xff]  }
 0x378   :  { %v3988_v36 = vadd.f32 %v3966_v12, %v3939_v27  ;;  %v3990_v37 = vadd.f32 %v3974_v20, %v3941_v28  ;;  %v5425_v3 = vld [vmem:[%s7482_s5 + $0x1a0] sm:$0xff]   ;;  %v5427_v8 = vld [vmem:[%s7482_s5 + $0x1d8] sm:$0xff]   ;;  %v5430_v20 = vld [vmem:[%s7482_s5 + $0x150] sm:$0xff]   ;;  %v3930_v31 = vsub.f32 %v7173_v29, %v7306_v47  ;;  %v3932_v19 = vsub.f32 %v7193_v49, %v7306_v47 }
 0x379   :  { %v3992_v38 = vmax.f32 %v3984_v60, 0.0  ;;  %v3994_v39 = vmax.f32 %v3986_v32, 0.0  ;;  %v3991_v58 = vmax.f32 %v3983_v62, 0.0  ;;  %v3993_v40 = vmax.f32 %v3985_v33, 0.0  ;;  %v5428_v12 = vld [vmem:[%s7482_s5 + $0x118] sm:$0xff]   ;;  %v5434_v29 = vld [vmem:[%s7482_s5 + $0x148] sm:$0xff]  }
 0x37a   :  { %v3996_v41 = vmax.f32 %v3988_v36, 0.0  ;;  %v3998_v42 = vmax.f32 %v3990_v37, 0.0  ;;  %v3962_v51 = vrot.slane %v7318_v57, %v7150_v14  ;;  %v5435_v49 = vld [vmem:[%s7482_s5 + $0x1c8] sm:$0xff]   ;;  %v3938_v47 = vmul.f32 %v3930_v31, %v3922_v18  ;;  %v5440_v50 = vld [vmem:[%s7482_s5 + $0x100] sm:$0xff]  }
 0x37b   :  { %v4000_v2 = vpack.c.bf16 %v3992_v38, %v3992_v38  ;;  %v4002_v54 = vpack.c.bf16 %v3994_v39, %v3994_v39  ;;  %v3999_v43 = vpack.c.bf16 %v3991_v58, %v3991_v58  ;;  %v4001_v44 = vpack.c.bf16 %v3993_v40, %v3993_v40  ;;  %v5436_v14 = vld [vmem:[%s7482_s5 + $0x108] sm:$0xff]   ;;  %v5441_v16 = vld [vmem:[%s7482_s5 + $0x180] sm:$0xff]  }
 0x37c   :  { %v4004_v13 = vpack.c.bf16 %v3996_v41, %v3996_v41  ;;  %v4006_v22 = vpack.c.bf16 %v3998_v42, %v3998_v42  ;;  %v3940_v48 = vmul.f32 %v3932_v19, %v3924_v4  ;;  %v3970_v21 = vrot.slane %v7318_v57, %v7177_v34  ;;  %v5439_v34 = vld [vmem:[%s7482_s5 + $0x1c0] sm:$0xff]  }
 0x37d   :  { %4555 = vmatprep.mubr.bf16.mxu0 %v4000_v2  ;;  %4595 = vmatprep.mubr.bf16.mxu1 %v4002_v54  ;;  %v3987_v57 = vadd.f32 %v3962_v51, %v3938_v47  ;;  %v5224_v40 = vld [vmem:[%s7481_s4 + $0x3] ss:$0 sm:$0xff] }
 0x37e   :  { %4556 = vmatmul.mubr.bf16.vlgmr.msra.gmra.mxu0 %v3999_v43  ;;  %4596 = vmatmul.mubr.bf16.vlgmr.msra.gmra.mxu1 %v4001_v44  ;;  %v3989_v15 = vadd.f32 %v3970_v21, %v3940_v48 }
 0x37f   :  { %5334 = vmatpush3.bf16.msra.mxu0 %v5412_v10  ;;  %5356 = vmatpush3.bf16.msra.mxu1 %v5413_v45  ;;  %v3995_v24 = vmax.f32 %v3987_v57, 0.0 }
 0x380   :  { %4635 = vmatprep.mubr.bf16.mxu0 %v4004_v13  ;;  %4675 = vmatprep.mubr.bf16.mxu1 %v4006_v22  ;;  %v3997_v26 = vmax.f32 %v3989_v15, 0.0 }
 0x381   :  { %5335 = vmatprep.subr.bf16.mxu0 %v5414_v1  ;;  %5357 = vmatprep.subr.bf16.mxu1 %v5415_v46  ;;  %v4003_v27 = vpack.c.bf16 %v3995_v24, %v3995_v24 }
 0x382   :  { %v4005_v28 = vpack.c.bf16 %v3997_v26, %v3997_v26 }
 0x383   :  { %5336 = vmatpush3.bf16.msra.mxu0 %v5416_v52  ;;  %5358 = vmatpush3.bf16.msra.mxu1 %v5417_v9 }
 0x384   :  { %5337 = vmatprep.subr.bf16.mxu0 %v5418_v53  ;;  %5359 = vmatprep.subr.bf16.mxu1 %v5419_v55 }
 0x387   :  { %5338 = vmatpush3.bf16.msra.mxu0 %v5420_v61  ;;  %5360 = vmatpush3.bf16.msra.mxu1 %v5421_v30 }
 0x388   :  { %5339 = vmatprep.subr.bf16.mxu0 %v5422_v63  ;;  %5361 = vmatprep.subr.bf16.mxu1 %v5423_v0 }
 0x38b   :  { %5340 = vmatpush3.bf16.msra.mxu0 %v5424_v25  ;;  %5362 = vmatpush3.bf16.msra.mxu1 %v5425_v3 }
 0x38c   :  { %5341 = vmatprep.subr.bf16.mxu0 %v5426_v7  ;;  %5363 = vmatprep.subr.bf16.mxu1 %v5427_v8 }
 0x38f   :  { %5342 = vmatpush3.bf16.msra.mxu0 %v5428_v12  ;;  %5364 = vmatpush3.bf16.msra.mxu1 %v5429_v56 }
 0x390   :  { %5343 = vmatprep.subr.bf16.mxu0 %v5430_v20  ;;  %5365 = vmatprep.subr.bf16.mxu1 %v5431_v23 }
 0x393   :  { %5344 = vmatpush3.bf16.msra.mxu0 %v5432_v17  ;;  %5366 = vmatpush3.bf16.msra.mxu1 %v5433_v35 }
 0x394   :  { %5345 = vmatprep.subr.bf16.mxu0 %v5434_v29  ;;  %5367 = vmatprep.subr.bf16.mxu1 %v5435_v49 }
 0x397   :  { %5346 = vmatpush3.bf16.msra.mxu0 %v5436_v14  ;;  %5368 = vmatpush3.bf16.msra.mxu1 %v5437_v11 }
 0x398   :  { %5347 = vmatprep.subr.bf16.mxu0 %v5438_v59  ;;  %5369 = vmatprep.subr.bf16.mxu1 %v5439_v34 }
 0x39b   :  { %5348 = vmatpush3.bf16.msra.mxu0 %v5440_v50  ;;  %5370 = vmatpush3.bf16.msra.mxu1 %v5441_v16 }
 0x39e   :  { %4636 = vmatmul.mubr.bf16.vlgmr.msra.gmra.mxu0 %v4003_v27  ;;  %4676 = vmatmul.mubr.bf16.vlgmr.msra.gmra.mxu1 %v4005_v28 }
 0x43e   :  { %v5305_v60 = vpop.f32.mrf.mxu0  ;;  %v5327_v32 = vpop.f32.mrf.mxu1 }
 0x440   :  { %v5306_v62 = vpop.f32.mrf.mxu0  ;;  %v5328_v33 = vpop.f32.mrf.mxu1 }
 0x441   :  { %v5307_v58 = vadd.f32 %v5306_v62, %v5305_v60  ;;  %v5329_v54 = vadd.f32 %v5328_v33, %v5327_v32 }
 0x442   :  { %v5308_v36 = vpop.f32.mrf.mxu0  ;;  %v5330_v37 = vpop.f32.mrf.mxu1 }
 0x443   :  { %v4558_v41 = vadd.f32 %v5307_v58, %v5224_v40 }
 0x444   :  { %v5309_v38 = vpop.f32.mrf.mxu0  ;;  %v5331_v39 = vpop.f32.mrf.mxu1 }
 0x445   :  { %v4598_v10 = vadd.f32 %v5329_v54, %v4558_v41 }
 0x45e   :  { %v5349_v42 = vpop.f32.mrf.mxu0  ;;  %v5371_v2 = vpop.f32.mrf.mxu1 }
 0x460   :  { %v5350_v43 = vpop.f32.mrf.mxu0  ;;  %v5372_v44 = vpop.f32.mrf.mxu1 }
 0x461   :  { %v5351_v45 = vadd.f32 %v5350_v43, %v5349_v42  ;;  %v5373_v22 = vadd.f32 %v5372_v44, %v5371_v2 }
 0x462   :  { %v5352_v1 = vpop.f32.mrf.mxu0  ;;  %v5374_v46 = vpop.f32.mrf.mxu1 }
 0x463   :  { %v4638_v13 = vadd.f32 %v5351_v45, %v4598_v10 }
 0x464   :  { %v5353_v52 = vpop.f32.mrf.mxu0  ;;  %v5375_v9 = vpop.f32.mrf.mxu1 }
 0x465   :  { %v4678_v53 = vadd.f32 %v5373_v22, %v4638_v13 }
 0x467   :  { %4683 = vst [vmem:[%s7483_s6] sm:$0xff] %v4678_v53  ;;  %4684 = vmax.xlane.f32.xlu1 %v4678_v53 }
 0x4f0   :  { %v4685_v55 = vpop.xlane.xlu1 %4684 }
 0x4f1   :  { %v4686_v61 = vsub.f32 %v4678_v53, %v4685_v55 }
 0x4f3   :  { %v4687_v30 = vmul.f32 1.442695, %v4686_v61 }
 0x4f5   :  { %5444 = vpow2.f32 %v4687_v30 }
 0x502   :  { %v5445_v63 = vpop.eup %5444 }
 0x503   :  { %4689 = vadd.xlane.f32.xlu1 %v5445_v63 }
 0x58c   :  { %v4690_v0 = vpop.xlane.xlu1 %4689 }
 0x58d   :  { %5446 = vrcp.f32 %v4690_v0 }
 0x59a   :  { %v5447_v25 = vpop.eup %5446 }
 0x59b   :  { %v4692_v3 = vmul.f32 %v5447_v25, %v5445_v63 }
 0x59d   :  { %4693 = vst [vmem:[%s7484_s7] sm:$0xff] %v4692_v3 }

</bundles_post_ra>
